<compile_context>
chip_gen: v7x
topology: tpu7x:2x2x1
jax: 0.10.0
libtpu: 0.0.40
codegen_flags: <defaults>
</compile_context>

<pallas_src>
import functools

import jax
import jax.numpy as jnp
import numpy as np
from jax.experimental import pallas as pl
from jax.experimental.pallas import tpu as pltpu

# ----------------------------- synthetic TN config (small) -----------------------------
N_SITES = 8     # number of MPS sites ("qubits")
PHYS = 2        # physical dimension
BOND = 4        # max bond dimension D
N_TARGETS = 3   # number of target states psi_tar


# ----------------------------------- plain JAX glue ------------------------------------
def mps_bond_dims(n, p, d):
    return [min(p ** i, p ** (n - i), d) for i in range(n + 1)]


def random_complex(key, shape):
    kr, ki = jax.random.split(key)
    re = jax.random.normal(kr, shape, jnp.float32)
    im = jax.random.normal(ki, shape, jnp.float32)
    return (re + 1j * im).astype(jnp.complex64)


def isometrize_qr(t):
    """quimb TensorNetwork.isometrize(method='qr') per-tensor equivalent:
    matricize over (left_bond, phys) x (right_bond), QR, keep phase-fixed Q."""
    l, p, r = t.shape
    mat = t.reshape(l * p, r)
    q, rr = jnp.linalg.qr(mat, mode="reduced")
    d = jnp.diagonal(rr)
    s = jnp.where(jnp.abs(d) > 0, d / (jnp.abs(d) + 1e-30), jnp.ones_like(d))
    q = q * s[None, :]
    return q.reshape(l, p, r)


def pad_site(t, D):
    """Zero-pad a (l, p, r) site tensor to a uniform (D, p, D) tile (zeros are REQUIRED)."""
    l, p, r = t.shape
    out = jnp.zeros((D, p, D), t.dtype)
    return out.at[:l, :, :r].set(t)


def embed_complex(z):
    """rho(z): complex (..., m, k) -> real float32 (..., 2m, 2k) = [[Re,-Im],[Im,Re]].
    Matrix products of embeddings equal embeddings of complex matrix products."""
    zr = jnp.real(z).astype(jnp.float32)
    zi = jnp.imag(z).astype(jnp.float32)
    top = jnp.concatenate([zr, -zi], axis=-1)
    bot = jnp.concatenate([zi, zr], axis=-1)
    return jnp.concatenate([top, bot], axis=-2)


def psi_embedded(psi_tensors, D, p):
    """Isometrize, pad, and lay out psi as (N, 2D, p*2D):
    per site the p per-physical-index complex embeddings rho(A_s) side by side along lanes,
    so the in-kernel step-1 update is ONE real (2MD,2D)x(2D,p*2D) matmul."""
    mats = []
    for t in psi_tensors:
        tp = pad_site(isometrize_qr(t), D)                      # (D, p, D) complex = (b, s, d)
        mats.append(jnp.concatenate([embed_complex(tp[:, s, :]) for s in range(p)], axis=-1))
    return jnp.stack(mats, axis=0)                              # (N, 2D, p*2D) f32


def targets_blockdiag_embedded(psi_tar_list, D, p):
    """Targets laid out as (N, p, 2*M*D, 2*M*D) real embeddings of the CONJ-TRANSPOSED
    block-diagonal matrices BigB[n,s]^H (block m = B_m_n[:, s, :]^H), so the kernel updates
    the transfer matrices of all M targets with plain (non-transposed) matmuls."""
    M = len(psi_tar_list)
    N = len(psi_tar_list[0])
    big_h = jnp.zeros((N, p, M * D, M * D), jnp.complex64)
    for m, tar in enumerate(psi_tar_list):
        for n, t in enumerate(tar):
            tp = pad_site(isometrize_qr(t), D)                  # (D, p, D) = (a, s, c)
            blk_h = jnp.conj(jnp.transpose(tp, (1, 2, 0)))      # (s, c, a) = B_s^H
            big_h = big_h.at[n, :, m * D:(m + 1) * D, m * D:(m + 1) * D].set(blk_h)
    return embed_complex(big_h)                                 # (N, p, 2MD, 2MD) f32


def e0_embedded(M, D):
    """rho(E_0) for E_0 = M stacked DxD identities (initial transfer matrix of every target)."""
    e0 = jnp.tile(jnp.eye(D, dtype=jnp.complex64), (M, 1))      # (M*D, D) complex
    return embed_complex(e0)                                    # (2MD, 2D) f32


# ----------------------------------- Pallas kernel -------------------------------------
def _overlap_kernel(e0_ref, psi_ref, tarh_ref, out_ref, *, N, M, D, p):
    """Single invocation (no grid).  Carries rho(E) (2*M*D, 2*D) over the N sites:
        T  = rho(E) @ [rho(A_0) | rho(A_1) | ...]   -- 1 real matmul (complex + phys fused)
        E' = sum_s rho(BigB_s^H) @ rho(T_s)         -- p real matmuls, block-diag over targets
    Only E[m*D, 0] survives the zero-padded boundary bonds == <psi_tar_m | psi>."""
    MD2 = 2 * M * D
    D2 = 2 * D

    e = e0_ref[...]                                             # (2MD, 2D) f32
    for n in range(N):                                          # static unroll (N = 8, tiny)
        t = jnp.dot(e, psi_ref[n], preferred_element_type=jnp.float32)   # (2MD, p*2D)
        new_e = jnp.zeros((MD2, D2), jnp.float32)
        for s in range(p):                                      # static unroll (p = 2)
            new_e = new_e + jnp.dot(tarh_ref[n, s],             # (2MD, 2MD) prepacked B_s^H
                                    t[:, s * D2:(s + 1) * D2],  # (2MD, 2D) static lane slice
                                    preferred_element_type=jnp.float32)
        e = new_e
    out_ref[...] = e                                            # single tiny writeback, once


def mps_overlaps_pallas(e0_emb, psi_emb, tarh_emb, *, M, D, p):
    """Returns (ov_re, ov_im), each shape (M,):  <psi_tar_m | psi>."""
    N = psi_emb.shape[0]
    kernel = functools.partial(_overlap_kernel, N=N, M=M, D=D, p=p)
    vmem = pltpu.MemorySpace.VMEM
    out = pl.pallas_call(
        kernel,
        out_shape=jax.ShapeDtypeStruct((2 * M * D, 2 * D), jnp.float32),
        in_specs=[pl.BlockSpec(memory_space=vmem) for _ in range(3)],
        out_specs=pl.BlockSpec(memory_space=vmem),
    )(e0_emb, psi_emb, tarh_emb)
    md = M * D
    ov_re = out[:md, 0].reshape(M, D)[:, 0]                     # Re(E)[m*D, 0]
    ov_im = out[md:, 0].reshape(M, D)[:, 0]                     # Im(E)[m*D, 0]
    return ov_re, ov_im


# ------------------------------------ model wrapper ------------------------------------
@functools.partial(jax.jit, static_argnames=("M", "D", "p"))
def _forward_impl(psi_list, e0_emb, tarh_emb, *, M, D, p):
    # psi = unpack(params); psi = psi.isometrize(method='qr')   (preprocessing glue, plain JAX)
    psi_emb = psi_embedded(psi_list, D, p)
    ov_re, ov_im = mps_overlaps_pallas(e0_emb, psi_emb, tarh_emb, M=M, D=D, p=p)
    overlaps = 1.0 - (ov_re ** 2 + ov_im ** 2)                  # 1 - |<psi_tar_i|psi>|^2
    return jnp.mean(overlaps)                                   # sum(...) / len(...)


class TNModelJax:
    """JAX/Pallas equivalent of TNModel: params = MPS site tensors of psi (the 'packed'
    tensor network), targets are fixed normalized states prepared once in __init__."""

    def __init__(self, psi_tensors, psi_tar_list):
        # qtn.pack(psi) -> parameter dict
        self.params = {i: t for i, t in enumerate(psi_tensors)}
        self.M = len(psi_tar_list)
        # Targets: isometrize once (=> normalized), pad, block-diag, conj-transpose, embed.
        self.tarh_emb = targets_blockdiag_embedded(psi_tar_list, BOND, PHYS)
        # Embedded stacked identities — initial transfer matrix (hoisted, host-side).
        self.e0_emb = e0_embedded(self.M, BOND)

    def forward(self):
        psi_list = [self.params[i] for i in range(len(self.params))]
        return _forward_impl(psi_list, self.e0_emb, self.tarh_emb,
                             M=self.M, D=BOND, p=PHYS)


# --------------------------------- pure-JAX reference ----------------------------------
def loss_reference(psi_tensors, psi_tar_list):
    iso = [isometrize_qr(t) for t in psi_tensors]
    losses = []
    for tar in psi_tar_list:
        tar_iso = [isometrize_qr(t) for t in tar]
        E = jnp.ones((1, 1), jnp.complex64)
        for B, A in zip(tar_iso, iso):
            E = jnp.einsum("ab,asc,bsd->cd", E, jnp.conj(B), A)
        losses.append(1.0 - jnp.abs(E[0, 0]) ** 2)
    return jnp.mean(jnp.stack(losses))


# ----------------------------------------- main -----------------------------------------
if __name__ == "__main__":
    key = jax.random.PRNGKey(0)
    bonds = mps_bond_dims(N_SITES, PHYS, BOND)
    keys = jax.random.split(key, 1 + N_TARGETS)

    psi_keys = jax.random.split(keys[0], N_SITES)
    psi = [random_complex(psi_keys[i], (bonds[i], PHYS, bonds[i + 1]))
           for i in range(N_SITES)]

    psi_tars = []
    for m in range(N_TARGETS):
        tk = jax.random.split(keys[1 + m], N_SITES)
        psi_tars.append([random_complex(tk[i], (bonds[i], PHYS, bonds[i + 1]))
                         for i in range(N_SITES)])

    model = TNModelJax(psi, psi_tars)
    loss = jax.block_until_ready(model.forward())
    ref = jax.block_until_ready(loss_reference(psi, psi_tars))

    assert np.isfinite(float(loss)), float(loss)
    assert abs(float(loss) - float(ref)) < 5e-2, (float(loss), float(ref))
    print("KERNEL_OK")
</pallas_src>

<mosaic_0001>
module attributes {stable_mosaic.version = 11 : i64} {
  func.func @_overlap_kernel(%arg0: memref<24x8xf32, #tpu.memory_space<vmem>>, %arg1: memref<8x8x16xf32, #tpu.memory_space<vmem>>, %arg2: memref<8x2x24x24xf32, #tpu.memory_space<vmem>>, %arg3: memref<24x8xf32, #tpu.memory_space<vmem>>) attributes {dimension_semantics = [], scalar_prefetch = 0 : i64, scratch_operands = 0 : i64, tpu.core_type = #tpu.core_type<tc>} {
    %c0 = arith.constant 0 : index
    %c0_0 = arith.constant 0 : index
    %0 = vector.load %arg0[%c0, %c0_0] : memref<24x8xf32, #tpu.memory_space<vmem>>, vector<24x8xf32>
    %c0_1 = arith.constant 0 : index
    %c0_2 = arith.constant 0 : index
    %c0_3 = arith.constant 0 : index
    %1 = vector.load %arg1[%c0_1, %c0_2, %c0_3] : memref<8x8x16xf32, #tpu.memory_space<vmem>>, vector<1x8x16xf32>
    %2 = vector.shape_cast %1 : vector<1x8x16xf32> to vector<8x16xf32>
    %cst = arith.constant dense<0.000000e+00> : vector<24x16xf32>
    %3 = tpu.matmul %0, %2, %cst {dimension_numbers = #tpu.dot_dimension_numbers<[1], [0], [0], [1], [0, 0, 1, 1], [], []>} : vector<24x8xf32>, vector<8x16xf32>, vector<24x16xf32> -> vector<24x16xf32>
    %cst_4 = arith.constant 0.000000e+00 : f32
    %4 = vector.broadcast %cst_4 : f32 to vector<24x8xf32>
    %c0_5 = arith.constant 0 : index
    %c0_6 = arith.constant 0 : index
    %c0_7 = arith.constant 0 : index
    %c0_8 = arith.constant 0 : index
    %5 = vector.load %arg2[%c0_5, %c0_6, %c0_7, %c0_8] : memref<8x2x24x24xf32, #tpu.memory_space<vmem>>, vector<1x1x24x24xf32>
    %6 = vector.shape_cast %5 : vector<1x1x24x24xf32> to vector<24x24xf32>
    %7 = vector.extract_strided_slice %3 {offsets = [0, 0], sizes = [24, 8], strides = [1, 1]} : vector<24x16xf32> to vector<24x8xf32>
    %cst_9 = arith.constant dense<0.000000e+00> : vector<24x8xf32>
    %8 = tpu.matmul %6, %7, %cst_9 {dimension_numbers = #tpu.dot_dimension_numbers<[1], [0], [0], [1], [0, 0, 1, 1], [], []>} : vector<24x24xf32>, vector<24x8xf32>, vector<24x8xf32> -> vector<24x8xf32>
    %9 = arith.addf %4, %8 : vector<24x8xf32>
    %c0_10 = arith.constant 0 : index
    %c1 = arith.constant 1 : index
    %c0_11 = arith.constant 0 : index
    %c0_12 = arith.constant 0 : index
    %10 = vector.load %arg2[%c0_10, %c1, %c0_11, %c0_12] : memref<8x2x24x24xf32, #tpu.memory_space<vmem>>, vector<1x1x24x24xf32>
    %11 = vector.shape_cast %10 : vector<1x1x24x24xf32> to vector<24x24xf32>
    %12 = vector.extract_strided_slice %3 {offsets = [0, 8], sizes = [24, 8], strides = [1, 1]} : vector<24x16xf32> to vector<24x8xf32>
    %cst_13 = arith.constant dense<0.000000e+00> : vector<24x8xf32>
    %13 = tpu.matmul %11, %12, %cst_13 {dimension_numbers = #tpu.dot_dimension_numbers<[1], [0], [0], [1], [0, 0, 1, 1], [], []>} : vector<24x24xf32>, vector<24x8xf32>, vector<24x8xf32> -> vector<24x8xf32>
    %14 = arith.addf %9, %13 : vector<24x8xf32>
    %c1_14 = arith.constant 1 : index
    %c0_15 = arith.constant 0 : index
    %c0_16 = arith.constant 0 : index
    %15 = vector.load %arg1[%c1_14, %c0_15, %c0_16] : memref<8x8x16xf32, #tpu.memory_space<vmem>>, vector<1x8x16xf32>
    %16 = vector.shape_cast %15 : vector<1x8x16xf32> to vector<8x16xf32>
    %cst_17 = arith.constant dense<0.000000e+00> : vector<24x16xf32>
    %17 = tpu.matmul %14, %16, %cst_17 {dimension_numbers = #tpu.dot_dimension_numbers<[1], [0], [0], [1], [0, 0, 1, 1], [], []>} : vector<24x8xf32>, vector<8x16xf32>, vector<24x16xf32> -> vector<24x16xf32>
    %cst_18 = arith.constant 0.000000e+00 : f32
    %18 = vector.broadcast %cst_18 : f32 to vector<24x8xf32>
    %c1_19 = arith.constant 1 : index
    %c0_20 = arith.constant 0 : index
    %c0_21 = arith.constant 0 : index
    %c0_22 = arith.constant 0 : index
    %19 = vector.load %arg2[%c1_19, %c0_20, %c0_21, %c0_22] : memref<8x2x24x24xf32, #tpu.memory_space<vmem>>, vector<1x1x24x24xf32>
    %20 = vector.shape_cast %19 : vector<1x1x24x24xf32> to vector<24x24xf32>
    %21 = vector.extract_strided_slice %17 {offsets = [0, 0], sizes = [24, 8], strides = [1, 1]} : vector<24x16xf32> to vector<24x8xf32>
    %cst_23 = arith.constant dense<0.000000e+00> : vector<24x8xf32>
    %22 = tpu.matmul %20, %21, %cst_23 {dimension_numbers = #tpu.dot_dimension_numbers<[1], [0], [0], [1], [0, 0, 1, 1], [], []>} : vector<24x24xf32>, vector<24x8xf32>, vector<24x8xf32> -> vector<24x8xf32>
    %23 = arith.addf %18, %22 : vector<24x8xf32>
    %c1_24 = arith.constant 1 : index
    %c1_25 = arith.constant 1 : index
    %c0_26 = arith.constant 0 : index
    %c0_27 = arith.constant 0 : index
    %24 = vector.load %arg2[%c1_24, %c1_25, %c0_26, %c0_27] : memref<8x2x24x24xf32, #tpu.memory_space<vmem>>, vector<1x1x24x24xf32>
    %25 = vector.shape_cast %24 : vector<1x1x24x24xf32> to vector<24x24xf32>
    %26 = vector.extract_strided_slice %17 {offsets = [0, 8], sizes = [24, 8], strides = [1, 1]} : vector<24x16xf32> to vector<24x8xf32>
    %cst_28 = arith.constant dense<0.000000e+00> : vector<24x8xf32>
    %27 = tpu.matmul %25, %26, %cst_28 {dimension_numbers = #tpu.dot_dimension_numbers<[1], [0], [0], [1], [0, 0, 1, 1], [], []>} : vector<24x24xf32>, vector<24x8xf32>, vector<24x8xf32> -> vector<24x8xf32>
    %28 = arith.addf %23, %27 : vector<24x8xf32>
    %c2 = arith.constant 2 : index
    %c0_29 = arith.constant 0 : index
    %c0_30 = arith.constant 0 : index
    %29 = vector.load %arg1[%c2, %c0_29, %c0_30] : memref<8x8x16xf32, #tpu.memory_space<vmem>>, vector<1x8x16xf32>
    %30 = vector.shape_cast %29 : vector<1x8x16xf32> to vector<8x16xf32>
    %cst_31 = arith.constant dense<0.000000e+00> : vector<24x16xf32>
    %31 = tpu.matmul %28, %30, %cst_31 {dimension_numbers = #tpu.dot_dimension_numbers<[1], [0], [0], [1], [0, 0, 1, 1], [], []>} : vector<24x8xf32>, vector<8x16xf32>, vector<24x16xf32> -> vector<24x16xf32>
    %cst_32 = arith.constant 0.000000e+00 : f32
    %32 = vector.broadcast %cst_32 : f32 to vector<24x8xf32>
    %c2_33 = arith.constant 2 : index
    %c0_34 = arith.constant 0 : index
    %c0_35 = arith.constant 0 : index
    %c0_36 = arith.constant 0 : index
    %33 = vector.load %arg2[%c2_33, %c0_34, %c0_35, %c0_36] : memref<8x2x24x24xf32, #tpu.memory_space<vmem>>, vector<1x1x24x24xf32>
    %34 = vector.shape_cast %33 : vector<1x1x24x24xf32> to vector<24x24xf32>
    %35 = vector.extract_strided_slice %31 {offsets = [0, 0], sizes = [24, 8], strides = [1, 1]} : vector<24x16xf32> to vector<24x8xf32>
    %cst_37 = arith.constant dense<0.000000e+00> : vector<24x8xf32>
    %36 = tpu.matmul %34, %35, %cst_37 {dimension_numbers = #tpu.dot_dimension_numbers<[1], [0], [0], [1], [0, 0, 1, 1], [], []>} : vector<24x24xf32>, vector<24x8xf32>, vector<24x8xf32> -> vector<24x8xf32>
    %37 = arith.addf %32, %36 : vector<24x8xf32>
    %c2_38 = arith.constant 2 : index
    %c1_39 = arith.constant 1 : index
    %c0_40 = arith.constant 0 : index
    %c0_41 = arith.constant 0 : index
    %38 = vector.load %arg2[%c2_38, %c1_39, %c0_40, %c0_41] : memref<8x2x24x24xf32, #tpu.memory_space<vmem>>, vector<1x1x24x24xf32>
    %39 = vector.shape_cast %38 : vector<1x1x24x24xf32> to vector<24x24xf32>
    %40 = vector.extract_strided_slice %31 {offsets = [0, 8], sizes = [24, 8], strides = [1, 1]} : vector<24x16xf32> to vector<24x8xf32>
    %cst_42 = arith.constant dense<0.000000e+00> : vector<24x8xf32>
    %41 = tpu.matmul %39, %40, %cst_42 {dimension_numbers = #tpu.dot_dimension_numbers<[1], [0], [0], [1], [0, 0, 1, 1], [], []>} : vector<24x24xf32>, vector<24x8xf32>, vector<24x8xf32> -> vector<24x8xf32>
    %42 = arith.addf %37, %41 : vector<24x8xf32>
    %c3 = arith.constant 3 : index
    %c0_43 = arith.constant 0 : index
    %c0_44 = arith.constant 0 : index
    %43 = vector.load %arg1[%c3, %c0_43, %c0_44] : memref<8x8x16xf32, #tpu.memory_space<vmem>>, vector<1x8x16xf32>
    %44 = vector.shape_cast %43 : vector<1x8x16xf32> to vector<8x16xf32>
    %cst_45 = arith.constant dense<0.000000e+00> : vector<24x16xf32>
    %45 = tpu.matmul %42, %44, %cst_45 {dimension_numbers = #tpu.dot_dimension_numbers<[1], [0], [0], [1], [0, 0, 1, 1], [], []>} : vector<24x8xf32>, vector<8x16xf32>, vector<24x16xf32> -> vector<24x16xf32>
    %cst_46 = arith.constant 0.000000e+00 : f32
    %46 = vector.broadcast %cst_46 : f32 to vector<24x8xf32>
    %c3_47 = arith.constant 3 : index
    %c0_48 = arith.constant 0 : index
    %c0_49 = arith.constant 0 : index
    %c0_50 = arith.constant 0 : index
    %47 = vector.load %arg2[%c3_47, %c0_48, %c0_49, %c0_50] : memref<8x2x24x24xf32, #tpu.memory_space<vmem>>, vector<1x1x24x24xf32>
    %48 = vector.shape_cast %47 : vector<1x1x24x24xf32> to vector<24x24xf32>
    %49 = vector.extract_strided_slice %45 {offsets = [0, 0], sizes = [24, 8], strides = [1, 1]} : vector<24x16xf32> to vector<24x8xf32>
    %cst_51 = arith.constant dense<0.000000e+00> : vector<24x8xf32>
    %50 = tpu.matmul %48, %49, %cst_51 {dimension_numbers = #tpu.dot_dimension_numbers<[1], [0], [0], [1], [0, 0, 1, 1], [], []>} : vector<24x24xf32>, vector<24x8xf32>, vector<24x8xf32> -> vector<24x8xf32>
    %51 = arith.addf %46, %50 : vector<24x8xf32>
    %c3_52 = arith.constant 3 : index
    %c1_53 = arith.constant 1 : index
    %c0_54 = arith.constant 0 : index
    %c0_55 = arith.constant 0 : index
    %52 = vector.load %arg2[%c3_52, %c1_53, %c0_54, %c0_55] : memref<8x2x24x24xf32, #tpu.memory_space<vmem>>, vector<1x1x24x24xf32>
    %53 = vector.shape_cast %52 : vector<1x1x24x24xf32> to vector<24x24xf32>
    %54 = vector.extract_strided_slice %45 {offsets = [0, 8], sizes = [24, 8], strides = [1, 1]} : vector<24x16xf32> to vector<24x8xf32>
    %cst_56 = arith.constant dense<0.000000e+00> : vector<24x8xf32>
    %55 = tpu.matmul %53, %54, %cst_56 {dimension_numbers = #tpu.dot_dimension_numbers<[1], [0], [0], [1], [0, 0, 1, 1], [], []>} : vector<24x24xf32>, vector<24x8xf32>, vector<24x8xf32> -> vector<24x8xf32>
    %56 = arith.addf %51, %55 : vector<24x8xf32>
    %c4 = arith.constant 4 : index
    %c0_57 = arith.constant 0 : index
    %c0_58 = arith.constant 0 : index
    %57 = vector.load %arg1[%c4, %c0_57, %c0_58] : memref<8x8x16xf32, #tpu.memory_space<vmem>>, vector<1x8x16xf32>
    %58 = vector.shape_cast %57 : vector<1x8x16xf32> to vector<8x16xf32>
    %cst_59 = arith.constant dense<0.000000e+00> : vector<24x16xf32>
    %59 = tpu.matmul %56, %58, %cst_59 {dimension_numbers = #tpu.dot_dimension_numbers<[1], [0], [0], [1], [0, 0, 1, 1], [], []>} : vector<24x8xf32>, vector<8x16xf32>, vector<24x16xf32> -> vector<24x16xf32>
    %cst_60 = arith.constant 0.000000e+00 : f32
    %60 = vector.broadcast %cst_60 : f32 to vector<24x8xf32>
    %c4_61 = arith.constant 4 : index
    %c0_62 = arith.constant 0 : index
    %c0_63 = arith.constant 0 : index
    %c0_64 = arith.constant 0 : index
    %61 = vector.load %arg2[%c4_61, %c0_62, %c0_63, %c0_64] : memref<8x2x24x24xf32, #tpu.memory_space<vmem>>, vector<1x1x24x24xf32>
    %62 = vector.shape_cast %61 : vector<1x1x24x24xf32> to vector<24x24xf32>
    %63 = vector.extract_strided_slice %59 {offsets = [0, 0], sizes = [24, 8], strides = [1, 1]} : vector<24x16xf32> to vector<24x8xf32>
    %cst_65 = arith.constant dense<0.000000e+00> : vector<24x8xf32>
    %64 = tpu.matmul %62, %63, %cst_65 {dimension_numbers = #tpu.dot_dimension_numbers<[1], [0], [0], [1], [0, 0, 1, 1], [], []>} : vector<24x24xf32>, vector<24x8xf32>, vector<24x8xf32> -> vector<24x8xf32>
    %65 = arith.addf %60, %64 : vector<24x8xf32>
    %c4_66 = arith.constant 4 : index
    %c1_67 = arith.constant 1 : index
    %c0_68 = arith.constant 0 : index
    %c0_69 = arith.constant 0 : index
    %66 = vector.load %arg2[%c4_66, %c1_67, %c0_68, %c0_69] : memref<8x2x24x24xf32, #tpu.memory_space<vmem>>, vector<1x1x24x24xf32>
    %67 = vector.shape_cast %66 : vector<1x1x24x24xf32> to vector<24x24xf32>
    %68 = vector.extract_strided_slice %59 {offsets = [0, 8], sizes = [24, 8], strides = [1, 1]} : vector<24x16xf32> to vector<24x8xf32>
    %cst_70 = arith.constant dense<0.000000e+00> : vector<24x8xf32>
    %69 = tpu.matmul %67, %68, %cst_70 {dimension_numbers = #tpu.dot_dimension_numbers<[1], [0], [0], [1], [0, 0, 1, 1], [], []>} : vector<24x24xf32>, vector<24x8xf32>, vector<24x8xf32> -> vector<24x8xf32>
    %70 = arith.addf %65, %69 : vector<24x8xf32>
    %c5 = arith.constant 5 : index
    %c0_71 = arith.constant 0 : index
    %c0_72 = arith.constant 0 : index
    %71 = vector.load %arg1[%c5, %c0_71, %c0_72] : memref<8x8x16xf32, #tpu.memory_space<vmem>>, vector<1x8x16xf32>
    %72 = vector.shape_cast %71 : vector<1x8x16xf32> to vector<8x16xf32>
    %cst_73 = arith.constant dense<0.000000e+00> : vector<24x16xf32>
    %73 = tpu.matmul %70, %72, %cst_73 {dimension_numbers = #tpu.dot_dimension_numbers<[1], [0], [0], [1], [0, 0, 1, 1], [], []>} : vector<24x8xf32>, vector<8x16xf32>, vector<24x16xf32> -> vector<24x16xf32>
    %cst_74 = arith.constant 0.000000e+00 : f32
    %74 = vector.broadcast %cst_74 : f32 to vector<24x8xf32>
    %c5_75 = arith.constant 5 : index
    %c0_76 = arith.constant 0 : index
    %c0_77 = arith.constant 0 : index
    %c0_78 = arith.constant 0 : index
    %75 = vector.load %arg2[%c5_75, %c0_76, %c0_77, %c0_78] : memref<8x2x24x24xf32, #tpu.memory_space<vmem>>, vector<1x1x24x24xf32>
    %76 = vector.shape_cast %75 : vector<1x1x24x24xf32> to vector<24x24xf32>
    %77 = vector.extract_strided_slice %73 {offsets = [0, 0], sizes = [24, 8], strides = [1, 1]} : vector<24x16xf32> to vector<24x8xf32>
    %cst_79 = arith.constant dense<0.000000e+00> : vector<24x8xf32>
    %78 = tpu.matmul %76, %77, %cst_79 {dimension_numbers = #tpu.dot_dimension_numbers<[1], [0], [0], [1], [0, 0, 1, 1], [], []>} : vector<24x24xf32>, vector<24x8xf32>, vector<24x8xf32> -> vector<24x8xf32>
    %79 = arith.addf %74, %78 : vector<24x8xf32>
    %c5_80 = arith.constant 5 : index
    %c1_81 = arith.constant 1 : index
    %c0_82 = arith.constant 0 : index
    %c0_83 = arith.constant 0 : index
    %80 = vector.load %arg2[%c5_80, %c1_81, %c0_82, %c0_83] : memref<8x2x24x24xf32, #tpu.memory_space<vmem>>, vector<1x1x24x24xf32>
    %81 = vector.shape_cast %80 : vector<1x1x24x24xf32> to vector<24x24xf32>
    %82 = vector.extract_strided_slice %73 {offsets = [0, 8], sizes = [24, 8], strides = [1, 1]} : vector<24x16xf32> to vector<24x8xf32>
    %cst_84 = arith.constant dense<0.000000e+00> : vector<24x8xf32>
    %83 = tpu.matmul %81, %82, %cst_84 {dimension_numbers = #tpu.dot_dimension_numbers<[1], [0], [0], [1], [0, 0, 1, 1], [], []>} : vector<24x24xf32>, vector<24x8xf32>, vector<24x8xf32> -> vector<24x8xf32>
    %84 = arith.addf %79, %83 : vector<24x8xf32>
    %c6 = arith.constant 6 : index
    %c0_85 = arith.constant 0 : index
    %c0_86 = arith.constant 0 : index
    %85 = vector.load %arg1[%c6, %c0_85, %c0_86] : memref<8x8x16xf32, #tpu.memory_space<vmem>>, vector<1x8x16xf32>
    %86 = vector.shape_cast %85 : vector<1x8x16xf32> to vector<8x16xf32>
    %cst_87 = arith.constant dense<0.000000e+00> : vector<24x16xf32>
    %87 = tpu.matmul %84, %86, %cst_87 {dimension_numbers = #tpu.dot_dimension_numbers<[1], [0], [0], [1], [0, 0, 1, 1], [], []>} : vector<24x8xf32>, vector<8x16xf32>, vector<24x16xf32> -> vector<24x16xf32>
    %cst_88 = arith.constant 0.000000e+00 : f32
    %88 = vector.broadcast %cst_88 : f32 to vector<24x8xf32>
    %c6_89 = arith.constant 6 : index
    %c0_90 = arith.constant 0 : index
    %c0_91 = arith.constant 0 : index
    %c0_92 = arith.constant 0 : index
    %89 = vector.load %arg2[%c6_89, %c0_90, %c0_91, %c0_92] : memref<8x2x24x24xf32, #tpu.memory_space<vmem>>, vector<1x1x24x24xf32>
    %90 = vector.shape_cast %89 : vector<1x1x24x24xf32> to vector<24x24xf32>
    %91 = vector.extract_strided_slice %87 {offsets = [0, 0], sizes = [24, 8], strides = [1, 1]} : vector<24x16xf32> to vector<24x8xf32>
    %cst_93 = arith.constant dense<0.000000e+00> : vector<24x8xf32>
    %92 = tpu.matmul %90, %91, %cst_93 {dimension_numbers = #tpu.dot_dimension_numbers<[1], [0], [0], [1], [0, 0, 1, 1], [], []>} : vector<24x24xf32>, vector<24x8xf32>, vector<24x8xf32> -> vector<24x8xf32>
    %93 = arith.addf %88, %92 : vector<24x8xf32>
    %c6_94 = arith.constant 6 : index
    %c1_95 = arith.constant 1 : index
    %c0_96 = arith.constant 0 : index
    %c0_97 = arith.constant 0 : index
    %94 = vector.load %arg2[%c6_94, %c1_95, %c0_96, %c0_97] : memref<8x2x24x24xf32, #tpu.memory_space<vmem>>, vector<1x1x24x24xf32>
    %95 = vector.shape_cast %94 : vector<1x1x24x24xf32> to vector<24x24xf32>
    %96 = vector.extract_strided_slice %87 {offsets = [0, 8], sizes = [24, 8], strides = [1, 1]} : vector<24x16xf32> to vector<24x8xf32>
    %cst_98 = arith.constant dense<0.000000e+00> : vector<24x8xf32>
    %97 = tpu.matmul %95, %96, %cst_98 {dimension_numbers = #tpu.dot_dimension_numbers<[1], [0], [0], [1], [0, 0, 1, 1], [], []>} : vector<24x24xf32>, vector<24x8xf32>, vector<24x8xf32> -> vector<24x8xf32>
    %98 = arith.addf %93, %97 : vector<24x8xf32>
    %c7 = arith.constant 7 : index
    %c0_99 = arith.constant 0 : index
    %c0_100 = arith.constant 0 : index
    %99 = vector.load %arg1[%c7, %c0_99, %c0_100] : memref<8x8x16xf32, #tpu.memory_space<vmem>>, vector<1x8x16xf32>
    %100 = vector.shape_cast %99 : vector<1x8x16xf32> to vector<8x16xf32>
    %cst_101 = arith.constant dense<0.000000e+00> : vector<24x16xf32>
    %101 = tpu.matmul %98, %100, %cst_101 {dimension_numbers = #tpu.dot_dimension_numbers<[1], [0], [0], [1], [0, 0, 1, 1], [], []>} : vector<24x8xf32>, vector<8x16xf32>, vector<24x16xf32> -> vector<24x16xf32>
    %cst_102 = arith.constant 0.000000e+00 : f32
    %102 = vector.broadcast %cst_102 : f32 to vector<24x8xf32>
    %c7_103 = arith.constant 7 : index
    %c0_104 = arith.constant 0 : index
    %c0_105 = arith.constant 0 : index
    %c0_106 = arith.constant 0 : index
    %103 = vector.load %arg2[%c7_103, %c0_104, %c0_105, %c0_106] : memref<8x2x24x24xf32, #tpu.memory_space<vmem>>, vector<1x1x24x24xf32>
    %104 = vector.shape_cast %103 : vector<1x1x24x24xf32> to vector<24x24xf32>
    %105 = vector.extract_strided_slice %101 {offsets = [0, 0], sizes = [24, 8], strides = [1, 1]} : vector<24x16xf32> to vector<24x8xf32>
    %cst_107 = arith.constant dense<0.000000e+00> : vector<24x8xf32>
    %106 = tpu.matmul %104, %105, %cst_107 {dimension_numbers = #tpu.dot_dimension_numbers<[1], [0], [0], [1], [0, 0, 1, 1], [], []>} : vector<24x24xf32>, vector<24x8xf32>, vector<24x8xf32> -> vector<24x8xf32>
    %107 = arith.addf %102, %106 : vector<24x8xf32>
    %c7_108 = arith.constant 7 : index
    %c1_109 = arith.constant 1 : index
    %c0_110 = arith.constant 0 : index
    %c0_111 = arith.constant 0 : index
    %108 = vector.load %arg2[%c7_108, %c1_109, %c0_110, %c0_111] : memref<8x2x24x24xf32, #tpu.memory_space<vmem>>, vector<1x1x24x24xf32>
    %109 = vector.shape_cast %108 : vector<1x1x24x24xf32> to vector<24x24xf32>
    %110 = vector.extract_strided_slice %101 {offsets = [0, 8], sizes = [24, 8], strides = [1, 1]} : vector<24x16xf32> to vector<24x8xf32>
    %cst_112 = arith.constant dense<0.000000e+00> : vector<24x8xf32>
    %111 = tpu.matmul %109, %110, %cst_112 {dimension_numbers = #tpu.dot_dimension_numbers<[1], [0], [0], [1], [0, 0, 1, 1], [], []>} : vector<24x24xf32>, vector<24x8xf32>, vector<24x8xf32> -> vector<24x8xf32>
    %112 = arith.addf %107, %111 : vector<24x8xf32>
    %c0_113 = arith.constant 0 : index
    %c0_114 = arith.constant 0 : index
    %113 = vector.load %arg3[%c0_113, %c0_114] : memref<24x8xf32, #tpu.memory_space<vmem>>, vector<24x8xf32>
    tpu.vector_store %arg3[%c0_113, %c0_114], %112 {strides = array<i32>} : memref<24x8xf32, #tpu.memory_space<vmem>>, vector<24x8xf32>,
    return
  }
}

</mosaic_0001>

<bundles_post_ra>
// kernel: custom-call.14
= control target key start
LH: loop header
LB: loop body
LE: loop exit
PB: predicated region body
PF: predicated region fallthrough
CT: control target
= control target key end

     0   :  { %2 = vsyncpa [#allocation0], 0  ;;  %s61_s0 = inlined_call_operand.hbm [shape: c64[2,2,1], index: 0, kind: input, shape index: {}]   ;;  %s62_s1 = inlined_call_operand.vmem [shape: f32[2,2,1], index: 1, kind: output, shape index: {}]  }
   0x1   :  { %s3_s8 = sshll.u32 %s62_s1, 4  ;;  %s9_s11 = scalar_lea.hbm %s61_s0, 32  ;;  %s4_s8 = int_to_ptr.vmem [resolvable:$true] %s3_s8 }
   0x2   :  { %p10_p0 = scmp.ne.s32.totalorder %s61_s0, %s9_s11  ;;  %s11_s16 = scalar_lea.hbm %s61_s0, 64 }
   0x3   :  { %p12_p1 = scmp.lt.u32.totalorder %s11_s16, %s9_s11  ;;  %p13_p2 = scmp.lt.u32.totalorder %s9_s11, %s61_s0 }
   0x5   :  { %p14_p3 = por %p13_p2, %p12_p1 }
   0x7   :  { %p15_p4 = pnand %p14_p3, %p10_p0 }
   0x9   :  { %18 = shalt.err (!%p15_p4)  }
   0xa   :  { %s19_s1 = scalar_lea.vmem %s4_s8, 32  ;;  %p24_p6 = scmp.lt.s32.totalorder %s4_s8, %s4_s8 }
   0xb   :  { %p20_p5 = scmp.ne.s32.totalorder %s4_s8, %s19_s1  ;;  %p25_p7 = scmp.lt.s32.totalorder %s19_s1, %s19_s1 }
   0xd   :  { %p26_p8 = por %p25_p7, %p24_p6 }
   0xf   :  { %p27_p9 = pnand %p26_p8, %p20_p5 }
  0x11   :  { %30 = shalt.err (!%p27_p9)  }
  0x12   :  { %6 = dma.hbm_to_vmem [thread:$0]  %s61_s0, 32, %s4_s8, [#allocation0] }
  0x13   :  { %31 = dma.done.wait [#allocation0], 32  }
  0x14   :  { %32 = vsyncadd [#allocation0], 4294967264 }
  0x15   :  { %8 = vsyncpa [#allocation0], 1 }

// kernel: custom-call.15
= control target key start
LH: loop header
LB: loop body
LE: loop exit
PB: predicated region body
PF: predicated region fallthrough
CT: control target
= control target key end

     0   :  { %s59_s0 = inlined_call_operand.hbm [shape: c64[2,2,1], index: 0, kind: input, shape index: {}]   ;;  %s60_s1 = inlined_call_operand.vmem [shape: f32[2,2,1], index: 1, kind: output, shape index: {}]  }
   0x1   :  { %s2_s8 = scalar_lea.hbm %s59_s0, 32 }
   0x2   :  { %3 = vsyncpa [#allocation0], 0  ;;  %s4_s11 = sshll.u32 %s60_s1, 4  ;;  %s34_s14 = scalar_lea.hbm %s59_s0, 64  ;;  %s5_s11 = int_to_ptr.vmem [resolvable:$true] %s4_s11 }
   0x3   :  { %p11_p0 = scmp.ne.s32.totalorder %s2_s8, %s34_s14  ;;  %p13_p1 = scmp.lt.u32.totalorder %s2_s8, %s59_s0 }
   0x4   :  { %p14_p2 = scmp.lt.u32.totalorder %s34_s14, %s34_s14  ;;  %p16_p4 = scmp.lt.u32.totalorder %s34_s14, %s2_s8 }
   0x6   :  { %p15_p3 = por %p14_p2, %p13_p1 }
   0x8   :  { %p17_p5 = por %p16_p4, %p15_p3 }
   0xa   :  { %p18_p6 = pnand %p17_p5, %p11_p0 }
   0xc   :  { %21 = shalt.err (!%p18_p6)  }
   0xd   :  { %s22_s17 = scalar_lea.vmem %s5_s11, 32  ;;  %p27_p8 = scmp.lt.s32.totalorder %s5_s11, %s5_s11 }
   0xe   :  { %p23_p7 = scmp.ne.s32.totalorder %s5_s11, %s22_s17  ;;  %p28_p9 = scmp.lt.s32.totalorder %s22_s17, %s22_s17 }
  0x10   :  { %p29_p10 = por %p28_p9, %p27_p8 }
  0x12   :  { %p30_p11 = pnand %p29_p10, %p23_p7 }
  0x14   :  { %33 = shalt.err (!%p30_p11)  }
  0x15   :  { %7 = dma.hbm_to_vmem [thread:$0]  %s2_s8, 32, %s5_s11, [#allocation0] }
  0x16   :  { %35 = dma.done.wait [#allocation0], 32  }
  0x17   :  { %36 = vsyncadd [#allocation0], 4294967264 }
  0x18   :  { %9 = vsyncpa [#allocation0], 1 }

// kernel: custom-call.35
= control target key start
LH: loop header
LB: loop body
LE: loop exit
PB: predicated region body
PF: predicated region fallthrough
CT: control target
= control target key end

     0   :  { %7 = vsyncpa [#allocation10], 0  ;;  %s708_s0 = inlined_call_operand.vmem [shape: f32[4,1], index: 0, kind: input, shape index: {}]   ;;  %s709_s1 = inlined_call_operand.vmem [shape: f32[4,1], index: 1, kind: input, shape index: {}]   ;;  %s710_s2 = inlined_call_operand.vmem [shape: f32[4,1], index: 2, kind: output, shape index: {0}]   ;;  %s711_s3 = inlined_call_operand.vmem [shape: f32[4,1], index: 3, kind: output, shape index: {1}]   ;;  %s712_s4 = inlined_call_operand.hbm [shape: f32[1], index: 4, kind: output, shape index: {2}]   ;;  %s713_s5 = inlined_call_operand.hbm [shape: f32[1], index: 5, kind: output, shape index: {3}]  }
   0x1   :  { %v24_v0 = vld [vmem:[%s708_s0] sm:$0xf] }
   0x2   :  { %v55_v1 = vld [vmem:[%s709_s1] sm:$0xf]  ;;  %25 = vst [vmem:[#allocation1] sm:$0xf] %v24_v0 }
   0x3   :  { %56 = vst [vmem:[#allocation3] sm:$0xf] %v55_v1 }
   0x4   :  { %8 = vsyncpa [#allocation13], 0  ;;  %v87_v2 = vlaneseq  ;;  %v536_v6 = vmov 0.0   ;;  %s162_s0 = smov [#allocation4]  ;;  %s163_s1 = smov [#allocation6] }
   0x5   :  { %83 = vst [vmem:[#allocation8] sm:$0x1] %v536_v6  ;;  %84 = vst [vmem:[#allocation11] sm:$0x1] %v536_v6  ;;  %s537_s22 = smov [#allocation12]   ;;  %s538_s24 = smov [#allocation9]  }
   0x6   :  { %v577_v3 = vshrl.u32 %v87_v2, 7  ;;  %v609_v59 = vand.u32 127, %v87_v2  ;;  %s444_s23 = sshll.u32 %s537_s22, 4  ;;  %s434_s25 = sshll.u32 %s538_s24, 4  ;;  %s445_s23 = int_to_ptr.vmem [resolvable:$true] %s444_s23  ;;  %s435_s25 = int_to_ptr.vmem [resolvable:$true] %s434_s25 }
   0x7   :  { %s488_s26 = scalar_lea.vmem %s445_s23, 16  ;;  %s492_s27 = scalar_lea.vmem %s445_s23, 32 }
   0x8   :  { %vm90_vm0 = vcmp.gt.s32.totalorder %v577_v3, 0  ;;  %vm91_vm1 = vcmp.lt.s32.totalorder %v577_v3, 4  ;;  %v166_v3 = vmov %v577_v3  ;;  %vm220_vm12 = vcmp.eq.s32.totalorder %v609_v59, 0  ;;  %p489_p0 = scmp.ne.s32.totalorder %s445_s23, %s488_s26  ;;  %p493_p1 = scmp.lt.s32.totalorder %s445_s23, %s445_s23 }
   0x9   :  { %v73_v4 = vld [vmem:[#allocation1] sm:$0xf]  ;;  %vm92_vm2 = vmand %vm90_vm0, %vm91_vm1  ;;  %vm170_vm13 = vcmp.gt.s32.totalorder %v166_v3, 0  ;;  %vm171_vm14 = vcmp.lt.s32.totalorder %v166_v3, 4  ;;  %p494_p2 = scmp.lt.s32.totalorder %s492_s27, %s488_s26 }
   0xa   :  { %v77_v5 = vld [vmem:[#allocation3] sm:$0xf]  ;;  %74 = vst [vmem:[#allocation0] sm:$0xf] %v73_v4  ;;  %vm172_vm15 = vmand %vm170_vm13, %vm171_vm14 }
   0xb   :  { %78 = vst [vmem:[#allocation2] sm:$0xf] %v77_v5  ;;  %p495_p3 = por %p494_p2, %p493_p1 }
   0xd   :  { %p496_p4 = pnand %p495_p3, %p489_p0 }
  0x11   :  { %v79_v7 = vld [vmem:[#allocation0] sm:$0xff] }
  0x12   :  { %v81_v8 = vld [vmem:[#allocation2] sm:$0xff]  ;;  %80 = vst [vmem:[#allocation4] sm:$0xff] %v79_v7  ;;  %v93_v9 = vsel %vm92_vm2, %v79_v7, 0.0 }
  0x13   :  { %82 = vst [vmem:[#allocation6] sm:$0xff] %v81_v8  ;;  %v94_v10 = vsel %vm92_vm2, %v81_v8, 0.0  ;;  %v98_v12 = vmul.f32 %v93_v9, %v93_v9 }
  0x14   :  { %v95_v11 = vxor.u32 2147483648, %v94_v10 }
  0x16   :  { %v99_v13 = vmul.f32 %v95_v11, %v94_v10 }
  0x18   :  { %v100_v14 = vsub.f32 %v98_v12, %v99_v13 }
  0x19   :  { %v119_v21 = vld [vmem:[#allocation4] ss:$0 sm:$0xff]  ;;  %v167_v8 = vld [vmem:[%s162_s0] sm:$0xff] }
  0x1a   :  { %v105_v15 = vrot.slane %v100_v14, 4  ;;  %v583_v22 = vld [vmem:[#allocation6] ss:$0 sm:$0xff]  ;;  %v121_v23 = vand.u32 2147483647, %v119_v21  ;;  %vm147_vm9 = vcmp.lt.f32.partialorder %v119_v21, 0.0 }
  0x1b   :  { %v122_v24 = vand.u32 2147483647, %v583_v22  ;;  %vm156_vm8 = vcmp.eq.f32.partialorder %v583_v22, 0.0  ;;  %v153_v57 = vxor.u32 2147483648, %v583_v22  ;;  %v168_v9 = vld [vmem:[%s163_s1] sm:$0xff]  ;;  %v173_v12 = vsel %vm172_vm15, %v167_v8, 0.0 }
  0x1c   :  { %v106_v16 = vadd.f32 %v105_v15, %v100_v14  ;;  %v174_v13 = vsel %vm172_vm15, %v168_v9, 0.0  ;;  %vm209_vm2 = vcmp.eq.f32.partialorder %v173_v12, 0.0 }
  0x1d   :  { %v123_v29 = vmax.f32 %v121_v23, %v122_v24  ;;  %vm211_vm1 = vcmp.eq.f32.partialorder %v174_v13, 0.0 }
  0x1e   :  { %v107_v17 = vrot.slane %v106_v16, 2 }
  0x20   :  { %v108_v18 = vadd.f32 %v107_v17, %v106_v16 }
  0x22   :  { %v109_v19 = vrot.slane %v108_v18, 1 }
  0x24   :  { %v110_v20 = vadd.f32 %v109_v19, %v108_v18  ;;  %v207_v19 = vand.u32 2147483648, %v174_v13 }
  0x26   :  { %476 = vrsqrt.f32 %v110_v20  ;;  %vm113_vm3 = vcmp.eq.f32.partialorder %v110_v20, inf  ;;  %v116_v26 = vand.u32 2147483648, %v110_v20  ;;  %vm115_vm4 = vcmp.eq.f32.partialorder %v110_v20, 0.0 }
  0x27   :  { %vm591_vm10 = vmand %vm115_vm4, %vm156_vm8 }
  0x30   :  { %v477_v25 = vpop.eup %476 }
  0x31   :  { %v112_v27 = vmul.f32 %v477_v25, %v110_v20 }
  0x33   :  { %v114_v28 = vsel %vm113_vm3, %v110_v20, %v112_v27  ;;  %v205_v20 = vand.u32 2147483648, %v173_v12 }
  0x34   :  { %v117_v30 = vsel %vm115_vm4, %v116_v26, %v114_v28  ;;  %v208_v26 = vor.u32 inf, %v207_v19 }
  0x35   :  { %v124_v31 = vand.u32 2147483647, %v117_v30  ;;  %v206_v27 = vor.u32 inf, %v205_v20 }
  0x37   :  { %v125_v32 = vmax.f32 %v123_v29, %v124_v31 }
  0x39   :  { %478 = vrcp.f32 %v125_v32  ;;  %vm137_vm7 = vcmp.eq.f32.partialorder %v125_v32, 0.0 }
  0x43   :  { %v479_v33 = vpop.eup %478 }
  0x44   :  { %v127_v34 = vmul.f32 %v479_v33, %v121_v23  ;;  %v130_v35 = vmul.f32 %v479_v33, %v122_v24  ;;  %v134_v36 = vmul.f32 %v479_v33, %v124_v31  ;;  %v212_v31 = vsel %vm211_vm1, nan, %v208_v26 }
  0x46   :  { %v128_v37 = vmul.f32 %v127_v34, %v127_v34  ;;  %v131_v38 = vmul.f32 %v130_v35, %v130_v35  ;;  %v135_v39 = vmul.f32 %v134_v36, %v134_v36 }
  0x48   :  { %v132_v40 = vadd.f32 %v131_v38, %v128_v37 }
  0x4a   :  { %v136_v41 = vadd.f32 %v135_v39, %v132_v40  ;;  %v244_v40 = vld [vmem:[#allocation11] ss:$0 sm:$0xff] }
  0x4c   :  { %480 = vrsqrt.f32 %v136_v41  ;;  %vm140_vm5 = vcmp.eq.f32.partialorder %v136_v41, inf  ;;  %v143_v43 = vand.u32 2147483648, %v136_v41  ;;  %vm142_vm6 = vcmp.eq.f32.partialorder %v136_v41, 0.0 }
  0x56   :  { %v481_v42 = vpop.eup %480 }
  0x57   :  { %v139_v44 = vmul.f32 %v481_v42, %v136_v41 }
  0x59   :  { %v141_v45 = vsel %vm140_vm5, %v136_v41, %v139_v44 }
  0x5a   :  { %v144_v46 = vsel %vm142_vm6, %v143_v43, %v141_v45  ;;  %v243_v43 = vld [vmem:[#allocation8] ss:$0 sm:$0xff] }
  0x5b   :  { %v145_v47 = vmul.f32 %v144_v46, %v125_v32  ;;  %v210_v32 = vsel %vm209_vm2, nan, %v206_v27 }
  0x5d   :  { %v146_v48 = vsel %vm137_vm7, 0.0, %v145_v47 }
  0x5e   :  { %v148_v49 = vxor.u32 2147483648, %v146_v48 }
  0x60   :  { %v149_v51 = vsel %vm147_vm9, %v146_v48, %v148_v49 }
  0x61   :  { %v597_v52 = vsel %vm591_vm10, %v119_v21, %v149_v51  ;;  %482 = vrcp.f32 %v149_v51  ;;  %v150_v58 = vsub.f32 %v149_v51, %v119_v21 }
  0x62   :  { %v161_v53 = vsub.f32 %v119_v21, %v597_v52 }
  0x64   :  { %v177_v54 = vand.u32 2147483647, %v161_v53  ;;  %vm202_vm0 = vcmp.eq.f32.partialorder %v161_v53, 0.0 }
  0x65   :  { %vm204_vm3 = vmand %vm202_vm0, %vm156_vm8 }
  0x66   :  { %vm600_vm11 = vcmp.lt.f32.partialorder %v177_v54, %v122_v24 }
  0x67   :  { %v181_v56 = vsel %vm600_vm11, %v583_v22, %v161_v53  ;;  %v180_v2 = vsel %vm600_vm11, %v161_v53, %v583_v22 }
  0x68   :  { %484 = vrcp.f32 %v181_v56 }
  0x6b   :  { %v483_v60 = vpop.eup %482 }
  0x6c   :  { %v155_v61 = vmul.f32 %v483_v60, %v153_v57  ;;  %v152_v62 = vmul.f32 %v483_v60, %v150_v58 }
  0x6e   :  { %v160_v63 = vsel %vm591_vm10, 0.0, %v155_v61  ;;  %v159_v0 = vsel %vm591_vm10, 0.0, %v152_v62 }
  0x6f   :  { %v235_v1 = vsel %vm220_vm12, %v160_v63, 0.0  ;;  %v234_v4 = vsel %vm220_vm12, %v159_v0, 0.0 }
  0x70   :  { %238 = vadd.xlane.f32.xlu1 %v235_v1 }
  0x72   :  { %v485_v5 = vpop.eup %484 }
  0x73   :  { %v183_v7 = vmul.f32 %v485_v5, %v180_v2 }
  0x74   :  { %236 = vadd.xlane.f32.xlu1 %v234_v4 }
  0x75   :  { %v184_v10 = vmul.f32 %v183_v7, %v161_v53  ;;  %v186_v11 = vmul.f32 %v183_v7, %v583_v22  ;;  %v188_v17 = vmul.f32 %v183_v7, %v173_v12  ;;  %v190_v18 = vmul.f32 %v183_v7, %v174_v13 }
  0x77   :  { %v185_v14 = vadd.f32 %v184_v10, %v583_v22  ;;  %v187_v15 = vadd.f32 %v186_v11, %v161_v53  ;;  %v197_v21 = vsub.f32 %v190_v18, %v173_v12  ;;  %v199_v23 = vsub.f32 %v174_v13, %v188_v17 }
  0x78   :  { %v189_v24 = vadd.f32 %v188_v17, %v174_v13  ;;  %v191_v25 = vadd.f32 %v190_v18, %v173_v12 }
  0x79   :  { %v193_v16 = vsel %vm600_vm11, %v185_v14, %v187_v15  ;;  %v200_v28 = vsel %vm600_vm11, %v197_v21, %v199_v23 }
  0x7a   :  { %486 = vrcp.f32 %v193_v16  ;;  %v192_v29 = vsel %vm600_vm11, %v189_v24, %v191_v25 }
  0x84   :  { %v487_v30 = vpop.eup %486 }
  0x85   :  { %v201_v33 = vmul.f32 %v487_v30, %v200_v28  ;;  %v195_v34 = vmul.f32 %v487_v30, %v192_v29 }
  0x87   :  { %v214_v35 = vsel %vm204_vm3, %v212_v31, %v201_v33  ;;  %v213_v36 = vsel %vm204_vm3, %v210_v32, %v195_v34 }
  0x88   :  { %v217_v37 = vsel %vm591_vm10, 0.0, %v214_v35  ;;  %v216_v38 = vsel %vm591_vm10, 0.0, %v213_v36 }
  0x89   :  { %v222_v39 = vsel %vm220_vm12, %v217_v37, 0.0  ;;  %v221_v22 = vsel %vm220_vm12, %v216_v38, 0.0 }
  0x8a   :  { %225 = vadd.xlane.f32.xlu0 %v222_v39 }
  0x8e   :  { %223 = vadd.xlane.f32.xlu0 %v221_v22 }
  0xfd   :  { %v642_v41 = vpop.xlane.xlu1 %238 }
  0xfe   :  { %v246_v42 = vsel %vm220_vm12, %v642_v41, %v244_v40 }
  0xff   :  { %248 = vst [vmem:[#allocation11] sm:$0x1] %v246_v42 }
 0x101   :  { %v647_v44 = vpop.xlane.xlu1 %236 }
 0x102   :  { %v245_v45 = vsel %vm220_vm12, %v647_v44, %v243_v43 }
 0x103   :  { %247 = vst [vmem:[#allocation8] sm:$0x1] %v245_v45 }
 0x106   :  { %v363_v46 = vld [vmem:[#allocation11] sm:$0x1] }
 0x107   :  { %365 = vst [vmem:[#allocation12] sm:$0x1] %v363_v46 }
 0x108   :  { %499 = shalt.err (!%p496_p4)
}
 0x109   :  { %s500_s30 = scalar_lea.hbm %s713_s5, 16 }
 0x10a   :  { %p501_p5 = scmp.ne.s32.totalorder %s713_s5, %s500_s30  ;;  %p504_p6 = scmp.lt.u32.totalorder %s500_s30, %s713_s5 }
 0x10c   :  { %p506_p7 = pnand %p504_p6, %p501_p5 }
 0x10e   :  { %509 = shalt.err (!%p506_p7)
}
 0x10f   :  { %447 = dma.vmem_to_hbm [thread:$0]  %s445_s23, 16, %s713_s5, [#allocation13]   ;;  %v357_v47 = vld [vmem:[#allocation8] sm:$0x1] }
 0x110   :  { %359 = vst [vmem:[#allocation9] sm:$0x1] %v357_v47  ;;  %s510_s12 = scalar_lea.vmem %s435_s25, 16  ;;  %s514_s13 = scalar_lea.vmem %s435_s25, 32 }
 0x111   :  { %p511_p8 = scmp.ne.s32.totalorder %s435_s25, %s510_s12  ;;  %p515_p9 = scmp.lt.s32.totalorder %s435_s25, %s435_s25 }
 0x112   :  { %p516_p10 = scmp.lt.s32.totalorder %s514_s13, %s510_s12 }
 0x114   :  { %p517_p11 = por %p516_p10, %p515_p9 }
 0x116   :  { %p518_p12 = pnand %p517_p11, %p511_p8 }
 0x118   :  { %521 = shalt.err (!%p518_p12)
}
 0x119   :  { %s522_s16 = scalar_lea.hbm %s712_s4, 16 }
 0x11a   :  { %p523_p13 = scmp.ne.s32.totalorder %s712_s4, %s522_s16  ;;  %p526_p0 = scmp.lt.u32.totalorder %s522_s16, %s712_s4 }
 0x11c   :  { %p528_p1 = pnand %p526_p0, %p523_p13 }
 0x11e   :  { %531 = shalt.err (!%p528_p1)
}
 0x11f   :  { %437 = dma.vmem_to_hbm [thread:$0]  %s435_s25, 16, %s712_s4, [#allocation10]   ;;  %v226_v48 = vpop.xlane.xlu0 %225  ;;  %v539_v50 = vmov 1.0   ;;  %v255_v3 = vmov %v577_v3  ;;  %v293_v15 = vxor.u32 2147483648, %v642_v41  ;;  %vm319_vm6 = vcmp.gt.s32.totalorder %v609_v59, 0 }
 0x120   :  { %228 = vst [vmem:[#allocation15] sm:$0xff] %v226_v48  ;;  %s677_s0 = smov [#allocation15]  ;;  %s679_s1 = smov [#allocation4]  ;;  %vm271_vm4 = vcmp.lt.s32.totalorder %v255_v3, 4  ;;  %v292_v3 = vmov %v577_v3 }
 0x121   :  { %230 = vst [vmem:[#allocation15] sm:$0x1] %v536_v6  ;;  %s681_s22 = smov [#allocation6]  ;;  %s251_s23 = smov [#allocation14]  ;;  %v259_v54 = vld [vmem:[%s679_s1] sm:$0xff]  ;;  %vm327_vm5 = vcmp.ge.s32.totalorder %v292_v3, 0 }
 0x122   :  { %v260_v55 = vld [vmem:[%s681_s22] sm:$0xff]  ;;  %s286_s1 = smov %s679_s1  ;;  %s287_s22 = smov %s681_s22  ;;  %vm328_vm7 = vmand %vm220_vm12, %vm327_vm5 }
 0x123   :  { %v224_v49 = vpop.xlane.xlu0 %223  ;;  %v317_v29 = vld [vmem:[%s286_s1] sm:$0xff] }
 0x124   :  { %227 = vst [vmem:[#allocation14] sm:$0xff] %v224_v49  ;;  %v318_v30 = vld [vmem:[%s287_s22] sm:$0xff] }
 0x125   :  { %229 = vst [vmem:[#allocation14] sm:$0x1] %v539_v50 }
 0x128   :  { %v258_v51 = vld [vmem:[%s677_s0] sm:$0xff]  ;;  %s289_s0 = smov %s677_s0 }
 0x129   :  { %v261_v53 = vxor.u32 2147483648, %v258_v51  ;;  %v307_v24 = vld [vmem:[%s289_s0] sm:$0xff] }
 0x12b   :  { %v265_v57 = vmul.f32 %v261_v53, %v260_v55  ;;  %v268_v60 = vmul.f32 %v261_v53, %v259_v54 }
 0x12c   :  { %v257_v6 = vld [vmem:[%s251_s23] sm:$0xff]  ;;  %s288_s23 = smov %s251_s23 }
 0x12d   :  { %v264_v56 = vmul.f32 %v259_v54, %v257_v6  ;;  %v267_v58 = vmul.f32 %v260_v55, %v257_v6  ;;  %v306_v23 = vld [vmem:[%s288_s23] sm:$0xff] }
 0x12f   :  { %v266_v61 = vsub.f32 %v264_v56, %v265_v57  ;;  %v269_v62 = vadd.f32 %v268_v60, %v267_v58 }
 0x131   :  { %v272_v63 = vsel %vm271_vm4, %v266_v61, 0.0  ;;  %v273_v0 = vsel %vm271_vm4, %v269_v62, 0.0 }
 0x132   :  { %v274_v1 = vrot.slane %v272_v63, 4  ;;  %v280_v2 = vrot.slane %v273_v0, 4 }
 0x134   :  { %v275_v4 = vadd.f32 %v274_v1, %v272_v63  ;;  %v281_v5 = vadd.f32 %v280_v2, %v273_v0 }
 0x136   :  { %v276_v7 = vrot.slane %v275_v4, 2  ;;  %v282_v8 = vrot.slane %v281_v5, 2 }
 0x138   :  { %v277_v9 = vadd.f32 %v276_v7, %v275_v4  ;;  %v283_v10 = vadd.f32 %v282_v8, %v281_v5 }
 0x13a   :  { %v278_v11 = vrot.slane %v277_v9, 1  ;;  %v284_v12 = vrot.slane %v283_v10, 1 }
 0x13c   :  { %v279_v13 = vadd.f32 %v278_v11, %v277_v9  ;;  %v285_v14 = vadd.f32 %v284_v12, %v283_v10 }
 0x13e   :  { %v297_v16 = vmul.f32 %v293_v15, %v285_v14  ;;  %v299_v17 = vmul.f32 %v293_v15, %v279_v13  ;;  %v296_v18 = vmul.f32 %v279_v13, %v647_v44  ;;  %v300_v19 = vmul.f32 %v285_v14, %v647_v44 }
 0x140   :  { %v298_v20 = vsub.f32 %v296_v18, %v297_v16  ;;  %v301_v21 = vadd.f32 %v300_v19, %v299_v17 }
 0x142   :  { %v310_v25 = vmul.f32 %v306_v23, %v298_v20  ;;  %v311_v26 = vmul.f32 %v307_v24, %v301_v21  ;;  %v313_v27 = vmul.f32 %v306_v23, %v301_v21  ;;  %v314_v28 = vmul.f32 %v307_v24, %v298_v20 }
 0x144   :  { %v312_v31 = vsub.f32 %v310_v25, %v311_v26  ;;  %v315_v32 = vadd.f32 %v314_v28, %v313_v27 }
 0x146   :  { %v320_v33 = vsub.f32 %v317_v29, %v312_v31  ;;  %v321_v34 = vsub.f32 %v318_v30, %v315_v32 }
 0x148   :  { %v322_v35 = vsel %vm319_vm6, %v320_v33, %v317_v29  ;;  %v323_v36 = vsel %vm319_vm6, %v321_v34, %v318_v30 }
 0x149   :  { %v329_v37 = vsel %vm328_vm7, %v306_v23, %v322_v35  ;;  %v330_v38 = vsel %vm328_vm7, %v307_v24, %v323_v36 }
 0x14a   :  { %331 = vst [vmem:[%s286_s1] sm:$0xff] %v329_v37  ;;  %332 = vst [vmem:[%s287_s22] sm:$0xff] %v330_v38 }
 0x151   :  { %v333_v39 = vld [vmem:[%s286_s1] ss:$0 sm:$0xff] }
 0x152   :  { %v334_v22 = vld [vmem:[%s287_s22] ss:$0 sm:$0xff]  ;;  %v338_v3 = vsel %vm220_vm12, %v597_v52, %v333_v39 }
 0x153   :  { %v339_v40 = vsel %vm220_vm12, 0.0, %v334_v22  ;;  %340 = vst [vmem:[%s286_s1] sm:$0x1] %v338_v3 }
 0x154   :  { %341 = vst [vmem:[%s287_s22] sm:$0x1] %v339_v40 }
 0x15a   :  { %v345_v41 = vld [vmem:[#allocation4] sm:$0xf] }
 0x15b   :  { %v351_v42 = vld [vmem:[#allocation6] sm:$0xf]  ;;  %347 = vst [vmem:[#allocation5] sm:$0xf] %v345_v41 }
 0x15c   :  { %353 = vst [vmem:[#allocation7] sm:$0xf] %v351_v42 }
 0x162   :  { %v381_v43 = vld [vmem:[#allocation5] sm:$0xf] }
 0x163   :  { %v412_v44 = vld [vmem:[#allocation7] sm:$0xf]  ;;  %382 = vst [vmem:[%s710_s2] sm:$0xf] %v381_v43 }
 0x164   :  { %413 = vst [vmem:[%s711_s3] sm:$0xf] %v412_v44 }
 0x165   :  { %532 = dma.done.wait [#allocation10], 16  }
 0x166   :  { %533 = vsyncadd [#allocation10], 4294967280 }
 0x167   :  { %534 = dma.done.wait [#allocation13], 16  }
 0x168   :  { %535 = vsyncadd [#allocation13], 4294967280 }
 0x169   :  { %454 = vsyncpa [#allocation10], 1 }
 0x16a   :  { %455 = vsyncpa [#allocation13], 1 }

// kernel: custom-call.12
= control target key start
LH: loop header
LB: loop body
LE: loop exit
PB: predicated region body
PF: predicated region fallthrough
CT: control target
= control target key end

     0   :  { %2 = vsyncpa [#allocation0], 0  ;;  %s61_s0 = inlined_call_operand.hbm [shape: c64[4,2,2], index: 0, kind: input, shape index: {}]   ;;  %s62_s1 = inlined_call_operand.vmem [shape: f32[4,2,2], index: 1, kind: output, shape index: {}]  }
   0x1   :  { %s3_s8 = sshll.u32 %s62_s1, 4  ;;  %s9_s11 = scalar_lea.hbm %s61_s0, 64  ;;  %s4_s8 = int_to_ptr.vmem [resolvable:$true] %s3_s8 }
   0x2   :  { %p10_p0 = scmp.ne.s32.totalorder %s61_s0, %s9_s11  ;;  %s11_s16 = scalar_lea.hbm %s61_s0, 128 }
   0x3   :  { %p12_p1 = scmp.lt.u32.totalorder %s11_s16, %s9_s11  ;;  %p13_p2 = scmp.lt.u32.totalorder %s9_s11, %s61_s0 }
   0x5   :  { %p14_p3 = por %p13_p2, %p12_p1 }
   0x7   :  { %p15_p4 = pnand %p14_p3, %p10_p0 }
   0x9   :  { %18 = shalt.err (!%p15_p4)  }
   0xa   :  { %s19_s1 = scalar_lea.vmem %s4_s8, 64  ;;  %p24_p6 = scmp.lt.s32.totalorder %s4_s8, %s4_s8 }
   0xb   :  { %p20_p5 = scmp.ne.s32.totalorder %s4_s8, %s19_s1  ;;  %p25_p7 = scmp.lt.s32.totalorder %s19_s1, %s19_s1 }
   0xd   :  { %p26_p8 = por %p25_p7, %p24_p6 }
   0xf   :  { %p27_p9 = pnand %p26_p8, %p20_p5 }
  0x11   :  { %30 = shalt.err (!%p27_p9)  }
  0x12   :  { %6 = dma.hbm_to_vmem [thread:$0]  %s61_s0, 64, %s4_s8, [#allocation0] }
  0x13   :  { %31 = dma.done.wait [#allocation0], 64  }
  0x14   :  { %32 = vsyncadd [#allocation0], 4294967232 }
  0x15   :  { %8 = vsyncpa [#allocation0], 1 }

// kernel: custom-call.13
= control target key start
LH: loop header
LB: loop body
LE: loop exit
PB: predicated region body
PF: predicated region fallthrough
CT: control target
= control target key end

     0   :  { %s59_s0 = inlined_call_operand.hbm [shape: c64[4,2,2], index: 0, kind: input, shape index: {}]   ;;  %s60_s1 = inlined_call_operand.vmem [shape: f32[4,2,2], index: 1, kind: output, shape index: {}]  }
   0x1   :  { %s2_s8 = scalar_lea.hbm %s59_s0, 64 }
   0x2   :  { %3 = vsyncpa [#allocation0], 0  ;;  %s4_s11 = sshll.u32 %s60_s1, 4  ;;  %s34_s14 = scalar_lea.hbm %s59_s0, 128  ;;  %s5_s11 = int_to_ptr.vmem [resolvable:$true] %s4_s11 }
   0x3   :  { %p11_p0 = scmp.ne.s32.totalorder %s2_s8, %s34_s14  ;;  %p13_p1 = scmp.lt.u32.totalorder %s2_s8, %s59_s0 }
   0x4   :  { %p14_p2 = scmp.lt.u32.totalorder %s34_s14, %s34_s14  ;;  %p16_p4 = scmp.lt.u32.totalorder %s34_s14, %s2_s8 }
   0x6   :  { %p15_p3 = por %p14_p2, %p13_p1 }
   0x8   :  { %p17_p5 = por %p16_p4, %p15_p3 }
   0xa   :  { %p18_p6 = pnand %p17_p5, %p11_p0 }
   0xc   :  { %21 = shalt.err (!%p18_p6)  }
   0xd   :  { %s22_s17 = scalar_lea.vmem %s5_s11, 64  ;;  %p27_p8 = scmp.lt.s32.totalorder %s5_s11, %s5_s11 }
   0xe   :  { %p23_p7 = scmp.ne.s32.totalorder %s5_s11, %s22_s17  ;;  %p28_p9 = scmp.lt.s32.totalorder %s22_s17, %s22_s17 }
  0x10   :  { %p29_p10 = por %p28_p9, %p27_p8 }
  0x12   :  { %p30_p11 = pnand %p29_p10, %p23_p7 }
  0x14   :  { %33 = shalt.err (!%p30_p11)  }
  0x15   :  { %7 = dma.hbm_to_vmem [thread:$0]  %s2_s8, 64, %s5_s11, [#allocation0] }
  0x16   :  { %35 = dma.done.wait [#allocation0], 64  }
  0x17   :  { %36 = vsyncadd [#allocation0], 4294967232 }
  0x18   :  { %9 = vsyncpa [#allocation0], 1 }

// kernel: custom-call.32
= control target key start
LH: loop header
LB: loop body
LE: loop exit
PB: predicated region body
PF: predicated region fallthrough
CT: control target
= control target key end

     0   :  { %v576_v2 = vmov 0.0   ;;  %s615_s22 = smov 0   ;;  %s742_s0 = inlined_call_operand.vmem [shape: f32[8,2], index: 0, kind: input, shape index: {}]   ;;  %s743_s1 = inlined_call_operand.vmem [shape: f32[8,2], index: 1, kind: input, shape index: {}]   ;;  %s744_s2 = inlined_call_operand.vmem [shape: f32[8,2], index: 2, kind: output, shape index: {0}]   ;;  %s745_s3 = inlined_call_operand.vmem [shape: f32[8,2], index: 3, kind: output, shape index: {1}]   ;;  %s746_s4 = inlined_call_operand.vmem [shape: f32[2], index: 4, kind: output, shape index: {2}]   ;;  %s747_s5 = inlined_call_operand.vmem [shape: f32[2], index: 5, kind: output, shape index: {3}]  }
   0x1   :  { %v34_v0 = vld [vmem:[%s742_s0] sm:$0xff]  ;;  %75 = vst [vmem:[#allocation4] sm:$0x1] %v576_v2  ;;  %76 = vst [vmem:[#allocation6] sm:$0x1] %v576_v2 }
   0x2   :  { %v66_v1 = vld [vmem:[%s743_s1] sm:$0xff]  ;;  %72 = vst [vmem:[#allocation2] sm:$0xff] %v34_v0 }
   0x3   :  { %74 = vst [vmem:[#allocation3] sm:$0xff] %v66_v1 }
   0x4 LB: > { %v85_v3 = vlaneseq  ;;  %v624_v7 = vstv %s574_s22  ;;  %s122_s0 = scalar_lea.vmem [#allocation2], %s574_s22  ;;  %s123_s1 = scalar_lea.vmem [#allocation3], %s574_s22  ;;  %v578_v49 = vmov 1.0   ;;  %s574_s22 = sphi %s615_s22, %s82_s22  }
   0x5   : > { %s167_s23 = smov [#allocation2]  ;;  %s168_s24 = smov [#allocation3] }
   0x6   : > { %v621_v6 = vshrl.u32 %v85_v3, 7  ;;  %v656_v58 = vand.u32 127, %v85_v3  ;;  %s237_s25 = scalar_lea.vmem [#allocation9], %s574_s22  ;;  %s236_s26 = scalar_lea.vmem [#allocation8], %s574_s22 }
   0x7   : > { %s701_s27 = smov [#allocation9]  ;;  %s703_s28 = smov [#allocation2] }
   0x8   : > { %vm89_vm0 = vcmp.gt.s32.totalorder %v621_v6, %v624_v7  ;;  %v171_v6 = vmov %v621_v6  ;;  %vm661_vm10 = vcmp.eq.s32.totalorder %v656_v58, %v624_v7  ;;  %s705_s29 = smov [#allocation3]  ;;  %s262_s30 = smov [#allocation8] }
   0x9   : > { %v83_v4 = vld [vmem:[#allocation2] sm:$0xff]  ;;  %vm176_vm11 = vcmp.gt.s32.totalorder %v171_v6, %v624_v7  ;;  %vm177_vm12 = vcmp.lt.s32.totalorder %v171_v6, 8  ;;  %v266_v6 = vmov %v621_v6 }
   0xa   : > { %v84_v5 = vld [vmem:[#allocation3] sm:$0xff]  ;;  %v92_v8 = vsel %vm89_vm0, %v83_v4, 0.0  ;;  %v124_v20 = vld [vmem:[%s122_s0] ss:$0 sm:$0xff]  ;;  %vm178_vm13 = vmand %vm176_vm11, %vm177_vm12 }
   0xb   : > { %v93_v9 = vsel %vm89_vm0, %v84_v5, 0.0  ;;  %v97_v11 = vmul.f32 %v92_v8, %v92_v8  ;;  %v630_v21 = vld [vmem:[%s123_s1] ss:$0 sm:$0xff]  ;;  %v126_v22 = vand.u32 2147483647, %v124_v20  ;;  %vm152_vm7 = vcmp.lt.f32.partialorder %v124_v20, 0.0 }
   0xc   : > { %v94_v10 = vxor.u32 2147483648, %v93_v9  ;;  %v127_v23 = vand.u32 2147483647, %v630_v21  ;;  %vm161_vm6 = vcmp.eq.f32.partialorder %v630_v21, 0.0  ;;  %v158_v56 = vxor.u32 2147483648, %v630_v21  ;;  %v172_v8 = vld [vmem:[%s167_s23] sm:$0xff] }
   0xd   : > { %v271_v54 = vld [vmem:[%s705_s29] sm:$0xff]  ;;  %s298_s29 = smov %s705_s29 }
   0xe   : > { %v98_v12 = vmul.f32 %v94_v10, %v93_v9  ;;  %v128_v28 = vmax.f32 %v126_v22, %v127_v23  ;;  %v173_v9 = vld [vmem:[%s168_s24] sm:$0xff]  ;;  %s348_s7 = scalar_lea.vmem %s298_s29, %s574_s22 }
  0x10   : > { %v99_v13 = vsub.f32 %v97_v11, %v98_v12  ;;  %v179_v12 = vsel %vm178_vm13, %v172_v8, 0.0 }
  0x11   : > { %vm215_vm0 = vcmp.eq.f32.partialorder %v179_v12, 0.0 }
  0x12   : > { %v104_v14 = vrot.slane %v99_v13, 4 }
  0x14   : > { %v105_v15 = vadd.f32 %v104_v14, %v99_v13  ;;  %v180_v13 = vsel %vm178_vm13, %v173_v9, 0.0 }
  0x15   : > { %vm217_vm15 = vcmp.eq.f32.partialorder %v180_v13, 0.0 }
  0x16   : > { %v106_v16 = vrot.slane %v105_v15, 2 }
  0x18   : > { %v107_v17 = vadd.f32 %v106_v16, %v105_v15 }
  0x1a   : > { %v108_v18 = vrot.slane %v107_v17, 1 }
  0x1c   : > { %v109_v19 = vadd.f32 %v108_v18, %v107_v17 }
  0x1e   : > { %556 = vrsqrt.f32 %v109_v19  ;;  %vm112_vm1 = vcmp.eq.f32.partialorder %v109_v19, inf  ;;  %v115_v25 = vand.u32 2147483648, %v109_v19  ;;  %vm114_vm2 = vcmp.eq.f32.partialorder %v109_v19, 0.0 }
  0x1f   : > { %vm638_vm8 = vmand %vm114_vm2, %vm161_vm6 }
  0x28   : > { %v557_v24 = vpop.eup %556 }
  0x29   : > { %v111_v26 = vmul.f32 %v557_v24, %v109_v19 }
  0x2b   : > { %v113_v27 = vsel %vm112_vm1, %v109_v19, %v111_v26  ;;  %v213_v19 = vand.u32 2147483648, %v180_v13 }
  0x2c   : > { %v116_v29 = vsel %vm114_vm2, %v115_v25, %v113_v27  ;;  %vm282_vm2 = vcmp.lt.s32.totalorder %v266_v6, 8  ;;  %v303_v6 = vmov %v621_v6 }
  0x2d   : > { %v129_v30 = vand.u32 2147483647, %v116_v29  ;;  %v214_v26 = vor.u32 inf, %v213_v19 }
  0x2f   : > { %v130_v31 = vmax.f32 %v128_v28, %v129_v30 }
  0x31   : > { %558 = vrcp.f32 %v130_v31  ;;  %vm142_vm5 = vcmp.eq.f32.partialorder %v130_v31, 0.0 }
  0x3b   : > { %v559_v32 = vpop.eup %558 }
  0x3c   : > { %v132_v33 = vmul.f32 %v559_v32, %v126_v22  ;;  %v135_v34 = vmul.f32 %v559_v32, %v127_v23  ;;  %v139_v35 = vmul.f32 %v559_v32, %v129_v30 }
  0x3e   : > { %v133_v36 = vmul.f32 %v132_v33, %v132_v33  ;;  %v136_v37 = vmul.f32 %v135_v34, %v135_v34  ;;  %v140_v38 = vmul.f32 %v139_v35, %v139_v35 }
  0x40   : > { %v137_v39 = vadd.f32 %v136_v37, %v133_v36 }
  0x42   : > { %v141_v40 = vadd.f32 %v140_v38, %v137_v39 }
  0x44   : > { %560 = vrsqrt.f32 %v141_v40  ;;  %vm145_vm3 = vcmp.eq.f32.partialorder %v141_v40, inf  ;;  %v148_v42 = vand.u32 2147483648, %v141_v40  ;;  %vm147_vm4 = vcmp.eq.f32.partialorder %v141_v40, 0.0 }
  0x4e   : > { %v561_v41 = vpop.eup %560 }
  0x4f   : > { %v144_v43 = vmul.f32 %v561_v41, %v141_v40 }
  0x51   : > { %v146_v44 = vsel %vm145_vm3, %v141_v40, %v144_v43  ;;  %v255_v40 = vld [vmem:[#allocation6] ss:$0 sm:$0xff]  ;;  %v254_v43 = vld [vmem:[#allocation4] ss:$0 sm:$0xff]  ;;  %vm341_vm3 = vcmp.ge.s32.totalorder %v303_v6, %v624_v7 }
  0x52   : > { %v149_v45 = vsel %vm147_vm4, %v148_v42, %v146_v44  ;;  %vm331_vm4 = vcmp.gt.s32.totalorder %v656_v58, %v624_v7 }
  0x53   : > { %v150_v46 = vmul.f32 %v149_v45, %v130_v31  ;;  %v218_v31 = vsel %vm217_vm15, nan, %v214_v26 }
  0x55   : > { %v151_v47 = vsel %vm142_vm5, 0.0, %v150_v46  ;;  %vm342_vm5 = vmand %vm661_vm10, %vm341_vm3 }
  0x56   : > { %v153_v48 = vxor.u32 2147483648, %v151_v47 }
  0x58   : > { %v154_v50 = vsel %vm152_vm7, %v151_v47, %v153_v48  ;;  %v577_v47 = vmov 0.0  }
  0x59   : > { %v644_v51 = vsel %vm638_vm8, %v124_v20, %v154_v50  ;;  %562 = vrcp.f32 %v154_v50  ;;  %v155_v57 = vsub.f32 %v154_v50, %v124_v20 }
  0x5a   : > { %v166_v52 = vsub.f32 %v124_v20, %v644_v51  ;;  %v211_v20 = vand.u32 2147483648, %v179_v12 }
  0x5c   : > { %v183_v53 = vand.u32 2147483647, %v166_v52  ;;  %v212_v27 = vor.u32 inf, %v211_v20  ;;  %vm208_vm14 = vcmp.eq.f32.partialorder %v166_v52, 0.0 }
  0x5d   : > { %vm210_vm1 = vmand %vm208_vm14, %vm161_vm6 }
  0x5e   : > { %vm647_vm9 = vcmp.lt.f32.partialorder %v183_v53, %v127_v23  ;;  %v216_v32 = vsel %vm215_vm0, nan, %v212_v27  ;;  %v270_v53 = vld [vmem:[%s703_s28] sm:$0xff]  ;;  %s297_s28 = smov %s703_s28 }
  0x5f   : > { %v187_v55 = vsel %vm647_vm9, %v630_v21, %v166_v52  ;;  %v186_v2 = vsel %vm647_vm9, %v166_v52, %v630_v21  ;;  %s347_s6 = scalar_lea.vmem %s297_s28, %s574_s22  ;;  %s82_s22 = sadd.s32 1, %s574_s22  }
  0x60   : > { %564 = vrcp.f32 %v187_v55  ;;  %p79_p0 = scmp.ge.s32.totalorder %s82_s22, 2  }
  0x63   : > { %v563_v59 = vpop.eup %562 }
  0x64   : > { %v160_v60 = vmul.f32 %v563_v59, %v158_v56  ;;  %v157_v61 = vmul.f32 %v563_v59, %v155_v57 }
  0x66   : > { %v165_v63 = vsel %vm638_vm8, 0.0, %v160_v60  ;;  %v164_v0 = vsel %vm638_vm8, 0.0, %v157_v61 }
  0x67   : > { %v245_v1 = vsel %vm661_vm10, %v165_v63, 0.0  ;;  %v244_v3 = vsel %vm661_vm10, %v164_v0, 0.0 }
  0x68   : > { %248 = vadd.xlane.f32.xlu1 %v245_v1 }
  0x6a   : > { %v565_v4 = vpop.eup %564 }
  0x6b   : > { %v189_v5 = vmul.f32 %v565_v4, %v186_v2 }
  0x6c   : > { %246 = vadd.xlane.f32.xlu1 %v244_v3 }
  0x6d   : > { %v190_v10 = vmul.f32 %v189_v5, %v166_v52  ;;  %v192_v11 = vmul.f32 %v189_v5, %v630_v21  ;;  %v194_v17 = vmul.f32 %v189_v5, %v179_v12  ;;  %v196_v18 = vmul.f32 %v189_v5, %v180_v13 }
  0x6f   : > { %v191_v14 = vadd.f32 %v190_v10, %v630_v21  ;;  %v193_v15 = vadd.f32 %v192_v11, %v166_v52  ;;  %v203_v22 = vsub.f32 %v196_v18, %v179_v12  ;;  %v205_v23 = vsub.f32 %v180_v13, %v194_v17 }
  0x70   : > { %v195_v24 = vadd.f32 %v194_v17, %v180_v13  ;;  %v197_v25 = vadd.f32 %v196_v18, %v179_v12 }
  0x71   : > { %v199_v16 = vsel %vm647_vm9, %v191_v14, %v193_v15  ;;  %v206_v28 = vsel %vm647_vm9, %v203_v22, %v205_v23 }
  0x72   : > { %566 = vrcp.f32 %v199_v16  ;;  %v198_v29 = vsel %vm647_vm9, %v195_v24, %v197_v25 }
  0x7c   : > { %v567_v30 = vpop.eup %566 }
  0x7d   : > { %v207_v33 = vmul.f32 %v567_v30, %v206_v28  ;;  %v201_v34 = vmul.f32 %v567_v30, %v198_v29  ;;  %v328_v30 = vld [vmem:[%s297_s28] sm:$0xff] }
  0x7f   : > { %v220_v35 = vsel %vm210_vm1, %v218_v31, %v207_v33  ;;  %v219_v36 = vsel %vm210_vm1, %v216_v32, %v201_v34  ;;  %v329_v31 = vld [vmem:[%s298_s29] sm:$0xff] }
  0x80   : > { %v223_v37 = vsel %vm638_vm8, 0.0, %v220_v35  ;;  %v222_v38 = vsel %vm638_vm8, 0.0, %v219_v36 }
  0x81   : > { %v229_v39 = vsel %vm661_vm10, %v223_v37, 0.0  ;;  %v228_v21 = vsel %vm661_vm10, %v222_v38, 0.0 }
  0x82   : > { %232 = vadd.xlane.f32.xlu0 %v229_v39 }
  0x86   : > { %230 = vadd.xlane.f32.xlu0 %v228_v21 }
  0xf5   : > { %v249_v41 = vpop.xlane.xlu1 %248 }
  0xf6   : > { %v257_v42 = vsel %vm661_vm10, %v249_v41, %v255_v40  ;;  %v304_v16 = vxor.u32 2147483648, %v249_v41 }
  0xf7   : > { %259 = vst [vmem:[#allocation6] sm:$0x1] %v257_v42 }
  0xf9   : > { %v247_v44 = vpop.xlane.xlu1 %246 }
  0xfa   : > { %v256_v45 = vsel %vm661_vm10, %v247_v44, %v254_v43 }
  0xfb   : > { %258 = vst [vmem:[#allocation4] sm:$0x1] %v256_v45 }
  0xfe   :  { %v368_v41 = vld [vmem:[#allocation6] sm:$0x1] (%p79_p0) }
  0xff   :  { %370 = vst [vmem:[#allocation7] sm:$0x1] (%p79_p0), %v368_v41 }
 0x102   :  { %v362_v58 = vld [vmem:[#allocation4] sm:$0x1] (%p79_p0) }
 0x103   :  { %364 = vst [vmem:[#allocation5] sm:$0x1] (%p79_p0), %v362_v58 }
 0x106   :  { %v485_v43 = vld [vmem:[#allocation7] sm:$0x1] (%p79_p0) }
 0x107   :  { %486 = vst [vmem:[%s747_s5] sm:$0x1] (%p79_p0), %v485_v43 }
 0x10a   :  { %v452_v62 = vld [vmem:[#allocation5] sm:$0x1] (%p79_p0) }
 0x10b   :  { %453 = vst [vmem:[%s746_s4] sm:$0x1] (%p79_p0), %v452_v62 }
 0x10f   : > { %v233_v46 = vpop.xlane.xlu0 %232 }
 0x110   : > { %235 = vst [vmem:[#allocation9] sm:$0xff] %v233_v46 }
 0x111   : > { %239 = vst [vmem:[%s237_s25] sm:$0x1] %v577_v47 }
 0x113   : > { %v231_v48 = vpop.xlane.xlu0 %230 }
 0x114   : > { %234 = vst [vmem:[#allocation8] sm:$0xff] %v231_v48 }
 0x115   : > { %238 = vst [vmem:[%s236_s26] sm:$0x1] %v578_v49 }
 0x118   : > { %v269_v50 = vld [vmem:[%s701_s27] sm:$0xff]  ;;  %s300_s27 = smov %s701_s27 }
 0x119   : > { %v272_v52 = vxor.u32 2147483648, %v269_v50  ;;  %v318_v25 = vld [vmem:[%s300_s27] sm:$0xff] }
 0x11b   : > { %v276_v57 = vmul.f32 %v272_v52, %v271_v54  ;;  %v279_v60 = vmul.f32 %v272_v52, %v270_v53 }
 0x11c   : > { %v268_v55 = vld [vmem:[%s262_s30] sm:$0xff]  ;;  %s299_s30 = smov %s262_s30 }
 0x11d   : > { %v275_v56 = vmul.f32 %v270_v53, %v268_v55  ;;  %v278_v59 = vmul.f32 %v271_v54, %v268_v55  ;;  %v317_v24 = vld [vmem:[%s299_s30] sm:$0xff] }
 0x11f   : > { %v277_v61 = vsub.f32 %v275_v56, %v276_v57  ;;  %v280_v63 = vadd.f32 %v279_v60, %v278_v59 }
 0x121   : > { %v283_v0 = vsel %vm282_vm2, %v277_v61, 0.0  ;;  %v284_v1 = vsel %vm282_vm2, %v280_v63, 0.0 }
 0x122   : > { %v285_v2 = vrot.slane %v283_v0, 4  ;;  %v291_v3 = vrot.slane %v284_v1, 4 }
 0x124   : > { %v286_v4 = vadd.f32 %v285_v2, %v283_v0  ;;  %v292_v5 = vadd.f32 %v291_v3, %v284_v1 }
 0x126   : > { %v287_v8 = vrot.slane %v286_v4, 2  ;;  %v293_v9 = vrot.slane %v292_v5, 2 }
 0x128   : > { %v288_v10 = vadd.f32 %v287_v8, %v286_v4  ;;  %v294_v11 = vadd.f32 %v293_v9, %v292_v5 }
 0x12a   : > { %v289_v12 = vrot.slane %v288_v10, 1  ;;  %v295_v13 = vrot.slane %v294_v11, 1 }
 0x12c   : > { %v290_v14 = vadd.f32 %v289_v12, %v288_v10  ;;  %v296_v15 = vadd.f32 %v295_v13, %v294_v11 }
 0x12e   : > { %v308_v17 = vmul.f32 %v304_v16, %v296_v15  ;;  %v310_v18 = vmul.f32 %v304_v16, %v290_v14  ;;  %v307_v19 = vmul.f32 %v290_v14, %v247_v44  ;;  %v311_v20 = vmul.f32 %v296_v15, %v247_v44 }
 0x130   : > { %v309_v22 = vsub.f32 %v307_v19, %v308_v17  ;;  %v312_v23 = vadd.f32 %v311_v20, %v310_v18 }
 0x132   : > { %v321_v26 = vmul.f32 %v317_v24, %v309_v22  ;;  %v322_v27 = vmul.f32 %v318_v25, %v312_v23  ;;  %v324_v28 = vmul.f32 %v317_v24, %v312_v23  ;;  %v325_v29 = vmul.f32 %v318_v25, %v309_v22 }
 0x134   : > { %v323_v32 = vsub.f32 %v321_v26, %v322_v27  ;;  %v326_v33 = vadd.f32 %v325_v29, %v324_v28 }
 0x136   : > { %v332_v34 = vsub.f32 %v328_v30, %v323_v32  ;;  %v333_v35 = vsub.f32 %v329_v31, %v326_v33 }
 0x138   : > { %v334_v36 = vsel %vm331_vm4, %v332_v34, %v328_v30  ;;  %v335_v37 = vsel %vm331_vm4, %v333_v35, %v329_v31 }
 0x139   : > { %v343_v38 = vsel %vm342_vm5, %v317_v24, %v334_v36  ;;  %v344_v39 = vsel %vm342_vm5, %v318_v25, %v335_v37 }
 0x13a   : > { %345 = vst [vmem:[%s297_s28] sm:$0xff] %v343_v38  ;;  %346 = vst [vmem:[%s298_s29] sm:$0xff] %v344_v39 }
 0x13e   :  { %81 = sbr.rel (!%p79_p0) target bundleno = 4 (0x4), region = 260 }
 0x141   : > { %v349_v21 = vld [vmem:[%s347_s6] ss:$0 sm:$0xff] }
 0x142   : > { %v350_v6 = vld [vmem:[%s348_s7] ss:$0 sm:$0xff]  ;;  %v355_v40 = vsel %vm661_vm10, %v644_v51, %v349_v21 }
 0x143   : > { %v356_v7 = vsel %vm661_vm10, 0.0, %v350_v6  ;;  %357 = vst [vmem:[%s347_s6] sm:$0x1] %v355_v40 }
 0x144   : > { %358 = vst [vmem:[%s348_s7] sm:$0x1] %v356_v7 }
 0x14a   :  { %v398_v42 = vld [vmem:[#allocation2] sm:$0xff] }
 0x14b   :  { %399 = vst [vmem:[%s744_s2] sm:$0xff] %v398_v42  ;;  %v430_v51 = vld [vmem:[#allocation3] sm:$0xff] }
 0x14c   :  { %431 = vst [vmem:[%s745_s3] sm:$0xff] %v430_v51 }

// kernel: custom-call.34
= control target key start
LH: loop header
LB: loop body
LE: loop exit
PB: predicated region body
PF: predicated region fallthrough
CT: control target
= control target key end

     0   :  { %v137_v2 = vlaneseq  ;;  %vm156_vm1 = vcmask 15360   ;;  %s449_s0 = inlined_call_operand.vmem [shape: f32[2,2], index: 0, kind: input, shape index: {}]   ;;  %s450_s1 = inlined_call_operand.vmem [shape: f32[2,2], index: 1, kind: input, shape index: {}]   ;;  %s451_s2 = inlined_call_operand.vmem [shape: f32[2,2], index: 2, kind: output, shape index: {0}]   ;;  %s452_s3 = inlined_call_operand.vmem [shape: f32[2,2], index: 3, kind: output, shape index: {1}]  }
   0x1   :  { %v65_v0 = vld [vmem:[%s449_s0] sm:$0x3] }
   0x2   :  { %v127_v1 = vld [vmem:[%s450_s1] sm:$0x3]  ;;  %66 = vst [vmem:[#allocation1] sm:$0x3] %v65_v0  ;;  %v138_v5 = vand.u32 127, %v137_v2  ;;  %v140_v6 = vshrl.u32 %v137_v2, 7 }
   0x3   :  { %128 = vst [vmem:[#allocation3] sm:$0x3] %v127_v1 }
   0x4   :  { %vm147_vm0 = vcmp.eq.s32.totalorder %v138_v5, 0  ;;  %vm142_vm2 = vcmp.eq.s32.totalorder %v138_v5, %v140_v6  ;;  %vm161_vm3 = vcmp.eq.s32.totalorder %v138_v5, 1 }
   0x9   :  { %v131_v3 = vld [vmem:[#allocation1] sm:$0x3] }
   0xa   :  { %v135_v4 = vld [vmem:[#allocation3] sm:$0x3]  ;;  %132 = vst [vmem:[#allocation0] sm:$0x3] %v131_v3 }
   0xb   :  { %136 = vst [vmem:[#allocation2] sm:$0x3] %v135_v4 }
  0x11   :  { %v143_v7 = vld [vmem:[#allocation0] sm:$0xff] }
  0x12   :  { %v144_v8 = vld [vmem:[#allocation2] sm:$0xff]  ;;  %v154_v9 = vld [vmem:[#allocation0 + $0x1] ss:$0 sm:$0xff]  ;;  %v148_v10 = vsel %vm147_vm0, %v143_v7, 1.0 }
  0x13   :  { %v149_v11 = vsel %vm147_vm0, %v144_v8, 0.0  ;;  %v155_v12 = vld [vmem:[#allocation2 + $0x1] ss:$0 sm:$0xff]  ;;  %v157_v13 = vsel %vm156_vm1, %v154_v9, 0.0  ;;  %v150_v14 = vsel %vm142_vm2, %v148_v10, 0.0 }
  0x14   :  { %v151_v15 = vsel %vm142_vm2, %v149_v11, 0.0  ;;  %v158_v16 = vsel %vm156_vm1, %v155_v12, 0.0  ;;  %v164_v17 = vmul.f32 %v157_v13, %v150_v14 }
  0x15   :  { %v165_v18 = vmul.f32 %v158_v16, %v151_v15  ;;  %v167_v19 = vmul.f32 %v157_v13, %v151_v15  ;;  %v168_v20 = vmul.f32 %v158_v16, %v150_v14 }
  0x17   :  { %v166_v21 = vsub.f32 %v164_v17, %v165_v18  ;;  %v169_v22 = vadd.f32 %v168_v20, %v167_v19 }
  0x19   :  { %171 = vadd.xlane.f32.xlu0 %v166_v21 }
  0x1d   :  { %173 = vadd.xlane.f32.xlu0 %v169_v22 }
  0xa6   :  { %v172_v23 = vpop.xlane.xlu0 %171 }
  0xa7   :  { %v175_v24 = vsel %vm161_vm3, %v172_v23, %v150_v14 }
  0xa8   :  { %177 = vst [vmem:[#allocation4] sm:$0xff] %v175_v24 }
  0xaa   :  { %v174_v25 = vpop.xlane.xlu0 %173 }
  0xab   :  { %v176_v26 = vsel %vm161_vm3, %v174_v25, %v151_v15 }
  0xac   :  { %178 = vst [vmem:[#allocation6] sm:$0xff] %v176_v26 }
  0xaf   :  { %v182_v27 = vld [vmem:[#allocation4] sm:$0x3] }
  0xb0   :  { %184 = vst [vmem:[#allocation5] sm:$0x3] %v182_v27 }
  0xb3   :  { %v188_v28 = vld [vmem:[#allocation6] sm:$0x3] }
  0xb4   :  { %190 = vst [vmem:[#allocation7] sm:$0x3] %v188_v28 }
  0xb7   :  { %v251_v29 = vld [vmem:[#allocation5] sm:$0x3] }
  0xb8   :  { %252 = vst [vmem:[%s451_s2] sm:$0x3] %v251_v29 }
  0xbb   :  { %v313_v30 = vld [vmem:[#allocation7] sm:$0x3] }
  0xbc   :  { %314 = vst [vmem:[%s452_s3] sm:$0x3] %v313_v30 }

// kernel: custom-call
= control target key start
LH: loop header
LB: loop body
LE: loop exit
PB: predicated region body
PF: predicated region fallthrough
CT: control target
= control target key end

     0   :  { %2 = vsyncpa [#allocation0], 0  ;;  %s61_s0 = inlined_call_operand.hbm [shape: c64[1,2,2], index: 0, kind: input, shape index: {}]   ;;  %s62_s1 = inlined_call_operand.vmem [shape: f32[1,2,2], index: 1, kind: output, shape index: {}]  }
   0x1   :  { %s3_s8 = sshll.u32 %s62_s1, 4  ;;  %s9_s11 = scalar_lea.hbm %s61_s0, 32  ;;  %s4_s8 = int_to_ptr.vmem [resolvable:$true] %s3_s8 }
   0x2   :  { %p10_p0 = scmp.ne.s32.totalorder %s61_s0, %s9_s11  ;;  %s11_s16 = scalar_lea.hbm %s61_s0, 64 }
   0x3   :  { %p12_p1 = scmp.lt.u32.totalorder %s11_s16, %s9_s11  ;;  %p13_p2 = scmp.lt.u32.totalorder %s9_s11, %s61_s0 }
   0x5   :  { %p14_p3 = por %p13_p2, %p12_p1 }
   0x7   :  { %p15_p4 = pnand %p14_p3, %p10_p0 }
   0x9   :  { %18 = shalt.err (!%p15_p4)  }
   0xa   :  { %s19_s1 = scalar_lea.vmem %s4_s8, 32  ;;  %p24_p6 = scmp.lt.s32.totalorder %s4_s8, %s4_s8 }
   0xb   :  { %p20_p5 = scmp.ne.s32.totalorder %s4_s8, %s19_s1  ;;  %p25_p7 = scmp.lt.s32.totalorder %s19_s1, %s19_s1 }
   0xd   :  { %p26_p8 = por %p25_p7, %p24_p6 }
   0xf   :  { %p27_p9 = pnand %p26_p8, %p20_p5 }
  0x11   :  { %30 = shalt.err (!%p27_p9)  }
  0x12   :  { %6 = dma.hbm_to_vmem [thread:$0]  %s61_s0, 32, %s4_s8, [#allocation0] }
  0x13   :  { %31 = dma.done.wait [#allocation0], 32  }
  0x14   :  { %32 = vsyncadd [#allocation0], 4294967264 }
  0x15   :  { %8 = vsyncpa [#allocation0], 1 }

// kernel: custom-call.1
= control target key start
LH: loop header
LB: loop body
LE: loop exit
PB: predicated region body
PF: predicated region fallthrough
CT: control target
= control target key end

     0   :  { %s59_s0 = inlined_call_operand.hbm [shape: c64[1,2,2], index: 0, kind: input, shape index: {}]   ;;  %s60_s1 = inlined_call_operand.vmem [shape: f32[1,2,2], index: 1, kind: output, shape index: {}]  }
   0x1   :  { %s2_s8 = scalar_lea.hbm %s59_s0, 32 }
   0x2   :  { %3 = vsyncpa [#allocation0], 0  ;;  %s4_s11 = sshll.u32 %s60_s1, 4  ;;  %s34_s14 = scalar_lea.hbm %s59_s0, 64  ;;  %s5_s11 = int_to_ptr.vmem [resolvable:$true] %s4_s11 }
   0x3   :  { %p11_p0 = scmp.ne.s32.totalorder %s2_s8, %s34_s14  ;;  %p13_p1 = scmp.lt.u32.totalorder %s2_s8, %s59_s0 }
   0x4   :  { %p14_p2 = scmp.lt.u32.totalorder %s34_s14, %s34_s14  ;;  %p16_p4 = scmp.lt.u32.totalorder %s34_s14, %s2_s8 }
   0x6   :  { %p15_p3 = por %p14_p2, %p13_p1 }
   0x8   :  { %p17_p5 = por %p16_p4, %p15_p3 }
   0xa   :  { %p18_p6 = pnand %p17_p5, %p11_p0 }
   0xc   :  { %21 = shalt.err (!%p18_p6)  }
   0xd   :  { %s22_s17 = scalar_lea.vmem %s5_s11, 32  ;;  %p27_p8 = scmp.lt.s32.totalorder %s5_s11, %s5_s11 }
   0xe   :  { %p23_p7 = scmp.ne.s32.totalorder %s5_s11, %s22_s17  ;;  %p28_p9 = scmp.lt.s32.totalorder %s22_s17, %s22_s17 }
  0x10   :  { %p29_p10 = por %p28_p9, %p27_p8 }
  0x12   :  { %p30_p11 = pnand %p29_p10, %p23_p7 }
  0x14   :  { %33 = shalt.err (!%p30_p11)  }
  0x15   :  { %7 = dma.hbm_to_vmem [thread:$0]  %s2_s8, 32, %s5_s11, [#allocation0] }
  0x16   :  { %35 = dma.done.wait [#allocation0], 32  }
  0x17   :  { %36 = vsyncadd [#allocation0], 4294967264 }
  0x18   :  { %9 = vsyncpa [#allocation0], 1 }

// kernel: custom-call.26
= control target key start
LH: loop header
LB: loop body
LE: loop exit
PB: predicated region body
PF: predicated region fallthrough
CT: control target
= control target key end

     0   :  { %v592_v2 = vmov 0.0   ;;  %s631_s22 = smov 0   ;;  %s759_s0 = inlined_call_operand.vmem [shape: f32[2,2], index: 0, kind: input, shape index: {}]   ;;  %s760_s1 = inlined_call_operand.vmem [shape: f32[2,2], index: 1, kind: input, shape index: {}]   ;;  %s761_s2 = inlined_call_operand.vmem [shape: f32[2,2], index: 2, kind: output, shape index: {0}]   ;;  %s762_s3 = inlined_call_operand.vmem [shape: f32[2,2], index: 3, kind: output, shape index: {1}]   ;;  %s763_s4 = inlined_call_operand.vmem [shape: f32[2], index: 4, kind: output, shape index: {2}]   ;;  %s764_s5 = inlined_call_operand.vmem [shape: f32[2], index: 5, kind: output, shape index: {3}]  }
   0x1   :  { %v22_v0 = vld [vmem:[%s759_s0] sm:$0x3]  ;;  %81 = vst [vmem:[#allocation8] sm:$0x1] %v592_v2  ;;  %82 = vst [vmem:[#allocation10] sm:$0x1] %v592_v2 }
   0x2   :  { %v53_v1 = vld [vmem:[%s760_s1] sm:$0x3]  ;;  %23 = vst [vmem:[#allocation1] sm:$0x3] %v22_v0 }
   0x3   :  { %54 = vst [vmem:[#allocation3] sm:$0x3] %v53_v1 }
   0x9   :  { %v71_v3 = vld [vmem:[#allocation1] sm:$0x3] }
   0xa   :  { %v75_v4 = vld [vmem:[#allocation3] sm:$0x3]  ;;  %72 = vst [vmem:[#allocation0] sm:$0x3] %v71_v3 }
   0xb   :  { %76 = vst [vmem:[#allocation2] sm:$0x3] %v75_v4 }
  0x11   :  { %v77_v5 = vld [vmem:[#allocation0] sm:$0xff] }
  0x12   :  { %v79_v6 = vld [vmem:[#allocation2] sm:$0xff]  ;;  %78 = vst [vmem:[#allocation4] sm:$0xff] %v77_v5 }
  0x13   :  { %80 = vst [vmem:[#allocation6] sm:$0xff] %v79_v6 }
  0x14 LB: > { %v91_v7 = vlaneseq  ;;  %v640_v9 = vstv %s590_s22  ;;  %s128_s0 = scalar_lea.vmem [#allocation4], %s590_s22  ;;  %s129_s1 = scalar_lea.vmem [#allocation6], %s590_s22  ;;  %v594_v53 = vmov 1.0   ;;  %s590_s22 = sphi %s631_s22, %s88_s22  }
  0x15   : > { %s173_s23 = smov [#allocation4]  ;;  %s174_s24 = smov [#allocation6] }
  0x16   : > { %v637_v8 = vshrl.u32 %v91_v7, 7  ;;  %v673_v62 = vand.u32 127, %v91_v7  ;;  %s243_s25 = scalar_lea.vmem [#allocation13], %s590_s22  ;;  %s242_s26 = scalar_lea.vmem [#allocation12], %s590_s22 }
  0x17   : > { %s718_s27 = smov [#allocation13]  ;;  %s720_s28 = smov [#allocation4] }
  0x18   : > { %vm95_vm0 = vcmp.gt.s32.totalorder %v637_v8, %v640_v9  ;;  %vm96_vm1 = vcmp.lt.s32.totalorder %v637_v8, 2  ;;  %v177_v8 = vmov %v637_v8  ;;  %vm678_vm12 = vcmp.eq.s32.totalorder %v673_v62, %v640_v9  ;;  %s722_s29 = smov [#allocation6]  ;;  %s268_s30 = smov [#allocation12] }
  0x19   : > { %v89_v10 = vld [vmem:[#allocation4] sm:$0xff]  ;;  %vm97_vm2 = vmand %vm95_vm0, %vm96_vm1  ;;  %v130_v24 = vld [vmem:[%s128_s0] ss:$0 sm:$0xff]  ;;  %vm182_vm13 = vcmp.gt.s32.totalorder %v177_v8, %v640_v9  ;;  %vm183_vm14 = vcmp.lt.s32.totalorder %v177_v8, 2  ;;  %v272_v8 = vmov %v637_v8 }
  0x1a   : > { %v90_v11 = vld [vmem:[#allocation6] sm:$0xff]  ;;  %v98_v12 = vsel %vm97_vm2, %v89_v10, 0.0  ;;  %v132_v26 = vand.u32 2147483647, %v130_v24  ;;  %vm158_vm9 = vcmp.lt.f32.partialorder %v130_v24, 0.0  ;;  %vm184_vm15 = vmand %vm182_vm13, %vm183_vm14 }
  0x1b   : > { %v99_v13 = vsel %vm97_vm2, %v90_v11, 0.0  ;;  %v103_v15 = vmul.f32 %v98_v12, %v98_v12  ;;  %v647_v25 = vld [vmem:[%s129_s1] ss:$0 sm:$0xff] }
  0x1c   : > { %v100_v14 = vxor.u32 2147483648, %v99_v13  ;;  %v133_v27 = vand.u32 2147483647, %v647_v25  ;;  %vm167_vm8 = vcmp.eq.f32.partialorder %v647_v25, 0.0  ;;  %v164_v60 = vxor.u32 2147483648, %v647_v25  ;;  %v178_v12 = vld [vmem:[%s173_s23] sm:$0xff] }
  0x1d   : > { %v277_v58 = vld [vmem:[%s722_s29] sm:$0xff]  ;;  %s304_s29 = smov %s722_s29 }
  0x1e   : > { %v104_v16 = vmul.f32 %v100_v14, %v99_v13  ;;  %v134_v32 = vmax.f32 %v132_v26, %v133_v27  ;;  %v179_v13 = vld [vmem:[%s174_s24] sm:$0xff]  ;;  %s354_s7 = scalar_lea.vmem %s304_s29, %s590_s22 }
  0x20   : > { %v105_v17 = vsub.f32 %v103_v15, %v104_v16  ;;  %v185_v16 = vsel %vm184_vm15, %v178_v12, 0.0 }
  0x21   : > { %vm221_vm2 = vcmp.eq.f32.partialorder %v185_v16, 0.0 }
  0x22   : > { %v110_v18 = vrot.slane %v105_v17, 4 }
  0x24   : > { %v111_v19 = vadd.f32 %v110_v18, %v105_v17  ;;  %v186_v17 = vsel %vm184_vm15, %v179_v13, 0.0 }
  0x25   : > { %vm223_vm1 = vcmp.eq.f32.partialorder %v186_v17, 0.0 }
  0x26   : > { %v112_v20 = vrot.slane %v111_v19, 2 }
  0x28   : > { %v113_v21 = vadd.f32 %v112_v20, %v111_v19 }
  0x2a   : > { %v114_v22 = vrot.slane %v113_v21, 1 }
  0x2c   : > { %v115_v23 = vadd.f32 %v114_v22, %v113_v21 }
  0x2e   : > { %572 = vrsqrt.f32 %v115_v23  ;;  %vm118_vm3 = vcmp.eq.f32.partialorder %v115_v23, inf  ;;  %v121_v29 = vand.u32 2147483648, %v115_v23  ;;  %vm120_vm4 = vcmp.eq.f32.partialorder %v115_v23, 0.0 }
  0x2f   : > { %vm655_vm10 = vmand %vm120_vm4, %vm167_vm8 }
  0x38   : > { %v573_v28 = vpop.eup %572 }
  0x39   : > { %v117_v30 = vmul.f32 %v573_v28, %v115_v23 }
  0x3b   : > { %v119_v31 = vsel %vm118_vm3, %v115_v23, %v117_v30  ;;  %v219_v23 = vand.u32 2147483648, %v186_v17 }
  0x3c   : > { %v122_v33 = vsel %vm120_vm4, %v121_v29, %v119_v31  ;;  %vm288_vm4 = vcmp.lt.s32.totalorder %v272_v8, 2  ;;  %v309_v8 = vmov %v637_v8 }
  0x3d   : > { %v135_v34 = vand.u32 2147483647, %v122_v33  ;;  %v220_v30 = vor.u32 inf, %v219_v23 }
  0x3f   : > { %v136_v35 = vmax.f32 %v134_v32, %v135_v34 }
  0x41   : > { %574 = vrcp.f32 %v136_v35  ;;  %vm148_vm7 = vcmp.eq.f32.partialorder %v136_v35, 0.0 }
  0x4b   : > { %v575_v36 = vpop.eup %574 }
  0x4c   : > { %v138_v37 = vmul.f32 %v575_v36, %v132_v26  ;;  %v141_v38 = vmul.f32 %v575_v36, %v133_v27  ;;  %v145_v39 = vmul.f32 %v575_v36, %v135_v34 }
  0x4e   : > { %v139_v40 = vmul.f32 %v138_v37, %v138_v37  ;;  %v142_v41 = vmul.f32 %v141_v38, %v141_v38  ;;  %v146_v42 = vmul.f32 %v145_v39, %v145_v39 }
  0x50   : > { %v143_v43 = vadd.f32 %v142_v41, %v139_v40 }
  0x52   : > { %v147_v44 = vadd.f32 %v146_v42, %v143_v43 }
  0x54   : > { %576 = vrsqrt.f32 %v147_v44  ;;  %vm151_vm5 = vcmp.eq.f32.partialorder %v147_v44, inf  ;;  %v154_v46 = vand.u32 2147483648, %v147_v44  ;;  %vm153_vm6 = vcmp.eq.f32.partialorder %v147_v44, 0.0 }
  0x5e   : > { %v577_v45 = vpop.eup %576 }
  0x5f   : > { %v150_v47 = vmul.f32 %v577_v45, %v147_v44 }
  0x61   : > { %v152_v48 = vsel %vm151_vm5, %v147_v44, %v150_v47  ;;  %v261_v44 = vld [vmem:[#allocation10] ss:$0 sm:$0xff]  ;;  %v260_v47 = vld [vmem:[#allocation8] ss:$0 sm:$0xff]  ;;  %vm347_vm5 = vcmp.ge.s32.totalorder %v309_v8, %v640_v9 }
  0x62   : > { %v155_v49 = vsel %vm153_vm6, %v154_v46, %v152_v48  ;;  %vm337_vm6 = vcmp.gt.s32.totalorder %v673_v62, %v640_v9 }
  0x63   : > { %v156_v50 = vmul.f32 %v155_v49, %v136_v35  ;;  %v224_v35 = vsel %vm223_vm1, nan, %v220_v30 }
  0x65   : > { %v157_v51 = vsel %vm148_vm7, 0.0, %v156_v50  ;;  %vm348_vm7 = vmand %vm678_vm12, %vm347_vm5 }
  0x66   : > { %v159_v52 = vxor.u32 2147483648, %v157_v51 }
  0x68   : > { %v160_v54 = vsel %vm158_vm9, %v157_v51, %v159_v52  ;;  %v593_v51 = vmov 0.0  }
  0x69   : > { %v661_v55 = vsel %vm655_vm10, %v130_v24, %v160_v54  ;;  %578 = vrcp.f32 %v160_v54  ;;  %v161_v61 = vsub.f32 %v160_v54, %v130_v24 }
  0x6a   : > { %v172_v56 = vsub.f32 %v130_v24, %v661_v55  ;;  %v217_v24 = vand.u32 2147483648, %v185_v16 }
  0x6c   : > { %v189_v57 = vand.u32 2147483647, %v172_v56  ;;  %v218_v31 = vor.u32 inf, %v217_v24  ;;  %vm214_vm0 = vcmp.eq.f32.partialorder %v172_v56, 0.0 }
  0x6d   : > { %vm216_vm3 = vmand %vm214_vm0, %vm167_vm8 }
  0x6e   : > { %vm664_vm11 = vcmp.lt.f32.partialorder %v189_v57, %v133_v27  ;;  %v222_v36 = vsel %vm221_vm2, nan, %v218_v31  ;;  %v276_v57 = vld [vmem:[%s720_s28] sm:$0xff]  ;;  %s303_s28 = smov %s720_s28 }
  0x6f   : > { %v193_v59 = vsel %vm664_vm11, %v647_v25, %v172_v56  ;;  %v192_v6 = vsel %vm664_vm11, %v172_v56, %v647_v25  ;;  %s353_s6 = scalar_lea.vmem %s303_s28, %s590_s22  ;;  %s88_s22 = sadd.s32 1, %s590_s22  }
  0x70   : > { %580 = vrcp.f32 %v193_v59  ;;  %p85_p0 = scmp.ge.s32.totalorder %s88_s22, 2  }
  0x73   : > { %v579_v63 = vpop.eup %578 }
  0x74   : > { %v166_v0 = vmul.f32 %v579_v63, %v164_v60  ;;  %v163_v1 = vmul.f32 %v579_v63, %v161_v61 }
  0x76   : > { %v171_v3 = vsel %vm655_vm10, 0.0, %v166_v0  ;;  %v170_v4 = vsel %vm655_vm10, 0.0, %v163_v1 }
  0x77   : > { %v251_v5 = vsel %vm678_vm12, %v171_v3, 0.0  ;;  %v250_v7 = vsel %vm678_vm12, %v170_v4, 0.0 }
  0x78   : > { %254 = vadd.xlane.f32.xlu1 %v251_v5 }
  0x7a   : > { %v581_v10 = vpop.eup %580 }
  0x7b   : > { %v195_v11 = vmul.f32 %v581_v10, %v192_v6 }
  0x7c   : > { %252 = vadd.xlane.f32.xlu1 %v250_v7 }
  0x7d   : > { %v196_v14 = vmul.f32 %v195_v11, %v172_v56  ;;  %v198_v15 = vmul.f32 %v195_v11, %v647_v25  ;;  %v200_v21 = vmul.f32 %v195_v11, %v185_v16  ;;  %v202_v22 = vmul.f32 %v195_v11, %v186_v17 }
  0x7f   : > { %v197_v18 = vadd.f32 %v196_v14, %v647_v25  ;;  %v199_v19 = vadd.f32 %v198_v15, %v172_v56  ;;  %v209_v26 = vsub.f32 %v202_v22, %v185_v16  ;;  %v211_v27 = vsub.f32 %v186_v17, %v200_v21 }
  0x80   : > { %v201_v28 = vadd.f32 %v200_v21, %v186_v17  ;;  %v203_v29 = vadd.f32 %v202_v22, %v185_v16 }
  0x81   : > { %v205_v20 = vsel %vm664_vm11, %v197_v18, %v199_v19  ;;  %v212_v32 = vsel %vm664_vm11, %v209_v26, %v211_v27 }
  0x82   : > { %582 = vrcp.f32 %v205_v20  ;;  %v204_v33 = vsel %vm664_vm11, %v201_v28, %v203_v29 }
  0x8c   : > { %v583_v34 = vpop.eup %582 }
  0x8d   : > { %v213_v37 = vmul.f32 %v583_v34, %v212_v32  ;;  %v207_v38 = vmul.f32 %v583_v34, %v204_v33  ;;  %v334_v34 = vld [vmem:[%s303_s28] sm:$0xff] }
  0x8f   : > { %v226_v39 = vsel %vm216_vm3, %v224_v35, %v213_v37  ;;  %v225_v40 = vsel %vm216_vm3, %v222_v36, %v207_v38  ;;  %v335_v35 = vld [vmem:[%s304_s29] sm:$0xff] }
  0x90   : > { %v229_v41 = vsel %vm655_vm10, 0.0, %v226_v39  ;;  %v228_v42 = vsel %vm655_vm10, 0.0, %v225_v40 }
  0x91   : > { %v235_v43 = vsel %vm678_vm12, %v229_v41, 0.0  ;;  %v234_v25 = vsel %vm678_vm12, %v228_v42, 0.0 }
  0x92   : > { %238 = vadd.xlane.f32.xlu0 %v235_v43 }
  0x96   : > { %236 = vadd.xlane.f32.xlu0 %v234_v25 }
 0x105   : > { %v255_v45 = vpop.xlane.xlu1 %254 }
 0x106   : > { %v263_v46 = vsel %vm678_vm12, %v255_v45, %v261_v44  ;;  %v310_v20 = vxor.u32 2147483648, %v255_v45 }
 0x107   : > { %265 = vst [vmem:[#allocation10] sm:$0x1] %v263_v46 }
 0x109   : > { %v253_v48 = vpop.xlane.xlu1 %252 }
 0x10a   : > { %v262_v49 = vsel %vm678_vm12, %v253_v48, %v260_v47 }
 0x10b   : > { %264 = vst [vmem:[#allocation8] sm:$0x1] %v262_v49 }
 0x10e   :  { %v386_v47 = vld [vmem:[#allocation10] sm:$0x1] (%p85_p0) }
 0x10f   :  { %388 = vst [vmem:[#allocation11] sm:$0x1] (%p85_p0), %v386_v47 }
 0x112   :  { %v380_v46 = vld [vmem:[#allocation8] sm:$0x1] (%p85_p0) }
 0x113   :  { %382 = vst [vmem:[#allocation9] sm:$0x1] (%p85_p0), %v380_v46 }
 0x116   :  { %v501_v49 = vld [vmem:[#allocation11] sm:$0x1] (%p85_p0) }
 0x117   :  { %502 = vst [vmem:[%s764_s5] sm:$0x1] (%p85_p0), %v501_v49 }
 0x11a   :  { %v468_v2 = vld [vmem:[#allocation9] sm:$0x1] (%p85_p0) }
 0x11b   :  { %469 = vst [vmem:[%s763_s4] sm:$0x1] (%p85_p0), %v468_v2 }
 0x11f   : > { %v239_v50 = vpop.xlane.xlu0 %238 }
 0x120   : > { %241 = vst [vmem:[#allocation13] sm:$0xff] %v239_v50 }
 0x121   : > { %245 = vst [vmem:[%s243_s25] sm:$0x1] %v593_v51 }
 0x123   : > { %v237_v52 = vpop.xlane.xlu0 %236 }
 0x124   : > { %240 = vst [vmem:[#allocation12] sm:$0xff] %v237_v52 }
 0x125   : > { %244 = vst [vmem:[%s242_s26] sm:$0x1] %v594_v53 }
 0x128   : > { %v275_v54 = vld [vmem:[%s718_s27] sm:$0xff]  ;;  %s306_s27 = smov %s718_s27 }
 0x129   : > { %v278_v56 = vxor.u32 2147483648, %v275_v54  ;;  %v324_v29 = vld [vmem:[%s306_s27] sm:$0xff] }
 0x12b   : > { %v282_v61 = vmul.f32 %v278_v56, %v277_v58  ;;  %v285_v0 = vmul.f32 %v278_v56, %v276_v57 }
 0x12c   : > { %v274_v59 = vld [vmem:[%s268_s30] sm:$0xff]  ;;  %s305_s30 = smov %s268_s30 }
 0x12d   : > { %v281_v60 = vmul.f32 %v276_v57, %v274_v59  ;;  %v284_v63 = vmul.f32 %v277_v58, %v274_v59  ;;  %v323_v28 = vld [vmem:[%s305_s30] sm:$0xff] }
 0x12f   : > { %v283_v1 = vsub.f32 %v281_v60, %v282_v61  ;;  %v286_v3 = vadd.f32 %v285_v0, %v284_v63 }
 0x131   : > { %v289_v4 = vsel %vm288_vm4, %v283_v1, 0.0  ;;  %v290_v5 = vsel %vm288_vm4, %v286_v3, 0.0 }
 0x132   : > { %v291_v6 = vrot.slane %v289_v4, 4  ;;  %v297_v7 = vrot.slane %v290_v5, 4 }
 0x134   : > { %v292_v10 = vadd.f32 %v291_v6, %v289_v4  ;;  %v298_v11 = vadd.f32 %v297_v7, %v290_v5 }
 0x136   : > { %v293_v12 = vrot.slane %v292_v10, 2  ;;  %v299_v13 = vrot.slane %v298_v11, 2 }
 0x138   : > { %v294_v14 = vadd.f32 %v293_v12, %v292_v10  ;;  %v300_v15 = vadd.f32 %v299_v13, %v298_v11 }
 0x13a   : > { %v295_v16 = vrot.slane %v294_v14, 1  ;;  %v301_v17 = vrot.slane %v300_v15, 1 }
 0x13c   : > { %v296_v18 = vadd.f32 %v295_v16, %v294_v14  ;;  %v302_v19 = vadd.f32 %v301_v17, %v300_v15 }
 0x13e   : > { %v314_v21 = vmul.f32 %v310_v20, %v302_v19  ;;  %v316_v22 = vmul.f32 %v310_v20, %v296_v18  ;;  %v313_v23 = vmul.f32 %v296_v18, %v253_v48  ;;  %v317_v24 = vmul.f32 %v302_v19, %v253_v48 }
 0x140   : > { %v315_v26 = vsub.f32 %v313_v23, %v314_v21  ;;  %v318_v27 = vadd.f32 %v317_v24, %v316_v22 }
 0x142   : > { %v327_v30 = vmul.f32 %v323_v28, %v315_v26  ;;  %v328_v31 = vmul.f32 %v324_v29, %v318_v27  ;;  %v330_v32 = vmul.f32 %v323_v28, %v318_v27  ;;  %v331_v33 = vmul.f32 %v324_v29, %v315_v26 }
 0x144   : > { %v329_v36 = vsub.f32 %v327_v30, %v328_v31  ;;  %v332_v37 = vadd.f32 %v331_v33, %v330_v32 }
 0x146   : > { %v338_v38 = vsub.f32 %v334_v34, %v329_v36  ;;  %v339_v39 = vsub.f32 %v335_v35, %v332_v37 }
 0x148   : > { %v340_v40 = vsel %vm337_vm6, %v338_v38, %v334_v34  ;;  %v341_v41 = vsel %vm337_vm6, %v339_v39, %v335_v35 }
 0x149   : > { %v349_v42 = vsel %vm348_vm7, %v323_v28, %v340_v40  ;;  %v350_v43 = vsel %vm348_vm7, %v324_v29, %v341_v41 }
 0x14a   : > { %351 = vst [vmem:[%s303_s28] sm:$0xff] %v349_v42  ;;  %352 = vst [vmem:[%s304_s29] sm:$0xff] %v350_v43 }
 0x14e   :  { %87 = sbr.rel (!%p85_p0) target bundleno = 20 (0x14), region = 244 }
 0x151   : > { %v355_v25 = vld [vmem:[%s353_s6] ss:$0 sm:$0xff] }
 0x152   : > { %v356_v8 = vld [vmem:[%s354_s7] ss:$0 sm:$0xff]  ;;  %v361_v44 = vsel %vm678_vm12, %v661_v55, %v355_v25 }
 0x153   : > { %v362_v9 = vsel %vm678_vm12, 0.0, %v356_v8  ;;  %363 = vst [vmem:[%s353_s6] sm:$0x1] %v361_v44 }
 0x154   : > { %364 = vst [vmem:[%s354_s7] sm:$0x1] %v362_v9 }
 0x15a   :  { %v368_v62 = vld [vmem:[#allocation4] sm:$0x3] }
 0x15b   :  { %v374_v45 = vld [vmem:[#allocation6] sm:$0x3]  ;;  %370 = vst [vmem:[#allocation5] sm:$0x3] %v368_v62 }
 0x15c   :  { %376 = vst [vmem:[#allocation7] sm:$0x3] %v374_v45 }
 0x162   :  { %v404_v55 = vld [vmem:[#allocation5] sm:$0x3] }
 0x163   :  { %v435_v48 = vld [vmem:[#allocation7] sm:$0x3]  ;;  %405 = vst [vmem:[%s761_s2] sm:$0x3] %v404_v55 }
 0x164   :  { %436 = vst [vmem:[%s762_s3] sm:$0x3] %v435_v48 }

// kernel: custom-call.10
= control target key start
LH: loop header
LB: loop body
LE: loop exit
PB: predicated region body
PF: predicated region fallthrough
CT: control target
= control target key end

     0   :  { %2 = vsyncpa [#allocation0], 0  ;;  %s61_s0 = inlined_call_operand.hbm [shape: c64[4,2,4], index: 0, kind: input, shape index: {}]   ;;  %s62_s1 = inlined_call_operand.vmem [shape: f32[4,2,4], index: 1, kind: output, shape index: {}]  }
   0x1   :  { %s3_s8 = sshll.u32 %s62_s1, 4  ;;  %s9_s11 = scalar_lea.hbm %s61_s0, 128  ;;  %s4_s8 = int_to_ptr.vmem [resolvable:$true] %s3_s8 }
   0x2   :  { %p10_p0 = scmp.ne.s32.totalorder %s61_s0, %s9_s11  ;;  %s11_s16 = scalar_lea.hbm %s61_s0, 256 }
   0x3   :  { %p12_p1 = scmp.lt.u32.totalorder %s11_s16, %s9_s11  ;;  %p13_p2 = scmp.lt.u32.totalorder %s9_s11, %s61_s0 }
   0x5   :  { %p14_p3 = por %p13_p2, %p12_p1 }
   0x7   :  { %p15_p4 = pnand %p14_p3, %p10_p0 }
   0x9   :  { %18 = shalt.err (!%p15_p4)  }
   0xa   :  { %s19_s1 = scalar_lea.vmem %s4_s8, 128  ;;  %p24_p6 = scmp.lt.s32.totalorder %s4_s8, %s4_s8 }
   0xb   :  { %p20_p5 = scmp.ne.s32.totalorder %s4_s8, %s19_s1  ;;  %p25_p7 = scmp.lt.s32.totalorder %s19_s1, %s19_s1 }
   0xd   :  { %p26_p8 = por %p25_p7, %p24_p6 }
   0xf   :  { %p27_p9 = pnand %p26_p8, %p20_p5 }
  0x11   :  { %30 = shalt.err (!%p27_p9)  }
  0x12   :  { %6 = dma.hbm_to_vmem [thread:$0]  %s61_s0, 128, %s4_s8, [#allocation0] }
  0x13   :  { %31 = dma.done.wait [#allocation0], 128  }
  0x14   :  { %32 = vsyncadd [#allocation0], 4294967168 }
  0x15   :  { %8 = vsyncpa [#allocation0], 1 }

// kernel: custom-call.11
= control target key start
LH: loop header
LB: loop body
LE: loop exit
PB: predicated region body
PF: predicated region fallthrough
CT: control target
= control target key end

     0   :  { %s59_s0 = inlined_call_operand.hbm [shape: c64[4,2,4], index: 0, kind: input, shape index: {}]   ;;  %s60_s1 = inlined_call_operand.vmem [shape: f32[4,2,4], index: 1, kind: output, shape index: {}]  }
   0x1   :  { %s2_s8 = scalar_lea.hbm %s59_s0, 128 }
   0x2   :  { %3 = vsyncpa [#allocation0], 0  ;;  %s4_s11 = sshll.u32 %s60_s1, 4  ;;  %s34_s14 = scalar_lea.hbm %s59_s0, 256  ;;  %s5_s11 = int_to_ptr.vmem [resolvable:$true] %s4_s11 }
   0x3   :  { %p11_p0 = scmp.ne.s32.totalorder %s2_s8, %s34_s14  ;;  %p13_p1 = scmp.lt.u32.totalorder %s2_s8, %s59_s0 }
   0x4   :  { %p14_p2 = scmp.lt.u32.totalorder %s34_s14, %s34_s14  ;;  %p16_p4 = scmp.lt.u32.totalorder %s34_s14, %s2_s8 }
   0x6   :  { %p15_p3 = por %p14_p2, %p13_p1 }
   0x8   :  { %p17_p5 = por %p16_p4, %p15_p3 }
   0xa   :  { %p18_p6 = pnand %p17_p5, %p11_p0 }
   0xc   :  { %21 = shalt.err (!%p18_p6)  }
   0xd   :  { %s22_s17 = scalar_lea.vmem %s5_s11, 128  ;;  %p27_p8 = scmp.lt.s32.totalorder %s5_s11, %s5_s11 }
   0xe   :  { %p23_p7 = scmp.ne.s32.totalorder %s5_s11, %s22_s17  ;;  %p28_p9 = scmp.lt.s32.totalorder %s22_s17, %s22_s17 }
  0x10   :  { %p29_p10 = por %p28_p9, %p27_p8 }
  0x12   :  { %p30_p11 = pnand %p29_p10, %p23_p7 }
  0x14   :  { %33 = shalt.err (!%p30_p11)  }
  0x15   :  { %7 = dma.hbm_to_vmem [thread:$0]  %s2_s8, 128, %s5_s11, [#allocation0] }
  0x16   :  { %35 = dma.done.wait [#allocation0], 128  }
  0x17   :  { %36 = vsyncadd [#allocation0], 4294967168 }
  0x18   :  { %9 = vsyncpa [#allocation0], 1 }

// kernel: custom-call.69
= control target key start
LH: loop header
LB: loop body
LE: loop exit
PB: predicated region body
PF: predicated region fallthrough
CT: control target
= control target key end

     0   :  { %v576_v2 = vmov 0.0   ;;  %s615_s22 = smov 0   ;;  %s742_s0 = inlined_call_operand.vmem [shape: f32[8,4], index: 0, kind: input, shape index: {}]   ;;  %s743_s1 = inlined_call_operand.vmem [shape: f32[8,4], index: 1, kind: input, shape index: {}]   ;;  %s744_s2 = inlined_call_operand.vmem [shape: f32[8,4], index: 2, kind: output, shape index: {0}]   ;;  %s745_s3 = inlined_call_operand.vmem [shape: f32[8,4], index: 3, kind: output, shape index: {1}]   ;;  %s746_s4 = inlined_call_operand.vmem [shape: f32[4], index: 4, kind: output, shape index: {2}]   ;;  %s747_s5 = inlined_call_operand.vmem [shape: f32[4], index: 5, kind: output, shape index: {3}]  }
   0x1   :  { %v34_v0 = vld [vmem:[%s742_s0] sm:$0xff]  ;;  %75 = vst [vmem:[#allocation4] sm:$0x1] %v576_v2  ;;  %76 = vst [vmem:[#allocation6] sm:$0x1] %v576_v2 }
   0x2   :  { %v66_v1 = vld [vmem:[%s743_s1] sm:$0xff]  ;;  %72 = vst [vmem:[#allocation2] sm:$0xff] %v34_v0 }
   0x3   :  { %74 = vst [vmem:[#allocation3] sm:$0xff] %v66_v1 }
   0x4 LB: > { %v85_v3 = vlaneseq  ;;  %v624_v7 = vstv %s574_s22  ;;  %s122_s0 = scalar_lea.vmem [#allocation2], %s574_s22  ;;  %s123_s1 = scalar_lea.vmem [#allocation3], %s574_s22  ;;  %v578_v49 = vmov 1.0   ;;  %s574_s22 = sphi %s615_s22, %s82_s22  }
   0x5   : > { %s167_s23 = smov [#allocation2]  ;;  %s168_s24 = smov [#allocation3] }
   0x6   : > { %v621_v6 = vshrl.u32 %v85_v3, 7  ;;  %v656_v58 = vand.u32 127, %v85_v3  ;;  %s237_s25 = scalar_lea.vmem [#allocation9], %s574_s22  ;;  %s236_s26 = scalar_lea.vmem [#allocation8], %s574_s22 }
   0x7   : > { %s701_s27 = smov [#allocation9]  ;;  %s703_s28 = smov [#allocation2] }
   0x8   : > { %vm89_vm0 = vcmp.gt.s32.totalorder %v621_v6, %v624_v7  ;;  %v171_v6 = vmov %v621_v6  ;;  %vm661_vm10 = vcmp.eq.s32.totalorder %v656_v58, %v624_v7  ;;  %s705_s29 = smov [#allocation3]  ;;  %s262_s30 = smov [#allocation8] }
   0x9   : > { %v83_v4 = vld [vmem:[#allocation2] sm:$0xff]  ;;  %vm176_vm11 = vcmp.gt.s32.totalorder %v171_v6, %v624_v7  ;;  %vm177_vm12 = vcmp.lt.s32.totalorder %v171_v6, 8  ;;  %v266_v6 = vmov %v621_v6 }
   0xa   : > { %v84_v5 = vld [vmem:[#allocation3] sm:$0xff]  ;;  %v92_v8 = vsel %vm89_vm0, %v83_v4, 0.0  ;;  %v124_v20 = vld [vmem:[%s122_s0] ss:$0 sm:$0xff]  ;;  %vm178_vm13 = vmand %vm176_vm11, %vm177_vm12 }
   0xb   : > { %v93_v9 = vsel %vm89_vm0, %v84_v5, 0.0  ;;  %v97_v11 = vmul.f32 %v92_v8, %v92_v8  ;;  %v630_v21 = vld [vmem:[%s123_s1] ss:$0 sm:$0xff]  ;;  %v126_v22 = vand.u32 2147483647, %v124_v20  ;;  %vm152_vm7 = vcmp.lt.f32.partialorder %v124_v20, 0.0 }
   0xc   : > { %v94_v10 = vxor.u32 2147483648, %v93_v9  ;;  %v127_v23 = vand.u32 2147483647, %v630_v21  ;;  %vm161_vm6 = vcmp.eq.f32.partialorder %v630_v21, 0.0  ;;  %v158_v56 = vxor.u32 2147483648, %v630_v21  ;;  %v172_v8 = vld [vmem:[%s167_s23] sm:$0xff] }
   0xd   : > { %v271_v54 = vld [vmem:[%s705_s29] sm:$0xff]  ;;  %s298_s29 = smov %s705_s29 }
   0xe   : > { %v98_v12 = vmul.f32 %v94_v10, %v93_v9  ;;  %v128_v28 = vmax.f32 %v126_v22, %v127_v23  ;;  %v173_v9 = vld [vmem:[%s168_s24] sm:$0xff]  ;;  %s348_s7 = scalar_lea.vmem %s298_s29, %s574_s22 }
  0x10   : > { %v99_v13 = vsub.f32 %v97_v11, %v98_v12  ;;  %v179_v12 = vsel %vm178_vm13, %v172_v8, 0.0 }
  0x11   : > { %vm215_vm0 = vcmp.eq.f32.partialorder %v179_v12, 0.0 }
  0x12   : > { %v104_v14 = vrot.slane %v99_v13, 4 }
  0x14   : > { %v105_v15 = vadd.f32 %v104_v14, %v99_v13  ;;  %v180_v13 = vsel %vm178_vm13, %v173_v9, 0.0 }
  0x15   : > { %vm217_vm15 = vcmp.eq.f32.partialorder %v180_v13, 0.0 }
  0x16   : > { %v106_v16 = vrot.slane %v105_v15, 2 }
  0x18   : > { %v107_v17 = vadd.f32 %v106_v16, %v105_v15 }
  0x1a   : > { %v108_v18 = vrot.slane %v107_v17, 1 }
  0x1c   : > { %v109_v19 = vadd.f32 %v108_v18, %v107_v17 }
  0x1e   : > { %556 = vrsqrt.f32 %v109_v19  ;;  %vm112_vm1 = vcmp.eq.f32.partialorder %v109_v19, inf  ;;  %v115_v25 = vand.u32 2147483648, %v109_v19  ;;  %vm114_vm2 = vcmp.eq.f32.partialorder %v109_v19, 0.0 }
  0x1f   : > { %vm638_vm8 = vmand %vm114_vm2, %vm161_vm6 }
  0x28   : > { %v557_v24 = vpop.eup %556 }
  0x29   : > { %v111_v26 = vmul.f32 %v557_v24, %v109_v19 }
  0x2b   : > { %v113_v27 = vsel %vm112_vm1, %v109_v19, %v111_v26  ;;  %v213_v19 = vand.u32 2147483648, %v180_v13 }
  0x2c   : > { %v116_v29 = vsel %vm114_vm2, %v115_v25, %v113_v27  ;;  %vm282_vm2 = vcmp.lt.s32.totalorder %v266_v6, 8  ;;  %v303_v6 = vmov %v621_v6 }
  0x2d   : > { %v129_v30 = vand.u32 2147483647, %v116_v29  ;;  %v214_v26 = vor.u32 inf, %v213_v19 }
  0x2f   : > { %v130_v31 = vmax.f32 %v128_v28, %v129_v30 }
  0x31   : > { %558 = vrcp.f32 %v130_v31  ;;  %vm142_vm5 = vcmp.eq.f32.partialorder %v130_v31, 0.0 }
  0x3b   : > { %v559_v32 = vpop.eup %558 }
  0x3c   : > { %v132_v33 = vmul.f32 %v559_v32, %v126_v22  ;;  %v135_v34 = vmul.f32 %v559_v32, %v127_v23  ;;  %v139_v35 = vmul.f32 %v559_v32, %v129_v30 }
  0x3e   : > { %v133_v36 = vmul.f32 %v132_v33, %v132_v33  ;;  %v136_v37 = vmul.f32 %v135_v34, %v135_v34  ;;  %v140_v38 = vmul.f32 %v139_v35, %v139_v35 }
  0x40   : > { %v137_v39 = vadd.f32 %v136_v37, %v133_v36 }
  0x42   : > { %v141_v40 = vadd.f32 %v140_v38, %v137_v39 }
  0x44   : > { %560 = vrsqrt.f32 %v141_v40  ;;  %vm145_vm3 = vcmp.eq.f32.partialorder %v141_v40, inf  ;;  %v148_v42 = vand.u32 2147483648, %v141_v40  ;;  %vm147_vm4 = vcmp.eq.f32.partialorder %v141_v40, 0.0 }
  0x4e   : > { %v561_v41 = vpop.eup %560 }
  0x4f   : > { %v144_v43 = vmul.f32 %v561_v41, %v141_v40 }
  0x51   : > { %v146_v44 = vsel %vm145_vm3, %v141_v40, %v144_v43  ;;  %v255_v40 = vld [vmem:[#allocation6] ss:$0 sm:$0xff]  ;;  %v254_v43 = vld [vmem:[#allocation4] ss:$0 sm:$0xff]  ;;  %vm341_vm3 = vcmp.ge.s32.totalorder %v303_v6, %v624_v7 }
  0x52   : > { %v149_v45 = vsel %vm147_vm4, %v148_v42, %v146_v44  ;;  %vm331_vm4 = vcmp.gt.s32.totalorder %v656_v58, %v624_v7 }
  0x53   : > { %v150_v46 = vmul.f32 %v149_v45, %v130_v31  ;;  %v218_v31 = vsel %vm217_vm15, nan, %v214_v26 }
  0x55   : > { %v151_v47 = vsel %vm142_vm5, 0.0, %v150_v46  ;;  %vm342_vm5 = vmand %vm661_vm10, %vm341_vm3 }
  0x56   : > { %v153_v48 = vxor.u32 2147483648, %v151_v47 }
  0x58   : > { %v154_v50 = vsel %vm152_vm7, %v151_v47, %v153_v48  ;;  %v577_v47 = vmov 0.0  }
  0x59   : > { %v644_v51 = vsel %vm638_vm8, %v124_v20, %v154_v50  ;;  %562 = vrcp.f32 %v154_v50  ;;  %v155_v57 = vsub.f32 %v154_v50, %v124_v20 }
  0x5a   : > { %v166_v52 = vsub.f32 %v124_v20, %v644_v51  ;;  %v211_v20 = vand.u32 2147483648, %v179_v12 }
  0x5c   : > { %v183_v53 = vand.u32 2147483647, %v166_v52  ;;  %v212_v27 = vor.u32 inf, %v211_v20  ;;  %vm208_vm14 = vcmp.eq.f32.partialorder %v166_v52, 0.0 }
  0x5d   : > { %vm210_vm1 = vmand %vm208_vm14, %vm161_vm6 }
  0x5e   : > { %vm647_vm9 = vcmp.lt.f32.partialorder %v183_v53, %v127_v23  ;;  %v216_v32 = vsel %vm215_vm0, nan, %v212_v27  ;;  %v270_v53 = vld [vmem:[%s703_s28] sm:$0xff]  ;;  %s297_s28 = smov %s703_s28 }
  0x5f   : > { %v187_v55 = vsel %vm647_vm9, %v630_v21, %v166_v52  ;;  %v186_v2 = vsel %vm647_vm9, %v166_v52, %v630_v21  ;;  %s347_s6 = scalar_lea.vmem %s297_s28, %s574_s22  ;;  %s82_s22 = sadd.s32 1, %s574_s22  }
  0x60   : > { %564 = vrcp.f32 %v187_v55  ;;  %p79_p0 = scmp.ge.s32.totalorder %s82_s22, 4  }
  0x63   : > { %v563_v59 = vpop.eup %562 }
  0x64   : > { %v160_v60 = vmul.f32 %v563_v59, %v158_v56  ;;  %v157_v61 = vmul.f32 %v563_v59, %v155_v57 }
  0x66   : > { %v165_v63 = vsel %vm638_vm8, 0.0, %v160_v60  ;;  %v164_v0 = vsel %vm638_vm8, 0.0, %v157_v61 }
  0x67   : > { %v245_v1 = vsel %vm661_vm10, %v165_v63, 0.0  ;;  %v244_v3 = vsel %vm661_vm10, %v164_v0, 0.0 }
  0x68   : > { %248 = vadd.xlane.f32.xlu1 %v245_v1 }
  0x6a   : > { %v565_v4 = vpop.eup %564 }
  0x6b   : > { %v189_v5 = vmul.f32 %v565_v4, %v186_v2 }
  0x6c   : > { %246 = vadd.xlane.f32.xlu1 %v244_v3 }
  0x6d   : > { %v190_v10 = vmul.f32 %v189_v5, %v166_v52  ;;  %v192_v11 = vmul.f32 %v189_v5, %v630_v21  ;;  %v194_v17 = vmul.f32 %v189_v5, %v179_v12  ;;  %v196_v18 = vmul.f32 %v189_v5, %v180_v13 }
  0x6f   : > { %v191_v14 = vadd.f32 %v190_v10, %v630_v21  ;;  %v193_v15 = vadd.f32 %v192_v11, %v166_v52  ;;  %v203_v22 = vsub.f32 %v196_v18, %v179_v12  ;;  %v205_v23 = vsub.f32 %v180_v13, %v194_v17 }
  0x70   : > { %v195_v24 = vadd.f32 %v194_v17, %v180_v13  ;;  %v197_v25 = vadd.f32 %v196_v18, %v179_v12 }
  0x71   : > { %v199_v16 = vsel %vm647_vm9, %v191_v14, %v193_v15  ;;  %v206_v28 = vsel %vm647_vm9, %v203_v22, %v205_v23 }
  0x72   : > { %566 = vrcp.f32 %v199_v16  ;;  %v198_v29 = vsel %vm647_vm9, %v195_v24, %v197_v25 }
  0x7c   : > { %v567_v30 = vpop.eup %566 }
  0x7d   : > { %v207_v33 = vmul.f32 %v567_v30, %v206_v28  ;;  %v201_v34 = vmul.f32 %v567_v30, %v198_v29  ;;  %v328_v30 = vld [vmem:[%s297_s28] sm:$0xff] }
  0x7f   : > { %v220_v35 = vsel %vm210_vm1, %v218_v31, %v207_v33  ;;  %v219_v36 = vsel %vm210_vm1, %v216_v32, %v201_v34  ;;  %v329_v31 = vld [vmem:[%s298_s29] sm:$0xff] }
  0x80   : > { %v223_v37 = vsel %vm638_vm8, 0.0, %v220_v35  ;;  %v222_v38 = vsel %vm638_vm8, 0.0, %v219_v36 }
  0x81   : > { %v229_v39 = vsel %vm661_vm10, %v223_v37, 0.0  ;;  %v228_v21 = vsel %vm661_vm10, %v222_v38, 0.0 }
  0x82   : > { %232 = vadd.xlane.f32.xlu0 %v229_v39 }
  0x86   : > { %230 = vadd.xlane.f32.xlu0 %v228_v21 }
  0xf5   : > { %v249_v41 = vpop.xlane.xlu1 %248 }
  0xf6   : > { %v257_v42 = vsel %vm661_vm10, %v249_v41, %v255_v40  ;;  %v304_v16 = vxor.u32 2147483648, %v249_v41 }
  0xf7   : > { %259 = vst [vmem:[#allocation6] sm:$0x1] %v257_v42 }
  0xf9   : > { %v247_v44 = vpop.xlane.xlu1 %246 }
  0xfa   : > { %v256_v45 = vsel %vm661_vm10, %v247_v44, %v254_v43 }
  0xfb   : > { %258 = vst [vmem:[#allocation4] sm:$0x1] %v256_v45 }
  0xfe   :  { %v368_v41 = vld [vmem:[#allocation6] sm:$0x1] (%p79_p0) }
  0xff   :  { %370 = vst [vmem:[#allocation7] sm:$0x1] (%p79_p0), %v368_v41 }
 0x102   :  { %v362_v58 = vld [vmem:[#allocation4] sm:$0x1] (%p79_p0) }
 0x103   :  { %364 = vst [vmem:[#allocation5] sm:$0x1] (%p79_p0), %v362_v58 }
 0x106   :  { %v485_v43 = vld [vmem:[#allocation7] sm:$0x1] (%p79_p0) }
 0x107   :  { %486 = vst [vmem:[%s747_s5] sm:$0x1] (%p79_p0), %v485_v43 }
 0x10a   :  { %v452_v62 = vld [vmem:[#allocation5] sm:$0x1] (%p79_p0) }
 0x10b   :  { %453 = vst [vmem:[%s746_s4] sm:$0x1] (%p79_p0), %v452_v62 }
 0x10f   : > { %v233_v46 = vpop.xlane.xlu0 %232 }
 0x110   : > { %235 = vst [vmem:[#allocation9] sm:$0xff] %v233_v46 }
 0x111   : > { %239 = vst [vmem:[%s237_s25] sm:$0x1] %v577_v47 }
 0x113   : > { %v231_v48 = vpop.xlane.xlu0 %230 }
 0x114   : > { %234 = vst [vmem:[#allocation8] sm:$0xff] %v231_v48 }
 0x115   : > { %238 = vst [vmem:[%s236_s26] sm:$0x1] %v578_v49 }
 0x118   : > { %v269_v50 = vld [vmem:[%s701_s27] sm:$0xff]  ;;  %s300_s27 = smov %s701_s27 }
 0x119   : > { %v272_v52 = vxor.u32 2147483648, %v269_v50  ;;  %v318_v25 = vld [vmem:[%s300_s27] sm:$0xff] }
 0x11b   : > { %v276_v57 = vmul.f32 %v272_v52, %v271_v54  ;;  %v279_v60 = vmul.f32 %v272_v52, %v270_v53 }
 0x11c   : > { %v268_v55 = vld [vmem:[%s262_s30] sm:$0xff]  ;;  %s299_s30 = smov %s262_s30 }
 0x11d   : > { %v275_v56 = vmul.f32 %v270_v53, %v268_v55  ;;  %v278_v59 = vmul.f32 %v271_v54, %v268_v55  ;;  %v317_v24 = vld [vmem:[%s299_s30] sm:$0xff] }
 0x11f   : > { %v277_v61 = vsub.f32 %v275_v56, %v276_v57  ;;  %v280_v63 = vadd.f32 %v279_v60, %v278_v59 }
 0x121   : > { %v283_v0 = vsel %vm282_vm2, %v277_v61, 0.0  ;;  %v284_v1 = vsel %vm282_vm2, %v280_v63, 0.0 }
 0x122   : > { %v285_v2 = vrot.slane %v283_v0, 4  ;;  %v291_v3 = vrot.slane %v284_v1, 4 }
 0x124   : > { %v286_v4 = vadd.f32 %v285_v2, %v283_v0  ;;  %v292_v5 = vadd.f32 %v291_v3, %v284_v1 }
 0x126   : > { %v287_v8 = vrot.slane %v286_v4, 2  ;;  %v293_v9 = vrot.slane %v292_v5, 2 }
 0x128   : > { %v288_v10 = vadd.f32 %v287_v8, %v286_v4  ;;  %v294_v11 = vadd.f32 %v293_v9, %v292_v5 }
 0x12a   : > { %v289_v12 = vrot.slane %v288_v10, 1  ;;  %v295_v13 = vrot.slane %v294_v11, 1 }
 0x12c   : > { %v290_v14 = vadd.f32 %v289_v12, %v288_v10  ;;  %v296_v15 = vadd.f32 %v295_v13, %v294_v11 }
 0x12e   : > { %v308_v17 = vmul.f32 %v304_v16, %v296_v15  ;;  %v310_v18 = vmul.f32 %v304_v16, %v290_v14  ;;  %v307_v19 = vmul.f32 %v290_v14, %v247_v44  ;;  %v311_v20 = vmul.f32 %v296_v15, %v247_v44 }
 0x130   : > { %v309_v22 = vsub.f32 %v307_v19, %v308_v17  ;;  %v312_v23 = vadd.f32 %v311_v20, %v310_v18 }
 0x132   : > { %v321_v26 = vmul.f32 %v317_v24, %v309_v22  ;;  %v322_v27 = vmul.f32 %v318_v25, %v312_v23  ;;  %v324_v28 = vmul.f32 %v317_v24, %v312_v23  ;;  %v325_v29 = vmul.f32 %v318_v25, %v309_v22 }
 0x134   : > { %v323_v32 = vsub.f32 %v321_v26, %v322_v27  ;;  %v326_v33 = vadd.f32 %v325_v29, %v324_v28 }
 0x136   : > { %v332_v34 = vsub.f32 %v328_v30, %v323_v32  ;;  %v333_v35 = vsub.f32 %v329_v31, %v326_v33 }
 0x138   : > { %v334_v36 = vsel %vm331_vm4, %v332_v34, %v328_v30  ;;  %v335_v37 = vsel %vm331_vm4, %v333_v35, %v329_v31 }
 0x139   : > { %v343_v38 = vsel %vm342_vm5, %v317_v24, %v334_v36  ;;  %v344_v39 = vsel %vm342_vm5, %v318_v25, %v335_v37 }
 0x13a   : > { %345 = vst [vmem:[%s297_s28] sm:$0xff] %v343_v38  ;;  %346 = vst [vmem:[%s298_s29] sm:$0xff] %v344_v39 }
 0x13e   :  { %81 = sbr.rel (!%p79_p0) target bundleno = 4 (0x4), region = 260 }
 0x141   : > { %v349_v21 = vld [vmem:[%s347_s6] ss:$0 sm:$0xff] }
 0x142   : > { %v350_v6 = vld [vmem:[%s348_s7] ss:$0 sm:$0xff]  ;;  %v355_v40 = vsel %vm661_vm10, %v644_v51, %v349_v21 }
 0x143   : > { %v356_v7 = vsel %vm661_vm10, 0.0, %v350_v6  ;;  %357 = vst [vmem:[%s347_s6] sm:$0x1] %v355_v40 }
 0x144   : > { %358 = vst [vmem:[%s348_s7] sm:$0x1] %v356_v7 }
 0x14a   :  { %v398_v42 = vld [vmem:[#allocation2] sm:$0xff] }
 0x14b   :  { %399 = vst [vmem:[%s744_s2] sm:$0xff] %v398_v42  ;;  %v430_v51 = vld [vmem:[#allocation3] sm:$0xff] }
 0x14c   :  { %431 = vst [vmem:[%s745_s3] sm:$0xff] %v430_v51 }

// kernel: custom-call.70
= control target key start
LH: loop header
LB: loop body
LE: loop exit
PB: predicated region body
PF: predicated region fallthrough
CT: control target
= control target key end

     0   :  { %v137_v2 = vlaneseq  ;;  %vm156_vm1 = vcmask 31744   ;;  %s512_s0 = inlined_call_operand.vmem [shape: f32[4,4], index: 0, kind: input, shape index: {}]   ;;  %s513_s1 = inlined_call_operand.vmem [shape: f32[4,4], index: 1, kind: input, shape index: {}]   ;;  %s514_s2 = inlined_call_operand.vmem [shape: f32[4,4], index: 2, kind: output, shape index: {0}]   ;;  %s515_s3 = inlined_call_operand.vmem [shape: f32[4,4], index: 3, kind: output, shape index: {1}]  }
   0x1   :  { %v65_v0 = vld [vmem:[%s512_s0] sm:$0xf] }
   0x2   :  { %v127_v1 = vld [vmem:[%s513_s1] sm:$0xf]  ;;  %66 = vst [vmem:[#allocation1] sm:$0xf] %v65_v0  ;;  %v493_v5 = vand.u32 127, %v137_v2  ;;  %v140_v6 = vshrl.u32 %v137_v2, 7 }
   0x3   :  { %128 = vst [vmem:[#allocation3] sm:$0xf] %v127_v1 }
   0x4   :  { %vm147_vm0 = vcmp.eq.s32.totalorder %v493_v5, 0  ;;  %vm142_vm2 = vcmp.eq.s32.totalorder %v493_v5, %v140_v6  ;;  %vm161_vm3 = vcmp.eq.s32.totalorder %v493_v5, 1  ;;  %vm186_vm4 = vcmp.eq.s32.totalorder %v493_v5, 2 }
   0x5   :  { %vm211_vm5 = vcmp.eq.s32.totalorder %v493_v5, 3 }
   0x9   :  { %v131_v3 = vld [vmem:[#allocation1] sm:$0xf] }
   0xa   :  { %v135_v4 = vld [vmem:[#allocation3] sm:$0xf]  ;;  %132 = vst [vmem:[#allocation0] sm:$0xf] %v131_v3 }
   0xb   :  { %136 = vst [vmem:[#allocation2] sm:$0xf] %v135_v4 }
  0x11   :  { %v143_v7 = vld [vmem:[#allocation0] sm:$0xff] }
  0x12   :  { %v144_v8 = vld [vmem:[#allocation2] sm:$0xff]  ;;  %v154_v9 = vld [vmem:[#allocation0 + $0x1] ss:$0 sm:$0xff]  ;;  %v148_v10 = vsel %vm147_vm0, %v143_v7, 1.0  ;;  %v179_v24 = vld [vmem:[#allocation0 + $0x2] ss:$0 sm:$0xff] }
  0x13   :  { %v149_v11 = vsel %vm147_vm0, %v144_v8, 0.0  ;;  %v155_v12 = vld [vmem:[#allocation2 + $0x1] ss:$0 sm:$0xff]  ;;  %v157_v13 = vsel %vm156_vm1, %v154_v9, 0.0  ;;  %v150_v14 = vsel %vm142_vm2, %v148_v10, 0.0  ;;  %v182_v27 = vsel %vm156_vm1, %v179_v24, 0.0 }
  0x14   :  { %v151_v15 = vsel %vm142_vm2, %v149_v11, 0.0  ;;  %v158_v16 = vsel %vm156_vm1, %v155_v12, 0.0  ;;  %v164_v17 = vmul.f32 %v157_v13, %v150_v14  ;;  %v180_v25 = vld [vmem:[#allocation2 + $0x2] ss:$0 sm:$0xff]  ;;  %v204_v38 = vld [vmem:[#allocation0 + $0x3] ss:$0 sm:$0xff] }
  0x15   :  { %v165_v18 = vmul.f32 %v158_v16, %v151_v15  ;;  %v167_v19 = vmul.f32 %v157_v13, %v151_v15  ;;  %v168_v20 = vmul.f32 %v158_v16, %v150_v14  ;;  %v183_v30 = vsel %vm156_vm1, %v180_v25, 0.0  ;;  %v205_v39 = vld [vmem:[#allocation2 + $0x3] ss:$0 sm:$0xff] }
  0x16   :  { %v207_v41 = vsel %vm156_vm1, %v204_v38, 0.0  ;;  %v208_v42 = vsel %vm156_vm1, %v205_v39, 0.0 }
  0x17   :  { %v166_v21 = vsub.f32 %v164_v17, %v165_v18  ;;  %v169_v22 = vadd.f32 %v168_v20, %v167_v19 }
  0x19   :  { %171 = vadd.xlane.f32.xlu0 %v166_v21 }
  0x1d   :  { %173 = vadd.xlane.f32.xlu0 %v169_v22 }
  0xa6   :  { %v172_v23 = vpop.xlane.xlu0 %171 }
  0xa7   :  { %v175_v26 = vsel %vm161_vm3, %v172_v23, %v150_v14 }
  0xa8   :  { %v189_v31 = vmul.f32 %v182_v27, %v175_v26  ;;  %v193_v35 = vmul.f32 %v183_v30, %v175_v26 }
  0xaa   :  { %v174_v28 = vpop.xlane.xlu0 %173 }
  0xab   :  { %v176_v29 = vsel %vm161_vm3, %v174_v28, %v151_v15 }
  0xac   :  { %v190_v32 = vmul.f32 %v183_v30, %v176_v29  ;;  %v192_v34 = vmul.f32 %v182_v27, %v176_v29 }
  0xae   :  { %v191_v33 = vsub.f32 %v189_v31, %v190_v32  ;;  %v194_v36 = vadd.f32 %v193_v35, %v192_v34 }
  0xb0   :  { %196 = vadd.xlane.f32.xlu1 %v191_v33 }
  0xb4   :  { %198 = vadd.xlane.f32.xlu1 %v194_v36 }
 0x13d   :  { %v197_v37 = vpop.xlane.xlu1 %196 }
 0x13e   :  { %v200_v40 = vsel %vm186_vm4, %v197_v37, %v175_v26 }
 0x13f   :  { %v218_v46 = vmul.f32 %v208_v42, %v200_v40  ;;  %v214_v47 = vmul.f32 %v207_v41, %v200_v40 }
 0x141   :  { %v199_v43 = vpop.xlane.xlu1 %198 }
 0x142   :  { %v201_v44 = vsel %vm186_vm4, %v199_v43, %v176_v29 }
 0x143   :  { %v217_v45 = vmul.f32 %v207_v41, %v201_v44  ;;  %v215_v48 = vmul.f32 %v208_v42, %v201_v44 }
 0x145   :  { %v219_v49 = vadd.f32 %v218_v46, %v217_v45  ;;  %v216_v50 = vsub.f32 %v214_v47, %v215_v48 }
 0x147   :  { %223 = vadd.xlane.f32.xlu1 %v219_v49  ;;  %221 = vadd.xlane.f32.xlu0 %v216_v50 }
 0x1d4   :  { %v224_v51 = vpop.xlane.xlu1 %223  ;;  %v222_v52 = vpop.xlane.xlu0 %221 }
 0x1d5   :  { %v226_v53 = vsel %vm211_vm5, %v224_v51, %v201_v44  ;;  %v225_v54 = vsel %vm211_vm5, %v222_v52, %v200_v40 }
 0x1d6   :  { %228 = vst [vmem:[#allocation6] sm:$0xff] %v226_v53  ;;  %227 = vst [vmem:[#allocation4] sm:$0xff] %v225_v54 }
 0x1dd   :  { %v238_v55 = vld [vmem:[#allocation6] sm:$0xf]  ;;  %v232_v56 = vld [vmem:[#allocation4] sm:$0xf] }
 0x1de   :  { %240 = vst [vmem:[#allocation7] sm:$0xf] %v238_v55  ;;  %234 = vst [vmem:[#allocation5] sm:$0xf] %v232_v56 }
 0x1e5   :  { %v363_v57 = vld [vmem:[#allocation7] sm:$0xf]  ;;  %v301_v58 = vld [vmem:[#allocation5] sm:$0xf] }
 0x1e6   :  { %364 = vst [vmem:[%s515_s3] sm:$0xf] %v363_v57  ;;  %302 = vst [vmem:[%s514_s2] sm:$0xf] %v301_v58 }

// kernel: custom-call.2
= control target key start
LH: loop header
LB: loop body
LE: loop exit
PB: predicated region body
PF: predicated region fallthrough
CT: control target
= control target key end

     0   :  { %2 = vsyncpa [#allocation0], 0  ;;  %s61_s0 = inlined_call_operand.hbm [shape: c64[2,2,4], index: 0, kind: input, shape index: {}]   ;;  %s62_s1 = inlined_call_operand.vmem [shape: f32[2,2,4], index: 1, kind: output, shape index: {}]  }
   0x1   :  { %s3_s8 = sshll.u32 %s62_s1, 4  ;;  %s9_s11 = scalar_lea.hbm %s61_s0, 64  ;;  %s4_s8 = int_to_ptr.vmem [resolvable:$true] %s3_s8 }
   0x2   :  { %p10_p0 = scmp.ne.s32.totalorder %s61_s0, %s9_s11  ;;  %s11_s16 = scalar_lea.hbm %s61_s0, 128 }
   0x3   :  { %p12_p1 = scmp.lt.u32.totalorder %s11_s16, %s9_s11  ;;  %p13_p2 = scmp.lt.u32.totalorder %s9_s11, %s61_s0 }
   0x5   :  { %p14_p3 = por %p13_p2, %p12_p1 }
   0x7   :  { %p15_p4 = pnand %p14_p3, %p10_p0 }
   0x9   :  { %18 = shalt.err (!%p15_p4)  }
   0xa   :  { %s19_s1 = scalar_lea.vmem %s4_s8, 64  ;;  %p24_p6 = scmp.lt.s32.totalorder %s4_s8, %s4_s8 }
   0xb   :  { %p20_p5 = scmp.ne.s32.totalorder %s4_s8, %s19_s1  ;;  %p25_p7 = scmp.lt.s32.totalorder %s19_s1, %s19_s1 }
   0xd   :  { %p26_p8 = por %p25_p7, %p24_p6 }
   0xf   :  { %p27_p9 = pnand %p26_p8, %p20_p5 }
  0x11   :  { %30 = shalt.err (!%p27_p9)  }
  0x12   :  { %6 = dma.hbm_to_vmem [thread:$0]  %s61_s0, 64, %s4_s8, [#allocation0] }
  0x13   :  { %31 = dma.done.wait [#allocation0], 64  }
  0x14   :  { %32 = vsyncadd [#allocation0], 4294967232 }
  0x15   :  { %8 = vsyncpa [#allocation0], 1 }

// kernel: custom-call.3
= control target key start
LH: loop header
LB: loop body
LE: loop exit
PB: predicated region body
PF: predicated region fallthrough
CT: control target
= control target key end

     0   :  { %s59_s0 = inlined_call_operand.hbm [shape: c64[2,2,4], index: 0, kind: input, shape index: {}]   ;;  %s60_s1 = inlined_call_operand.vmem [shape: f32[2,2,4], index: 1, kind: output, shape index: {}]  }
   0x1   :  { %s2_s8 = scalar_lea.hbm %s59_s0, 64 }
   0x2   :  { %3 = vsyncpa [#allocation0], 0  ;;  %s4_s11 = sshll.u32 %s60_s1, 4  ;;  %s34_s14 = scalar_lea.hbm %s59_s0, 128  ;;  %s5_s11 = int_to_ptr.vmem [resolvable:$true] %s4_s11 }
   0x3   :  { %p11_p0 = scmp.ne.s32.totalorder %s2_s8, %s34_s14  ;;  %p13_p1 = scmp.lt.u32.totalorder %s2_s8, %s59_s0 }
   0x4   :  { %p14_p2 = scmp.lt.u32.totalorder %s34_s14, %s34_s14  ;;  %p16_p4 = scmp.lt.u32.totalorder %s34_s14, %s2_s8 }
   0x6   :  { %p15_p3 = por %p14_p2, %p13_p1 }
   0x8   :  { %p17_p5 = por %p16_p4, %p15_p3 }
   0xa   :  { %p18_p6 = pnand %p17_p5, %p11_p0 }
   0xc   :  { %21 = shalt.err (!%p18_p6)  }
   0xd   :  { %s22_s17 = scalar_lea.vmem %s5_s11, 64  ;;  %p27_p8 = scmp.lt.s32.totalorder %s5_s11, %s5_s11 }
   0xe   :  { %p23_p7 = scmp.ne.s32.totalorder %s5_s11, %s22_s17  ;;  %p28_p9 = scmp.lt.s32.totalorder %s22_s17, %s22_s17 }
  0x10   :  { %p29_p10 = por %p28_p9, %p27_p8 }
  0x12   :  { %p30_p11 = pnand %p29_p10, %p23_p7 }
  0x14   :  { %33 = shalt.err (!%p30_p11)  }
  0x15   :  { %7 = dma.hbm_to_vmem [thread:$0]  %s2_s8, 64, %s5_s11, [#allocation0] }
  0x16   :  { %35 = dma.done.wait [#allocation0], 64  }
  0x17   :  { %36 = vsyncadd [#allocation0], 4294967232 }
  0x18   :  { %9 = vsyncpa [#allocation0], 1 }

// kernel: custom-call.29
= control target key start
LH: loop header
LB: loop body
LE: loop exit
PB: predicated region body
PF: predicated region fallthrough
CT: control target
= control target key end

     0   :  { %v592_v2 = vmov 0.0   ;;  %s631_s22 = smov 0   ;;  %s759_s0 = inlined_call_operand.vmem [shape: f32[4,4], index: 0, kind: input, shape index: {}]   ;;  %s760_s1 = inlined_call_operand.vmem [shape: f32[4,4], index: 1, kind: input, shape index: {}]   ;;  %s761_s2 = inlined_call_operand.vmem [shape: f32[4,4], index: 2, kind: output, shape index: {0}]   ;;  %s762_s3 = inlined_call_operand.vmem [shape: f32[4,4], index: 3, kind: output, shape index: {1}]   ;;  %s763_s4 = inlined_call_operand.vmem [shape: f32[4], index: 4, kind: output, shape index: {2}]   ;;  %s764_s5 = inlined_call_operand.vmem [shape: f32[4], index: 5, kind: output, shape index: {3}]  }
   0x1   :  { %v22_v0 = vld [vmem:[%s759_s0] sm:$0xf]  ;;  %81 = vst [vmem:[#allocation8] sm:$0x1] %v592_v2  ;;  %82 = vst [vmem:[#allocation10] sm:$0x1] %v592_v2 }
   0x2   :  { %v53_v1 = vld [vmem:[%s760_s1] sm:$0xf]  ;;  %23 = vst [vmem:[#allocation1] sm:$0xf] %v22_v0 }
   0x3   :  { %54 = vst [vmem:[#allocation3] sm:$0xf] %v53_v1 }
   0x9   :  { %v71_v3 = vld [vmem:[#allocation1] sm:$0xf] }
   0xa   :  { %v75_v4 = vld [vmem:[#allocation3] sm:$0xf]  ;;  %72 = vst [vmem:[#allocation0] sm:$0xf] %v71_v3 }
   0xb   :  { %76 = vst [vmem:[#allocation2] sm:$0xf] %v75_v4 }
  0x11   :  { %v77_v5 = vld [vmem:[#allocation0] sm:$0xff] }
  0x12   :  { %v79_v6 = vld [vmem:[#allocation2] sm:$0xff]  ;;  %78 = vst [vmem:[#allocation4] sm:$0xff] %v77_v5 }
  0x13   :  { %80 = vst [vmem:[#allocation6] sm:$0xff] %v79_v6 }
  0x14 LB: > { %v91_v7 = vlaneseq  ;;  %v640_v9 = vstv %s590_s22  ;;  %s128_s0 = scalar_lea.vmem [#allocation4], %s590_s22  ;;  %s129_s1 = scalar_lea.vmem [#allocation6], %s590_s22  ;;  %v594_v53 = vmov 1.0   ;;  %s590_s22 = sphi %s631_s22, %s88_s22  }
  0x15   : > { %s173_s23 = smov [#allocation4]  ;;  %s174_s24 = smov [#allocation6] }
  0x16   : > { %v637_v8 = vshrl.u32 %v91_v7, 7  ;;  %v673_v62 = vand.u32 127, %v91_v7  ;;  %s243_s25 = scalar_lea.vmem [#allocation13], %s590_s22  ;;  %s242_s26 = scalar_lea.vmem [#allocation12], %s590_s22 }
  0x17   : > { %s718_s27 = smov [#allocation13]  ;;  %s720_s28 = smov [#allocation4] }
  0x18   : > { %vm95_vm0 = vcmp.gt.s32.totalorder %v637_v8, %v640_v9  ;;  %vm96_vm1 = vcmp.lt.s32.totalorder %v637_v8, 4  ;;  %v177_v8 = vmov %v637_v8  ;;  %vm678_vm12 = vcmp.eq.s32.totalorder %v673_v62, %v640_v9  ;;  %s722_s29 = smov [#allocation6]  ;;  %s268_s30 = smov [#allocation12] }
  0x19   : > { %v89_v10 = vld [vmem:[#allocation4] sm:$0xff]  ;;  %vm97_vm2 = vmand %vm95_vm0, %vm96_vm1  ;;  %v130_v24 = vld [vmem:[%s128_s0] ss:$0 sm:$0xff]  ;;  %vm182_vm13 = vcmp.gt.s32.totalorder %v177_v8, %v640_v9  ;;  %vm183_vm14 = vcmp.lt.s32.totalorder %v177_v8, 4  ;;  %v272_v8 = vmov %v637_v8 }
  0x1a   : > { %v90_v11 = vld [vmem:[#allocation6] sm:$0xff]  ;;  %v98_v12 = vsel %vm97_vm2, %v89_v10, 0.0  ;;  %v647_v25 = vld [vmem:[%s129_s1] ss:$0 sm:$0xff]  ;;  %v132_v26 = vand.u32 2147483647, %v130_v24  ;;  %vm184_vm15 = vmand %vm182_vm13, %vm183_vm14 }
  0x1b   : > { %v99_v13 = vsel %vm97_vm2, %v90_v11, 0.0  ;;  %v103_v15 = vmul.f32 %v98_v12, %v98_v12  ;;  %v133_v27 = vand.u32 2147483647, %v647_v25  ;;  %vm167_vm8 = vcmp.eq.f32.partialorder %v647_v25, 0.0  ;;  %v178_v12 = vld [vmem:[%s173_s23] sm:$0xff] }
  0x1c   : > { %v100_v14 = vxor.u32 2147483648, %v99_v13  ;;  %vm158_vm9 = vcmp.lt.f32.partialorder %v130_v24, 0.0  ;;  %v164_v60 = vxor.u32 2147483648, %v647_v25  ;;  %v277_v58 = vld [vmem:[%s722_s29] sm:$0xff]  ;;  %s304_s29 = smov %s722_s29 }
  0x1d   : > { %v134_v32 = vmax.f32 %v132_v26, %v133_v27  ;;  %s354_s7 = scalar_lea.vmem %s304_s29, %s590_s22 }
  0x1e   : > { %v104_v16 = vmul.f32 %v100_v14, %v99_v13  ;;  %v179_v13 = vld [vmem:[%s174_s24] sm:$0xff] }
  0x20   : > { %v105_v17 = vsub.f32 %v103_v15, %v104_v16  ;;  %v185_v16 = vsel %vm184_vm15, %v178_v12, 0.0 }
  0x21   : > { %vm221_vm2 = vcmp.eq.f32.partialorder %v185_v16, 0.0 }
  0x22   : > { %v110_v18 = vrot.slane %v105_v17, 4 }
  0x24   : > { %v111_v19 = vadd.f32 %v110_v18, %v105_v17  ;;  %v186_v17 = vsel %vm184_vm15, %v179_v13, 0.0 }
  0x25   : > { %vm223_vm1 = vcmp.eq.f32.partialorder %v186_v17, 0.0 }
  0x26   : > { %v112_v20 = vrot.slane %v111_v19, 2 }
  0x28   : > { %v113_v21 = vadd.f32 %v112_v20, %v111_v19 }
  0x2a   : > { %v114_v22 = vrot.slane %v113_v21, 1 }
  0x2c   : > { %v115_v23 = vadd.f32 %v114_v22, %v113_v21 }
  0x2e   : > { %572 = vrsqrt.f32 %v115_v23  ;;  %vm118_vm3 = vcmp.eq.f32.partialorder %v115_v23, inf  ;;  %v121_v29 = vand.u32 2147483648, %v115_v23  ;;  %vm120_vm4 = vcmp.eq.f32.partialorder %v115_v23, 0.0 }
  0x2f   : > { %vm655_vm10 = vmand %vm120_vm4, %vm167_vm8 }
  0x38   : > { %v573_v28 = vpop.eup %572 }
  0x39   : > { %v117_v30 = vmul.f32 %v573_v28, %v115_v23 }
  0x3b   : > { %v119_v31 = vsel %vm118_vm3, %v115_v23, %v117_v30  ;;  %v219_v23 = vand.u32 2147483648, %v186_v17 }
  0x3c   : > { %v122_v33 = vsel %vm120_vm4, %v121_v29, %v119_v31  ;;  %vm288_vm4 = vcmp.lt.s32.totalorder %v272_v8, 4  ;;  %v309_v8 = vmov %v637_v8 }
  0x3d   : > { %v135_v34 = vand.u32 2147483647, %v122_v33  ;;  %v220_v30 = vor.u32 inf, %v219_v23 }
  0x3f   : > { %v136_v35 = vmax.f32 %v134_v32, %v135_v34 }
  0x41   : > { %574 = vrcp.f32 %v136_v35  ;;  %vm148_vm7 = vcmp.eq.f32.partialorder %v136_v35, 0.0 }
  0x4b   : > { %v575_v36 = vpop.eup %574 }
  0x4c   : > { %v138_v37 = vmul.f32 %v575_v36, %v132_v26  ;;  %v141_v38 = vmul.f32 %v575_v36, %v133_v27  ;;  %v145_v39 = vmul.f32 %v575_v36, %v135_v34 }
  0x4e   : > { %v139_v40 = vmul.f32 %v138_v37, %v138_v37  ;;  %v142_v41 = vmul.f32 %v141_v38, %v141_v38  ;;  %v146_v42 = vmul.f32 %v145_v39, %v145_v39 }
  0x50   : > { %v143_v43 = vadd.f32 %v142_v41, %v139_v40 }
  0x52   : > { %v147_v44 = vadd.f32 %v146_v42, %v143_v43 }
  0x54   : > { %576 = vrsqrt.f32 %v147_v44  ;;  %vm151_vm5 = vcmp.eq.f32.partialorder %v147_v44, inf  ;;  %v154_v46 = vand.u32 2147483648, %v147_v44  ;;  %vm153_vm6 = vcmp.eq.f32.partialorder %v147_v44, 0.0 }
  0x5e   : > { %v577_v45 = vpop.eup %576 }
  0x5f   : > { %v150_v47 = vmul.f32 %v577_v45, %v147_v44 }
  0x61   : > { %v152_v48 = vsel %vm151_vm5, %v147_v44, %v150_v47  ;;  %v261_v44 = vld [vmem:[#allocation10] ss:$0 sm:$0xff]  ;;  %v260_v47 = vld [vmem:[#allocation8] ss:$0 sm:$0xff]  ;;  %vm347_vm5 = vcmp.ge.s32.totalorder %v309_v8, %v640_v9 }
  0x62   : > { %v155_v49 = vsel %vm153_vm6, %v154_v46, %v152_v48  ;;  %vm337_vm6 = vcmp.gt.s32.totalorder %v673_v62, %v640_v9 }
  0x63   : > { %v156_v50 = vmul.f32 %v155_v49, %v136_v35  ;;  %v224_v35 = vsel %vm223_vm1, nan, %v220_v30 }
  0x65   : > { %v157_v51 = vsel %vm148_vm7, 0.0, %v156_v50  ;;  %vm348_vm7 = vmand %vm678_vm12, %vm347_vm5 }
  0x66   : > { %v159_v52 = vxor.u32 2147483648, %v157_v51 }
  0x68   : > { %v160_v54 = vsel %vm158_vm9, %v157_v51, %v159_v52  ;;  %v593_v51 = vmov 0.0  }
  0x69   : > { %v661_v55 = vsel %vm655_vm10, %v130_v24, %v160_v54  ;;  %578 = vrcp.f32 %v160_v54  ;;  %v161_v61 = vsub.f32 %v160_v54, %v130_v24 }
  0x6a   : > { %v172_v56 = vsub.f32 %v130_v24, %v661_v55  ;;  %v217_v24 = vand.u32 2147483648, %v185_v16 }
  0x6c   : > { %v189_v57 = vand.u32 2147483647, %v172_v56  ;;  %v218_v31 = vor.u32 inf, %v217_v24  ;;  %vm214_vm0 = vcmp.eq.f32.partialorder %v172_v56, 0.0 }
  0x6d   : > { %vm216_vm3 = vmand %vm214_vm0, %vm167_vm8 }
  0x6e   : > { %vm664_vm11 = vcmp.lt.f32.partialorder %v189_v57, %v133_v27  ;;  %v222_v36 = vsel %vm221_vm2, nan, %v218_v31  ;;  %v276_v57 = vld [vmem:[%s720_s28] sm:$0xff]  ;;  %s303_s28 = smov %s720_s28 }
  0x6f   : > { %v193_v59 = vsel %vm664_vm11, %v647_v25, %v172_v56  ;;  %v192_v6 = vsel %vm664_vm11, %v172_v56, %v647_v25  ;;  %s353_s6 = scalar_lea.vmem %s303_s28, %s590_s22  ;;  %s88_s22 = sadd.s32 1, %s590_s22  }
  0x70   : > { %580 = vrcp.f32 %v193_v59  ;;  %p85_p0 = scmp.ge.s32.totalorder %s88_s22, 4  }
  0x73   : > { %v579_v63 = vpop.eup %578 }
  0x74   : > { %v166_v0 = vmul.f32 %v579_v63, %v164_v60  ;;  %v163_v1 = vmul.f32 %v579_v63, %v161_v61 }
  0x76   : > { %v171_v3 = vsel %vm655_vm10, 0.0, %v166_v0  ;;  %v170_v4 = vsel %vm655_vm10, 0.0, %v163_v1 }
  0x77   : > { %v251_v5 = vsel %vm678_vm12, %v171_v3, 0.0  ;;  %v250_v7 = vsel %vm678_vm12, %v170_v4, 0.0 }
  0x78   : > { %254 = vadd.xlane.f32.xlu1 %v251_v5 }
  0x7a   : > { %v581_v10 = vpop.eup %580 }
  0x7b   : > { %v195_v11 = vmul.f32 %v581_v10, %v192_v6 }
  0x7c   : > { %252 = vadd.xlane.f32.xlu1 %v250_v7 }
  0x7d   : > { %v196_v14 = vmul.f32 %v195_v11, %v172_v56  ;;  %v198_v15 = vmul.f32 %v195_v11, %v647_v25  ;;  %v200_v21 = vmul.f32 %v195_v11, %v185_v16  ;;  %v202_v22 = vmul.f32 %v195_v11, %v186_v17 }
  0x7f   : > { %v197_v18 = vadd.f32 %v196_v14, %v647_v25  ;;  %v199_v19 = vadd.f32 %v198_v15, %v172_v56  ;;  %v209_v26 = vsub.f32 %v202_v22, %v185_v16  ;;  %v211_v27 = vsub.f32 %v186_v17, %v200_v21 }
  0x80   : > { %v201_v28 = vadd.f32 %v200_v21, %v186_v17  ;;  %v203_v29 = vadd.f32 %v202_v22, %v185_v16 }
  0x81   : > { %v205_v20 = vsel %vm664_vm11, %v197_v18, %v199_v19  ;;  %v212_v32 = vsel %vm664_vm11, %v209_v26, %v211_v27 }
  0x82   : > { %582 = vrcp.f32 %v205_v20  ;;  %v204_v33 = vsel %vm664_vm11, %v201_v28, %v203_v29 }
  0x8c   : > { %v583_v34 = vpop.eup %582 }
  0x8d   : > { %v213_v37 = vmul.f32 %v583_v34, %v212_v32  ;;  %v207_v38 = vmul.f32 %v583_v34, %v204_v33  ;;  %v334_v34 = vld [vmem:[%s303_s28] sm:$0xff] }
  0x8f   : > { %v226_v39 = vsel %vm216_vm3, %v224_v35, %v213_v37  ;;  %v225_v40 = vsel %vm216_vm3, %v222_v36, %v207_v38  ;;  %v335_v35 = vld [vmem:[%s304_s29] sm:$0xff] }
  0x90   : > { %v229_v41 = vsel %vm655_vm10, 0.0, %v226_v39  ;;  %v228_v42 = vsel %vm655_vm10, 0.0, %v225_v40 }
  0x91   : > { %v235_v43 = vsel %vm678_vm12, %v229_v41, 0.0  ;;  %v234_v25 = vsel %vm678_vm12, %v228_v42, 0.0 }
  0x92   : > { %238 = vadd.xlane.f32.xlu0 %v235_v43 }
  0x96   : > { %236 = vadd.xlane.f32.xlu0 %v234_v25 }
 0x105   : > { %v255_v45 = vpop.xlane.xlu1 %254 }
 0x106   : > { %v263_v46 = vsel %vm678_vm12, %v255_v45, %v261_v44  ;;  %v310_v20 = vxor.u32 2147483648, %v255_v45 }
 0x107   : > { %265 = vst [vmem:[#allocation10] sm:$0x1] %v263_v46 }
 0x109   : > { %v253_v48 = vpop.xlane.xlu1 %252 }
 0x10a   : > { %v262_v49 = vsel %vm678_vm12, %v253_v48, %v260_v47 }
 0x10b   : > { %264 = vst [vmem:[#allocation8] sm:$0x1] %v262_v49 }
 0x10e   :  { %v386_v47 = vld [vmem:[#allocation10] sm:$0x1] (%p85_p0) }
 0x10f   :  { %388 = vst [vmem:[#allocation11] sm:$0x1] (%p85_p0), %v386_v47 }
 0x112   :  { %v380_v46 = vld [vmem:[#allocation8] sm:$0x1] (%p85_p0) }
 0x113   :  { %382 = vst [vmem:[#allocation9] sm:$0x1] (%p85_p0), %v380_v46 }
 0x116   :  { %v501_v49 = vld [vmem:[#allocation11] sm:$0x1] (%p85_p0) }
 0x117   :  { %502 = vst [vmem:[%s764_s5] sm:$0x1] (%p85_p0), %v501_v49 }
 0x11a   :  { %v468_v2 = vld [vmem:[#allocation9] sm:$0x1] (%p85_p0) }
 0x11b   :  { %469 = vst [vmem:[%s763_s4] sm:$0x1] (%p85_p0), %v468_v2 }
 0x11f   : > { %v239_v50 = vpop.xlane.xlu0 %238 }
 0x120   : > { %241 = vst [vmem:[#allocation13] sm:$0xff] %v239_v50 }
 0x121   : > { %245 = vst [vmem:[%s243_s25] sm:$0x1] %v593_v51 }
 0x123   : > { %v237_v52 = vpop.xlane.xlu0 %236 }
 0x124   : > { %240 = vst [vmem:[#allocation12] sm:$0xff] %v237_v52 }
 0x125   : > { %244 = vst [vmem:[%s242_s26] sm:$0x1] %v594_v53 }
 0x128   : > { %v275_v54 = vld [vmem:[%s718_s27] sm:$0xff]  ;;  %s306_s27 = smov %s718_s27 }
 0x129   : > { %v278_v56 = vxor.u32 2147483648, %v275_v54  ;;  %v324_v29 = vld [vmem:[%s306_s27] sm:$0xff] }
 0x12b   : > { %v282_v61 = vmul.f32 %v278_v56, %v277_v58  ;;  %v285_v0 = vmul.f32 %v278_v56, %v276_v57 }
 0x12c   : > { %v274_v59 = vld [vmem:[%s268_s30] sm:$0xff]  ;;  %s305_s30 = smov %s268_s30 }
 0x12d   : > { %v281_v60 = vmul.f32 %v276_v57, %v274_v59  ;;  %v284_v63 = vmul.f32 %v277_v58, %v274_v59  ;;  %v323_v28 = vld [vmem:[%s305_s30] sm:$0xff] }
 0x12f   : > { %v283_v1 = vsub.f32 %v281_v60, %v282_v61  ;;  %v286_v3 = vadd.f32 %v285_v0, %v284_v63 }
 0x131   : > { %v289_v4 = vsel %vm288_vm4, %v283_v1, 0.0  ;;  %v290_v5 = vsel %vm288_vm4, %v286_v3, 0.0 }
 0x132   : > { %v291_v6 = vrot.slane %v289_v4, 4  ;;  %v297_v7 = vrot.slane %v290_v5, 4 }
 0x134   : > { %v292_v10 = vadd.f32 %v291_v6, %v289_v4  ;;  %v298_v11 = vadd.f32 %v297_v7, %v290_v5 }
 0x136   : > { %v293_v12 = vrot.slane %v292_v10, 2  ;;  %v299_v13 = vrot.slane %v298_v11, 2 }
 0x138   : > { %v294_v14 = vadd.f32 %v293_v12, %v292_v10  ;;  %v300_v15 = vadd.f32 %v299_v13, %v298_v11 }
 0x13a   : > { %v295_v16 = vrot.slane %v294_v14, 1  ;;  %v301_v17 = vrot.slane %v300_v15, 1 }
 0x13c   : > { %v296_v18 = vadd.f32 %v295_v16, %v294_v14  ;;  %v302_v19 = vadd.f32 %v301_v17, %v300_v15 }
 0x13e   : > { %v314_v21 = vmul.f32 %v310_v20, %v302_v19  ;;  %v316_v22 = vmul.f32 %v310_v20, %v296_v18  ;;  %v313_v23 = vmul.f32 %v296_v18, %v253_v48  ;;  %v317_v24 = vmul.f32 %v302_v19, %v253_v48 }
 0x140   : > { %v315_v26 = vsub.f32 %v313_v23, %v314_v21  ;;  %v318_v27 = vadd.f32 %v317_v24, %v316_v22 }
 0x142   : > { %v327_v30 = vmul.f32 %v323_v28, %v315_v26  ;;  %v328_v31 = vmul.f32 %v324_v29, %v318_v27  ;;  %v330_v32 = vmul.f32 %v323_v28, %v318_v27  ;;  %v331_v33 = vmul.f32 %v324_v29, %v315_v26 }
 0x144   : > { %v329_v36 = vsub.f32 %v327_v30, %v328_v31  ;;  %v332_v37 = vadd.f32 %v331_v33, %v330_v32 }
 0x146   : > { %v338_v38 = vsub.f32 %v334_v34, %v329_v36  ;;  %v339_v39 = vsub.f32 %v335_v35, %v332_v37 }
 0x148   : > { %v340_v40 = vsel %vm337_vm6, %v338_v38, %v334_v34  ;;  %v341_v41 = vsel %vm337_vm6, %v339_v39, %v335_v35 }
 0x149   : > { %v349_v42 = vsel %vm348_vm7, %v323_v28, %v340_v40  ;;  %v350_v43 = vsel %vm348_vm7, %v324_v29, %v341_v41 }
 0x14a   : > { %351 = vst [vmem:[%s303_s28] sm:$0xff] %v349_v42  ;;  %352 = vst [vmem:[%s304_s29] sm:$0xff] %v350_v43 }
 0x14e   :  { %87 = sbr.rel (!%p85_p0) target bundleno = 20 (0x14), region = 244 }
 0x151   : > { %v355_v25 = vld [vmem:[%s353_s6] ss:$0 sm:$0xff] }
 0x152   : > { %v356_v8 = vld [vmem:[%s354_s7] ss:$0 sm:$0xff]  ;;  %v361_v44 = vsel %vm678_vm12, %v661_v55, %v355_v25 }
 0x153   : > { %v362_v9 = vsel %vm678_vm12, 0.0, %v356_v8  ;;  %363 = vst [vmem:[%s353_s6] sm:$0x1] %v361_v44 }
 0x154   : > { %364 = vst [vmem:[%s354_s7] sm:$0x1] %v362_v9 }
 0x15a   :  { %v368_v62 = vld [vmem:[#allocation4] sm:$0xf] }
 0x15b   :  { %v374_v45 = vld [vmem:[#allocation6] sm:$0xf]  ;;  %370 = vst [vmem:[#allocation5] sm:$0xf] %v368_v62 }
 0x15c   :  { %376 = vst [vmem:[#allocation7] sm:$0xf] %v374_v45 }
 0x162   :  { %v404_v55 = vld [vmem:[#allocation5] sm:$0xf] }
 0x163   :  { %v435_v48 = vld [vmem:[#allocation7] sm:$0xf]  ;;  %405 = vst [vmem:[%s761_s2] sm:$0xf] %v404_v55 }
 0x164   :  { %436 = vst [vmem:[%s762_s3] sm:$0xf] %v435_v48 }

// kernel: neg.26
= control target key start
LH: loop header
LB: loop body
LE: loop exit
PB: predicated region body
PF: predicated region fallthrough
CT: control target
= control target key end

     0   :  { %s24_s0 = inlined_call_operand.vmem [shape: f32[4,4], index: 0, kind: input, shape index: {}]   ;;  %s25_s1 = inlined_call_operand.vmem [shape: f32[4,4], index: 1, kind: output, shape index: {}]  }
   0x1   :  { %v2_v0 = vld [vmem:[%s24_s0] sm:$0xf] }
   0x2   :  { %v5_v1 = vxor.u32 2147483648, %v2_v0 }
   0x4   :  { %7 = vst [vmem:[%s25_s1] sm:$0xf] %v5_v1 }

// kernel: squeeze.36
= control target key start
LH: loop header
LB: loop body
LE: loop exit
PB: predicated region body
PF: predicated region fallthrough
CT: control target
= control target key end

     0   :  { %vm7_vm0 = vcmask 31744   ;;  %s30_s8 = smov 120   ;;  %s47_s0 = inlined_call_operand.vmem [shape: f32[12], index: 0, kind: input, shape index: {}]   ;;  %s48_s1 = inlined_call_operand.vmem [shape: f32[3,4], index: 1, kind: output, shape index: {}]  }
   0x1   :  { %v4_v0 = vld [vmem:[%s47_s0] sm:$0x1]  ;;  %s29_s0 = smov 124  }
   0x2   :  { %5 = vst [vmem:[#allocation1] sm:$0x1] %v4_v0 }
   0x9   :  { %v9_v1 = vld [vmem:[#allocation1] sm:$0x1]  }
   0xa   :  { %v6_v2 = vld [vmem:[#allocation1] sm:$0x1]   ;;  %10 = vrot.lane.b32.xlu0 %v9_v1, %s29_s0 }
   0xb   :  { %8 = vst.msk [vmem:[#allocation0] sm:$0x1] %vm7_vm0, %v6_v2   ;;  %v15_v3 = vld [vmem:[#allocation1] sm:$0x1]  }
   0xe   :  { %16 = vrot.lane.b32.xlu0 %v15_v3, %s30_s8 }
  0x7c   :  { %v11_v4 = vpop.permute.xlu0 %10  }
  0x7d   :  { %14 = vst.msk [vmem:[#allocation0 + $0x1] sm:$0x1] %vm7_vm0, %v11_v4  }
  0x80   :  { %v17_v5 = vpop.permute.xlu0 %16  }
  0x81   :  { %20 = vst.msk [vmem:[#allocation0 + $0x2] sm:$0x1] %vm7_vm0, %v17_v5  }
  0x88   :  { %v24_v6 = vld [vmem:[#allocation0] sm:$0xf] }
  0x89   :  { %26 = vst [vmem:[%s48_s1] sm:$0xf] %v24_v6 }

// kernel: _forward_impl.1
= control target key start
LH: loop header
LB: loop body
LE: loop exit
PB: predicated region body
PF: predicated region fallthrough
CT: control target
= control target key end

     0   :  { %vm18_vm0 = vcmask 64512   ;;  %v3056_v0 = vmov 0.0   ;;  %vm3057_vm1 = vmmov 0   ;;  %v3058_v5 = vmov 0.0|0.0   ;;  %s3059_s20 = smov 120   ;;  %s3541_s1 = inlined_call_operand.vmem [shape: f32[8,8,16], index: 1, kind: input, shape index: {}]   ;;  %s3542_s0 = inlined_call_operand.vmem [shape: f32[24,8], index: 0, kind: input, shape index: {}]   ;;  %s3543_s2 = inlined_call_operand.vmem [shape: f32[8,2,24,24], index: 2, kind: input, shape index: {}]   ;;  %s3544_s3 = inlined_call_operand.vmem [shape: f32[24,8], index: 3, kind: output, shape index: {}]  }
   0x1   :  { %2588 = vmatprep.subr.mxu1 %v3056_v0  ;;  %v17_v1 = vld [vmem:[%s3541_s1] sm:$0xff]  ;;  %2590 = vmatprep.mubr.msk.f32.mxu1 %vm3057_vm1, %v3056_v0  ;;  %v15_v3 = vld [vmem:[%s3542_s0 + $0x8] sm:$0xff]  ;;  %v16_v4 = vld [vmem:[%s3542_s0 + $0x10] sm:$0xff]  ;;  %vm127_vm2 = vcmask 195584  }
   0x2   :  { %v14_v2 = vld [vmem:[%s3542_s0] sm:$0xff]  ;;  %2589 = vmatpush3.msra.mxu1 %v17_v1  ;;  %2629 = vmatprep.subr.mxu0 %v3056_v0  ;;  %v2339_v19 = vld [vmem:[%s3543_s2 + $0x18] sm:$0xff]  ;;  %v2341_v21 = vld [vmem:[%s3543_s2 + $0x28] sm:$0xff] }
   0x3   :  { %2591 = vmatmul.mubr.msk.f32.vlgmr.msra.gmra.mrb[0].mxu1 %vm18_vm0, %v14_v2  ;;  %2631 = vmatprep.mubr.msk.f32.mxu0 %vm3057_vm1, %v3056_v0  ;;  %v2340_v20 = vld [vmem:[%s3543_s2 + $0x20] sm:$0xff]  ;;  %v109_v23 = vld [vmem:[%s3543_s2 + $0x8] sm:$0xff]  ;;  %v110_v24 = vld [vmem:[%s3543_s2 + $0x10] sm:$0xff] }
   0x4   :  { %2593 = vmatprep.mubr.msk.f32.mxu1 %vm3057_vm1, %v3056_v0  ;;  %2916 = vmatprep.subr.bf16.mxu1 %v3058_v5  ;;  %v108_v22 = vld [vmem:[%s3543_s2] sm:$0xff]  ;;  %v2348_v25 = vld [vmem:[%s3541_s1 + $0x8] sm:$0xff]  ;;  %v2364_v40 = vld [vmem:[%s3541_s1 + $0x10] sm:$0xff] }
   0x5   :  { %2630 = vmatpush3.msra.mxu0 %v2348_v25  ;;  %v2355_v45 = vld [vmem:[%s3543_s2 + $0x48] sm:$0xff]  ;;  %v2356_v47 = vld [vmem:[%s3543_s2 + $0x50] sm:$0xff]  ;;  %v2357_v48 = vld [vmem:[%s3543_s2 + $0x58] sm:$0xff] }
   0x6   :  { %2922 = vmatprep.subr.bf16.mxu0 %v3058_v5  ;;  %v2352_v49 = vld [vmem:[%s3543_s2 + $0x30] sm:$0xff]  ;;  %v2353_v50 = vld [vmem:[%s3543_s2 + $0x38] sm:$0xff]  ;;  %v2354_v51 = vld [vmem:[%s3543_s2 + $0x40] sm:$0xff] }
   0x7   :  { %2594 = vmatmul.mubr.msk.f32.gmra.mrb[2].mxu1 %vm18_vm0, %v15_v3  ;;  %v2380_v3 = vld [vmem:[%s3541_s1 + $0x18] sm:$0xff] }
   0x8   :  { %2596 = vmatprep.mubr.msk.f32.mxu1 %vm3057_vm1, %v3056_v0 }
   0xb   :  { %2597 = vmatmul.mubr.msk.f32.gmra.mrb[4].mxu1 %vm18_vm0, %v16_v4 }
   0xc   :  { %2605 = vmatprep.mubr.msk.f32.mxu1 %vm3057_vm1, %v3056_v0 }
  0xd6   :  { %v94_v6 = vpop.f32.mrb[0].mxu1 }
  0xd7   :  { %v2592_v7 = vpop.f32.mrb[1].mxu1 }
  0xda   :  { %v99_v8 = vpop.f32.mrb[2].mxu1 }
  0xdb   :  { %v2920_v9 = vpack.c.bf16 %v99_v8, %v94_v6  ;;  %v2595_v10 = vpop.f32.mrb[3].mxu1  ;;  %v3016_v11 = vpack.i.bf16 %v99_v8, %v94_v6 }
  0xdd   :  { %3017 = vrot.lane.b32.xlu0 %v3016_v11, %s3059_s20  ;;  %v2372_v11 = vld [vmem:[%s3543_s2 + $0x80] sm:$0xff] }
  0xde   :  { %v104_v12 = vpop.f32.mrb[4].mxu1 }
  0xdf   :  { %v2598_v13 = vpop.f32.mrb[5].mxu1 }
  0xe0   :  { %v2368_v13 = vld [vmem:[%s3543_s2 + $0x60] sm:$0xff] }
  0xe1   :  { %122 = vrot.lane.b32.xlu0 %v104_v12, %s3059_s20 }
 0x14f   :  { %v3018_v14 = vpop.permute.xlu0 %3017 }
 0x150   :  { %v3020_v15 = vunpack.i.h.bf16 %v3018_v14  ;;  %v3019_v16 = vunpack.i.l.bf16 %v3018_v14  ;;  %v2369_v14 = vld [vmem:[%s3543_s2 + $0x68] sm:$0xff] }
 0x152   :  { %v2917_v17 = vpack.c.bf16 %v3020_v15, %v3019_v16  ;;  %v2370_v15 = vld [vmem:[%s3543_s2 + $0x70] sm:$0xff] }
 0x153   :  { %v123_v18 = vpop.permute.xlu0 %122 }
 0x154   :  { %2918 = vmatpush3.bf16.msra.mxu1 %v2917_v17 }
 0x155   :  { %2603 = vmatprep.subr.mxu1 %v3056_v0 }
 0x158   :  { %2604 = vmatpush3.msra.mxu1 %v123_v18 }
 0x159   :  { %2606 = vmatmul.mubr.msk.f32.vlgmr.msra.gmra.mrb[6].mxu1 %vm127_vm2, %v2339_v19  ;;  %2919 = vmatprep.subr.bf16.mxu1 %v3058_v5 }
 0x15a   :  { %2921 = vmatpush3.bf16.msra.mxu1 %v2920_v9  ;;  %2608 = vmatprep.mubr.msk.f32.mxu1 %vm3057_vm1, %v3056_v0  ;;  %v2371_v9 = vld [vmem:[%s3543_s2 + $0x78] sm:$0xff] }
 0x15b   :  { %2618 = vmatprep.subr.mxu1 %v3056_v0 }
 0x15d   :  { %2609 = vmatmul.mubr.msk.f32.gmra.mrb[8].mxu1 %vm127_vm2, %v2340_v20 }
 0x15e   :  { %2619 = vmatpush3.msra.mxu1 %v104_v12  ;;  %2611 = vmatprep.mubr.msk.f32.mxu1 %vm3057_vm1, %v3056_v0  ;;  %v2373_v12 = vld [vmem:[%s3543_s2 + $0x88] sm:$0xff] }
 0x15f   :  { %2670 = vmatprep.subr.mxu1 %v3056_v0 }
 0x161   :  { %2612 = vmatmul.mubr.msk.f32.gmra.mrb[10].mxu1 %vm127_vm2, %v2341_v21 }
 0x162   :  { %2620 = vmatprep.mubr.msk.f32.mxu1 %vm3057_vm1, %v3056_v0 }
 0x165   :  { %2621 = vmatmul.mubr.msk.f32.vlgmr.msra.gmra.mrb[6].mxu1 %vm127_vm2, %v108_v22 }
 0x166   :  { %2623 = vmatprep.mubr.msk.f32.mxu1 %vm3057_vm1, %v3056_v0  ;;  %2671 = vmatpush3.msra.mxu1 %v2364_v40  ;;  %v2385_v40 = vld [vmem:[%s3543_s2 + $0x98] sm:$0xff] }
 0x167   :  { %2928 = vmatprep.subr.bf16.mxu1 %v3058_v5 }
 0x169   :  { %2624 = vmatmul.mubr.msk.f32.gmra.mrb[8].mxu1 %vm127_vm2, %v109_v23 }
 0x16a   :  { %2626 = vmatprep.mubr.msk.f32.mxu1 %vm3057_vm1, %v3056_v0 }
 0x16d   :  { %2627 = vmatmul.mubr.msk.f32.gmra.mrb[10].mxu1 %vm127_vm2, %v110_v24 }
 0x16e   :  { %2672 = vmatprep.mubr.msk.f32.mxu1 %vm3057_vm1, %v3056_v0 }
 0x238   :  { %v292_v26 = vpop.f32.mrb[6].mxu1 }
 0x239   :  { %v2622_v27 = vpop.f32.mrb[7].mxu1  ;;  %2632 = vmatmul.mubr.msk.f32.vlgmr.msra.gmra.mrb[0].mxu0 %vm18_vm0, %v292_v26 }
 0x23a   :  { %2634 = vmatprep.mubr.msk.f32.mxu0 %vm3057_vm1, %v3056_v0 }
 0x23c   :  { %v297_v28 = vpop.f32.mrb[8].mxu1 }
 0x23d   :  { %v2625_v29 = vpop.f32.mrb[9].mxu1  ;;  %2635 = vmatmul.mubr.msk.f32.gmra.mrb[2].mxu0 %vm18_vm0, %v297_v28 }
 0x23e   :  { %2637 = vmatprep.mubr.msk.f32.mxu0 %vm3057_vm1, %v3056_v0 }
 0x240   :  { %v302_v30 = vpop.f32.mrb[10].mxu1 }
 0x241   :  { %v2628_v31 = vpop.f32.mrb[11].mxu1  ;;  %2638 = vmatmul.mubr.msk.f32.gmra.mrb[4].mxu0 %vm18_vm0, %v302_v30  ;;  %v2396_v30 = vld [vmem:[%s3541_s1 + $0x20] sm:$0xff] }
 0x242   :  { %2646 = vmatprep.mubr.msk.f32.mxu0 %vm3057_vm1, %v3056_v0 }
 0x30c   :  { %v383_v32 = vpop.f32.mrb[0].mxu0 }
 0x30d   :  { %v2633_v33 = vpop.f32.mrb[1].mxu0 }
 0x310   :  { %v388_v34 = vpop.f32.mrb[2].mxu0 }
 0x311   :  { %v2926_v35 = vpack.c.bf16 %v388_v34, %v383_v32  ;;  %v2636_v36 = vpop.f32.mrb[3].mxu0  ;;  %v3021_v37 = vpack.i.bf16 %v388_v34, %v383_v32 }
 0x313   :  { %3022 = vrot.lane.b32.xlu1 %v3021_v37, %s3059_s20  ;;  %v2388_v37 = vld [vmem:[%s3543_s2 + $0xb0] sm:$0xff] }
 0x314   :  { %v393_v38 = vpop.f32.mrb[4].mxu0 }
 0x315   :  { %v2639_v39 = vpop.f32.mrb[5].mxu0 }
 0x316   :  { %v2384_v39 = vld [vmem:[%s3543_s2 + $0x90] sm:$0xff] }
 0x317   :  { %412 = vrot.lane.b32.xlu1 %v393_v38, %s3059_s20 }
 0x385   :  { %v3023_v41 = vpop.permute.xlu1 %3022 }
 0x386   :  { %v3025_v42 = vunpack.i.h.bf16 %v3023_v41  ;;  %v3024_v43 = vunpack.i.l.bf16 %v3023_v41  ;;  %v2386_v41 = vld [vmem:[%s3543_s2 + $0xa0] sm:$0xff] }
 0x388   :  { %v2923_v44 = vpack.c.bf16 %v3025_v42, %v3024_v43 }
 0x389   :  { %v413_v46 = vpop.permute.xlu1 %412 }
 0x38a   :  { %2924 = vmatpush3.bf16.msra.mxu0 %v2923_v44 }
 0x38b   :  { %2644 = vmatprep.subr.mxu0 %v3056_v0 }
 0x38e   :  { %2645 = vmatpush3.msra.mxu0 %v413_v46 }
 0x38f   :  { %2647 = vmatmul.mubr.msk.f32.vlgmr.msra.gmra.mrb[6].mxu0 %vm127_vm2, %v2355_v45  ;;  %2925 = vmatprep.subr.bf16.mxu0 %v3058_v5 }
 0x390   :  { %2927 = vmatpush3.bf16.msra.mxu0 %v2926_v35  ;;  %2649 = vmatprep.mubr.msk.f32.mxu0 %vm3057_vm1, %v3056_v0  ;;  %v2387_v35 = vld [vmem:[%s3543_s2 + $0xa8] sm:$0xff] }
 0x391   :  { %2659 = vmatprep.subr.mxu0 %v3056_v0 }
 0x393   :  { %2650 = vmatmul.mubr.msk.f32.gmra.mrb[8].mxu0 %vm127_vm2, %v2356_v47 }
 0x394   :  { %2660 = vmatpush3.msra.mxu0 %v393_v38  ;;  %2652 = vmatprep.mubr.msk.f32.mxu0 %vm3057_vm1, %v3056_v0  ;;  %v2389_v38 = vld [vmem:[%s3543_s2 + $0xb8] sm:$0xff] }
 0x395   :  { %2711 = vmatprep.subr.mxu0 %v3056_v0 }
 0x397   :  { %2653 = vmatmul.mubr.msk.f32.gmra.mrb[10].mxu0 %vm127_vm2, %v2357_v48 }
 0x398   :  { %2661 = vmatprep.mubr.msk.f32.mxu0 %vm3057_vm1, %v3056_v0 }
 0x39b   :  { %2662 = vmatmul.mubr.msk.f32.vlgmr.msra.gmra.mrb[6].mxu0 %vm127_vm2, %v2352_v49 }
 0x39c   :  { %2664 = vmatprep.mubr.msk.f32.mxu0 %vm3057_vm1, %v3056_v0  ;;  %2712 = vmatpush3.msra.mxu0 %v2380_v3  ;;  %v2401_v3 = vld [vmem:[%s3543_s2 + $0xc8] sm:$0xff] }
 0x39d   :  { %2934 = vmatprep.subr.bf16.mxu0 %v3058_v5 }
 0x39f   :  { %2665 = vmatmul.mubr.msk.f32.gmra.mrb[8].mxu0 %vm127_vm2, %v2353_v50 }
 0x3a0   :  { %2667 = vmatprep.mubr.msk.f32.mxu0 %vm3057_vm1, %v3056_v0 }
 0x3a3   :  { %2668 = vmatmul.mubr.msk.f32.gmra.mrb[10].mxu0 %vm127_vm2, %v2354_v51 }
 0x3a4   :  { %2713 = vmatprep.mubr.msk.f32.mxu0 %vm3057_vm1, %v3056_v0 }
 0x46e   :  { %v581_v52 = vpop.f32.mrb[6].mxu0 }
 0x46f   :  { %v2663_v53 = vpop.f32.mrb[7].mxu0  ;;  %2673 = vmatmul.mubr.msk.f32.vlgmr.msra.gmra.mrb[12].mxu1 %vm18_vm0, %v581_v52 }
 0x470   :  { %2675 = vmatprep.mubr.msk.f32.mxu1 %vm3057_vm1, %v3056_v0 }
 0x472   :  { %v586_v54 = vpop.f32.mrb[8].mxu0 }
 0x473   :  { %v2666_v55 = vpop.f32.mrb[9].mxu0  ;;  %2676 = vmatmul.mubr.msk.f32.gmra.mrb[14].mxu1 %vm18_vm0, %v586_v54 }
 0x474   :  { %2678 = vmatprep.mubr.msk.f32.mxu1 %vm3057_vm1, %v3056_v0 }
 0x476   :  { %v591_v56 = vpop.f32.mrb[10].mxu0 }
 0x477   :  { %v2669_v57 = vpop.f32.mrb[11].mxu0  ;;  %2679 = vmatmul.mubr.msk.f32.gmra.mrb[16].mxu1 %vm18_vm0, %v591_v56  ;;  %v2412_v56 = vld [vmem:[%s3541_s1 + $0x28] sm:$0xff] }
 0x478   :  { %2687 = vmatprep.mubr.msk.f32.mxu1 %vm3057_vm1, %v3056_v0 }
 0x542   :  { %v672_v58 = vpop.f32.mrb[12].mxu1 }
 0x543   :  { %v2674_v59 = vpop.f32.mrb[13].mxu1 }
 0x546   :  { %v677_v60 = vpop.f32.mrb[14].mxu1 }
 0x547   :  { %v3026_v61 = vpack.i.bf16 %v677_v60, %v672_v58  ;;  %v2932_v62 = vpack.c.bf16 %v677_v60, %v672_v58  ;;  %v2677_v63 = vpop.f32.mrb[15].mxu1 }
 0x548   :  { %v2404_v63 = vld [vmem:[%s3543_s2 + $0xe0] sm:$0xff] }
 0x549   :  { %3027 = vrot.lane.b32.xlu0 %v3026_v61, %s3059_s20  ;;  %v2403_v61 = vld [vmem:[%s3543_s2 + $0xd8] sm:$0xff] }
 0x54a   :  { %v682_v1 = vpop.f32.mrb[16].mxu1 }
 0x54b   :  { %701 = vrot.lane.b32.xlu1 %v682_v1, %s3059_s20  ;;  %v2680_v2 = vpop.f32.mrb[17].mxu1 }
 0x54c   :  { %v2400_v2 = vld [vmem:[%s3543_s2 + $0xc0] sm:$0xff] }
 0x5bb   :  { %v3028_v4 = vpop.permute.xlu0 %3027 }
 0x5bc   :  { %v3030_v6 = vunpack.i.h.bf16 %v3028_v4  ;;  %v3029_v7 = vunpack.i.l.bf16 %v3028_v4  ;;  %v2402_v4 = vld [vmem:[%s3543_s2 + $0xd0] sm:$0xff] }
 0x5bd   :  { %v702_v10 = vpop.permute.xlu1 %701 }
 0x5be   :  { %v2929_v8 = vpack.c.bf16 %v3030_v6, %v3029_v7 }
 0x5c0   :  { %2930 = vmatpush3.bf16.msra.mxu1 %v2929_v8 }
 0x5c1   :  { %2685 = vmatprep.subr.mxu1 %v3056_v0 }
 0x5c4   :  { %2686 = vmatpush3.msra.mxu1 %v702_v10 }
 0x5c5   :  { %2688 = vmatmul.mubr.msk.f32.vlgmr.msra.gmra.mrb[18].mxu1 %vm127_vm2, %v2371_v9  ;;  %2931 = vmatprep.subr.bf16.mxu1 %v3058_v5 }
 0x5c6   :  { %2933 = vmatpush3.bf16.msra.mxu1 %v2932_v62  ;;  %2690 = vmatprep.mubr.msk.f32.mxu1 %vm3057_vm1, %v3056_v0 }
 0x5c7   :  { %2700 = vmatprep.subr.mxu1 %v3056_v0 }
 0x5c9   :  { %2691 = vmatmul.mubr.msk.f32.gmra.mrb[20].mxu1 %vm127_vm2, %v2372_v11 }
 0x5ca   :  { %2701 = vmatpush3.msra.mxu1 %v682_v1  ;;  %2693 = vmatprep.mubr.msk.f32.mxu1 %vm3057_vm1, %v3056_v0  ;;  %v2405_v1 = vld [vmem:[%s3543_s2 + $0xe8] sm:$0xff] }
 0x5cb   :  { %2752 = vmatprep.subr.mxu1 %v3056_v0 }
 0x5cd   :  { %2694 = vmatmul.mubr.msk.f32.gmra.mrb[22].mxu1 %vm127_vm2, %v2373_v12 }
 0x5ce   :  { %2702 = vmatprep.mubr.msk.f32.mxu1 %vm3057_vm1, %v3056_v0 }
 0x5d1   :  { %2703 = vmatmul.mubr.msk.f32.vlgmr.msra.gmra.mrb[18].mxu1 %vm127_vm2, %v2368_v13 }
 0x5d2   :  { %2705 = vmatprep.mubr.msk.f32.mxu1 %vm3057_vm1, %v3056_v0  ;;  %2753 = vmatpush3.msra.mxu1 %v2396_v30  ;;  %v2417_v30 = vld [vmem:[%s3543_s2 + $0xf8] sm:$0xff] }
 0x5d3   :  { %2940 = vmatprep.subr.bf16.mxu1 %v3058_v5 }
 0x5d5   :  { %2706 = vmatmul.mubr.msk.f32.gmra.mrb[20].mxu1 %vm127_vm2, %v2369_v14 }
 0x5d6   :  { %2708 = vmatprep.mubr.msk.f32.mxu1 %vm3057_vm1, %v3056_v0 }
 0x5d9   :  { %2709 = vmatmul.mubr.msk.f32.gmra.mrb[22].mxu1 %vm127_vm2, %v2370_v15 }
 0x5da   :  { %2754 = vmatprep.mubr.msk.f32.mxu1 %vm3057_vm1, %v3056_v0 }
 0x6a4   :  { %v870_v16 = vpop.f32.mrb[18].mxu1 }
 0x6a5   :  { %v2704_v17 = vpop.f32.mrb[19].mxu1  ;;  %2714 = vmatmul.mubr.msk.f32.vlgmr.msra.gmra.mrb[12].mxu0 %vm18_vm0, %v870_v16 }
 0x6a6   :  { %2716 = vmatprep.mubr.msk.f32.mxu0 %vm3057_vm1, %v3056_v0 }
 0x6a8   :  { %v875_v18 = vpop.f32.mrb[20].mxu1 }
 0x6a9   :  { %v2707_v19 = vpop.f32.mrb[21].mxu1  ;;  %2717 = vmatmul.mubr.msk.f32.gmra.mrb[14].mxu0 %vm18_vm0, %v875_v18 }
 0x6aa   :  { %2719 = vmatprep.mubr.msk.f32.mxu0 %vm3057_vm1, %v3056_v0 }
 0x6ac   :  { %v880_v20 = vpop.f32.mrb[22].mxu1 }
 0x6ad   :  { %v2710_v21 = vpop.f32.mrb[23].mxu1  ;;  %2720 = vmatmul.mubr.msk.f32.gmra.mrb[16].mxu0 %vm18_vm0, %v880_v20  ;;  %v2428_v20 = vld [vmem:[%s3541_s1 + $0x30] sm:$0xff] }
 0x6ae   :  { %2728 = vmatprep.mubr.msk.f32.mxu0 %vm3057_vm1, %v3056_v0 }
 0x778   :  { %v961_v22 = vpop.f32.mrb[12].mxu0 }
 0x779   :  { %v2715_v23 = vpop.f32.mrb[13].mxu0 }
 0x77c   :  { %v966_v24 = vpop.f32.mrb[14].mxu0 }
 0x77d   :  { %v3031_v25 = vpack.i.bf16 %v966_v24, %v961_v22  ;;  %v2938_v26 = vpack.c.bf16 %v966_v24, %v961_v22  ;;  %v2718_v27 = vpop.f32.mrb[15].mxu0 }
 0x77e   :  { %v2420_v27 = vld [vmem:[%s3543_s2 + $0x110] sm:$0xff] }
 0x77f   :  { %3032 = vrot.lane.b32.xlu0 %v3031_v25, %s3059_s20  ;;  %v2419_v25 = vld [vmem:[%s3543_s2 + $0x108] sm:$0xff] }
 0x780   :  { %v971_v28 = vpop.f32.mrb[16].mxu0 }
 0x781   :  { %990 = vrot.lane.b32.xlu1 %v971_v28, %s3059_s20  ;;  %v2721_v29 = vpop.f32.mrb[17].mxu0 }
 0x782   :  { %v2416_v29 = vld [vmem:[%s3543_s2 + $0xf0] sm:$0xff] }
 0x7f1   :  { %v3033_v31 = vpop.permute.xlu0 %3032 }
 0x7f2   :  { %v3035_v32 = vunpack.i.h.bf16 %v3033_v31  ;;  %v3034_v33 = vunpack.i.l.bf16 %v3033_v31  ;;  %v2418_v31 = vld [vmem:[%s3543_s2 + $0x100] sm:$0xff] }
 0x7f3   :  { %v991_v36 = vpop.permute.xlu1 %990 }
 0x7f4   :  { %v2935_v34 = vpack.c.bf16 %v3035_v32, %v3034_v33 }
 0x7f6   :  { %2936 = vmatpush3.bf16.msra.mxu0 %v2935_v34 }
 0x7f7   :  { %2726 = vmatprep.subr.mxu0 %v3056_v0 }
 0x7fa   :  { %2727 = vmatpush3.msra.mxu0 %v991_v36 }
 0x7fb   :  { %2729 = vmatmul.mubr.msk.f32.vlgmr.msra.gmra.mrb[18].mxu0 %vm127_vm2, %v2387_v35  ;;  %2937 = vmatprep.subr.bf16.mxu0 %v3058_v5 }
 0x7fc   :  { %2939 = vmatpush3.bf16.msra.mxu0 %v2938_v26  ;;  %2731 = vmatprep.mubr.msk.f32.mxu0 %vm3057_vm1, %v3056_v0 }
 0x7fd   :  { %2741 = vmatprep.subr.mxu0 %v3056_v0 }
 0x7ff   :  { %2732 = vmatmul.mubr.msk.f32.gmra.mrb[20].mxu0 %vm127_vm2, %v2388_v37 }
 0x800   :  { %2742 = vmatpush3.msra.mxu0 %v971_v28  ;;  %2734 = vmatprep.mubr.msk.f32.mxu0 %vm3057_vm1, %v3056_v0  ;;  %v2421_v28 = vld [vmem:[%s3543_s2 + $0x118] sm:$0xff] }
 0x801   :  { %2793 = vmatprep.subr.mxu0 %v3056_v0 }
 0x803   :  { %2735 = vmatmul.mubr.msk.f32.gmra.mrb[22].mxu0 %vm127_vm2, %v2389_v38 }
 0x804   :  { %2743 = vmatprep.mubr.msk.f32.mxu0 %vm3057_vm1, %v3056_v0 }
 0x807   :  { %2744 = vmatmul.mubr.msk.f32.vlgmr.msra.gmra.mrb[18].mxu0 %vm127_vm2, %v2384_v39 }
 0x808   :  { %2746 = vmatprep.mubr.msk.f32.mxu0 %vm3057_vm1, %v3056_v0  ;;  %2794 = vmatpush3.msra.mxu0 %v2412_v56  ;;  %v2433_v56 = vld [vmem:[%s3543_s2 + $0x128] sm:$0xff] }
 0x809   :  { %2946 = vmatprep.subr.bf16.mxu0 %v3058_v5 }
 0x80b   :  { %2747 = vmatmul.mubr.msk.f32.gmra.mrb[20].mxu0 %vm127_vm2, %v2385_v40 }
 0x80c   :  { %2749 = vmatprep.mubr.msk.f32.mxu0 %vm3057_vm1, %v3056_v0 }
 0x80f   :  { %2750 = vmatmul.mubr.msk.f32.gmra.mrb[22].mxu0 %vm127_vm2, %v2386_v41 }
 0x810   :  { %2795 = vmatprep.mubr.msk.f32.mxu0 %vm3057_vm1, %v3056_v0 }
 0x8da   :  { %v1159_v42 = vpop.f32.mrb[18].mxu0 }
 0x8db   :  { %v2745_v43 = vpop.f32.mrb[19].mxu0  ;;  %2755 = vmatmul.mubr.msk.f32.vlgmr.msra.gmra.mrb[24].mxu1 %vm18_vm0, %v1159_v42 }
 0x8dc   :  { %2757 = vmatprep.mubr.msk.f32.mxu1 %vm3057_vm1, %v3056_v0 }
 0x8de   :  { %v1164_v44 = vpop.f32.mrb[20].mxu0 }
 0x8df   :  { %v2748_v45 = vpop.f32.mrb[21].mxu0  ;;  %2758 = vmatmul.mubr.msk.f32.gmra.mrb[26].mxu1 %vm18_vm0, %v1164_v44 }
 0x8e0   :  { %2760 = vmatprep.mubr.msk.f32.mxu1 %vm3057_vm1, %v3056_v0 }
 0x8e2   :  { %v1169_v46 = vpop.f32.mrb[22].mxu0 }
 0x8e3   :  { %v2751_v47 = vpop.f32.mrb[23].mxu0  ;;  %2761 = vmatmul.mubr.msk.f32.gmra.mrb[28].mxu1 %vm18_vm0, %v1169_v46  ;;  %v2444_v46 = vld [vmem:[%s3541_s1 + $0x38] sm:$0xff] }
 0x8e4   :  { %2769 = vmatprep.mubr.msk.f32.mxu1 %vm3057_vm1, %v3056_v0 }
 0x9ae   :  { %v1250_v48 = vpop.f32.mrb[24].mxu1 }
 0x9af   :  { %v2756_v49 = vpop.f32.mrb[25].mxu1 }
 0x9b2   :  { %v1255_v50 = vpop.f32.mrb[26].mxu1 }
 0x9b3   :  { %v3036_v51 = vpack.i.bf16 %v1255_v50, %v1250_v48  ;;  %v2944_v52 = vpack.c.bf16 %v1255_v50, %v1250_v48  ;;  %v2759_v53 = vpop.f32.mrb[27].mxu1 }
 0x9b4   :  { %v2436_v53 = vld [vmem:[%s3543_s2 + $0x140] sm:$0xff] }
 0x9b5   :  { %3037 = vrot.lane.b32.xlu0 %v3036_v51, %s3059_s20  ;;  %v2435_v51 = vld [vmem:[%s3543_s2 + $0x138] sm:$0xff] }
 0x9b6   :  { %v1260_v54 = vpop.f32.mrb[28].mxu1 }
 0x9b7   :  { %1279 = vrot.lane.b32.xlu1 %v1260_v54, %s3059_s20  ;;  %v2762_v55 = vpop.f32.mrb[29].mxu1 }
 0x9b8   :  { %v2432_v55 = vld [vmem:[%s3543_s2 + $0x120] sm:$0xff] }
 0xa27   :  { %v3038_v57 = vpop.permute.xlu0 %3037 }
 0xa28   :  { %v3040_v58 = vunpack.i.h.bf16 %v3038_v57  ;;  %v3039_v59 = vunpack.i.l.bf16 %v3038_v57  ;;  %v2434_v57 = vld [vmem:[%s3543_s2 + $0x130] sm:$0xff] }
 0xa29   :  { %v1280_v62 = vpop.permute.xlu1 %1279 }
 0xa2a   :  { %v2941_v60 = vpack.c.bf16 %v3040_v58, %v3039_v59 }
 0xa2c   :  { %2942 = vmatpush3.bf16.msra.mxu1 %v2941_v60 }
 0xa2d   :  { %2767 = vmatprep.subr.mxu1 %v3056_v0 }
 0xa30   :  { %2768 = vmatpush3.msra.mxu1 %v1280_v62 }
 0xa31   :  { %2770 = vmatmul.mubr.msk.f32.vlgmr.msra.gmra.mrb[30].mxu1 %vm127_vm2, %v2403_v61  ;;  %2943 = vmatprep.subr.bf16.mxu1 %v3058_v5 }
 0xa32   :  { %2945 = vmatpush3.bf16.msra.mxu1 %v2944_v52  ;;  %2772 = vmatprep.mubr.msk.f32.mxu1 %vm3057_vm1, %v3056_v0 }
 0xa33   :  { %2782 = vmatprep.subr.mxu1 %v3056_v0 }
 0xa35   :  { %2773 = vmatmul.mubr.msk.f32.gmra.mrb[32].mxu1 %vm127_vm2, %v2404_v63 }
 0xa36   :  { %2783 = vmatpush3.msra.mxu1 %v1260_v54  ;;  %2775 = vmatprep.mubr.msk.f32.mxu1 %vm3057_vm1, %v3056_v0  ;;  %v2437_v54 = vld [vmem:[%s3543_s2 + $0x148] sm:$0xff] }
 0xa37   :  { %2834 = vmatprep.subr.mxu1 %v3056_v0 }
 0xa39   :  { %2776 = vmatmul.mubr.msk.f32.gmra.mrb[34].mxu1 %vm127_vm2, %v2405_v1 }
 0xa3a   :  { %2784 = vmatprep.mubr.msk.f32.mxu1 %vm3057_vm1, %v3056_v0 }
 0xa3d   :  { %2785 = vmatmul.mubr.msk.f32.vlgmr.msra.gmra.mrb[30].mxu1 %vm127_vm2, %v2400_v2 }
 0xa3e   :  { %2787 = vmatprep.mubr.msk.f32.mxu1 %vm3057_vm1, %v3056_v0  ;;  %2835 = vmatpush3.msra.mxu1 %v2428_v20 }
 0xa3f   :  { %2952 = vmatprep.subr.bf16.mxu1 %v3058_v5 }
 0xa41   :  { %2788 = vmatmul.mubr.msk.f32.gmra.mrb[32].mxu1 %vm127_vm2, %v2401_v3 }
 0xa42   :  { %2790 = vmatprep.mubr.msk.f32.mxu1 %vm3057_vm1, %v3056_v0 }
 0xa45   :  { %2791 = vmatmul.mubr.msk.f32.gmra.mrb[34].mxu1 %vm127_vm2, %v2402_v4 }
 0xa46   :  { %2836 = vmatprep.mubr.msk.f32.mxu1 %vm3057_vm1, %v3056_v0 }
 0xb10   :  { %v1448_v6 = vpop.f32.mrb[30].mxu1 }
 0xb11   :  { %v2786_v7 = vpop.f32.mrb[31].mxu1  ;;  %2796 = vmatmul.mubr.msk.f32.vlgmr.msra.gmra.mrb[24].mxu0 %vm18_vm0, %v1448_v6 }
 0xb12   :  { %2798 = vmatprep.mubr.msk.f32.mxu0 %vm3057_vm1, %v3056_v0 }
 0xb14   :  { %v1453_v8 = vpop.f32.mrb[32].mxu1 }
 0xb15   :  { %v2789_v9 = vpop.f32.mrb[33].mxu1  ;;  %2799 = vmatmul.mubr.msk.f32.gmra.mrb[26].mxu0 %vm18_vm0, %v1453_v8 }
 0xb16   :  { %2801 = vmatprep.mubr.msk.f32.mxu0 %vm3057_vm1, %v3056_v0 }
 0xb18   :  { %v1458_v10 = vpop.f32.mrb[34].mxu1 }
 0xb19   :  { %v2792_v11 = vpop.f32.mrb[35].mxu1  ;;  %2802 = vmatmul.mubr.msk.f32.gmra.mrb[28].mxu0 %vm18_vm0, %v1458_v10 }
 0xb1a   :  { %2810 = vmatprep.mubr.msk.f32.mxu0 %vm3057_vm1, %v3056_v0 }
 0xbe4   :  { %v1539_v12 = vpop.f32.mrb[24].mxu0 }
 0xbe5   :  { %v2797_v13 = vpop.f32.mrb[25].mxu0 }
 0xbe8   :  { %v1544_v14 = vpop.f32.mrb[26].mxu0 }
 0xbe9   :  { %v3041_v15 = vpack.i.bf16 %v1544_v14, %v1539_v12  ;;  %v2950_v16 = vpack.c.bf16 %v1544_v14, %v1539_v12  ;;  %v2800_v17 = vpop.f32.mrb[27].mxu0  ;;  %v2451_v14 = vld [vmem:[%s3543_s2 + $0x168] sm:$0xff] }
 0xbea   :  { %v2448_v17 = vld [vmem:[%s3543_s2 + $0x150] sm:$0xff] }
 0xbeb   :  { %3042 = vrot.lane.b32.xlu0 %v3041_v15, %s3059_s20 }
 0xbec   :  { %v1549_v18 = vpop.f32.mrb[28].mxu0 }
 0xbed   :  { %1568 = vrot.lane.b32.xlu1 %v1549_v18, %s3059_s20  ;;  %v2803_v19 = vpop.f32.mrb[29].mxu0 }
 0xbee   :  { %v2450_v19 = vld [vmem:[%s3543_s2 + $0x160] sm:$0xff] }
 0xc5d   :  { %v3043_v21 = vpop.permute.xlu0 %3042 }
 0xc5e   :  { %v3045_v22 = vunpack.i.h.bf16 %v3043_v21  ;;  %v3044_v23 = vunpack.i.l.bf16 %v3043_v21 }
 0xc5f   :  { %v1569_v26 = vpop.permute.xlu1 %1568 }
 0xc60   :  { %v2947_v24 = vpack.c.bf16 %v3045_v22, %v3044_v23 }
 0xc62   :  { %2948 = vmatpush3.bf16.msra.mxu0 %v2947_v24 }
 0xc63   :  { %2808 = vmatprep.subr.mxu0 %v3056_v0 }
 0xc66   :  { %2809 = vmatpush3.msra.mxu0 %v1569_v26 }
 0xc67   :  { %2811 = vmatmul.mubr.msk.f32.vlgmr.msra.gmra.mrb[30].mxu0 %vm127_vm2, %v2419_v25  ;;  %2949 = vmatprep.subr.bf16.mxu0 %v3058_v5 }
 0xc68   :  { %2951 = vmatpush3.bf16.msra.mxu0 %v2950_v16  ;;  %2813 = vmatprep.mubr.msk.f32.mxu0 %vm3057_vm1, %v3056_v0  ;;  %v2452_v16 = vld [vmem:[%s3543_s2 + $0x170] sm:$0xff] }
 0xc69   :  { %2823 = vmatprep.subr.mxu0 %v3056_v0 }
 0xc6b   :  { %2814 = vmatmul.mubr.msk.f32.gmra.mrb[32].mxu0 %vm127_vm2, %v2420_v27 }
 0xc6c   :  { %2824 = vmatpush3.msra.mxu0 %v1549_v18  ;;  %2816 = vmatprep.mubr.msk.f32.mxu0 %vm3057_vm1, %v3056_v0  ;;  %v2449_v18 = vld [vmem:[%s3543_s2 + $0x158] sm:$0xff] }
 0xc6d   :  { %2875 = vmatprep.subr.mxu0 %v3056_v0 }
 0xc6f   :  { %2817 = vmatmul.mubr.msk.f32.gmra.mrb[34].mxu0 %vm127_vm2, %v2421_v28 }
 0xc70   :  { %2825 = vmatprep.mubr.msk.f32.mxu0 %vm3057_vm1, %v3056_v0 }
 0xc73   :  { %2826 = vmatmul.mubr.msk.f32.vlgmr.msra.gmra.mrb[30].mxu0 %vm127_vm2, %v2416_v29 }
 0xc74   :  { %2828 = vmatprep.mubr.msk.f32.mxu0 %vm3057_vm1, %v3056_v0  ;;  %2876 = vmatpush3.msra.mxu0 %v2444_v46 }
 0xc75   :  { %2958 = vmatprep.subr.bf16.mxu0 %v3058_v5 }
 0xc77   :  { %2829 = vmatmul.mubr.msk.f32.gmra.mrb[32].mxu0 %vm127_vm2, %v2417_v30 }
 0xc78   :  { %2831 = vmatprep.mubr.msk.f32.mxu0 %vm3057_vm1, %v3056_v0 }
 0xc7b   :  { %2832 = vmatmul.mubr.msk.f32.gmra.mrb[34].mxu0 %vm127_vm2, %v2418_v31 }
 0xc7c   :  { %2877 = vmatprep.mubr.msk.f32.mxu0 %vm3057_vm1, %v3056_v0 }
 0xd46   :  { %v1737_v32 = vpop.f32.mrb[30].mxu0 }
 0xd47   :  { %v2827_v33 = vpop.f32.mrb[31].mxu0  ;;  %2837 = vmatmul.mubr.msk.f32.vlgmr.msra.gmra.mrb[36].mxu1 %vm18_vm0, %v1737_v32 }
 0xd48   :  { %2839 = vmatprep.mubr.msk.f32.mxu1 %vm3057_vm1, %v3056_v0 }
 0xd4a   :  { %v1742_v34 = vpop.f32.mrb[32].mxu0 }
 0xd4b   :  { %v2830_v35 = vpop.f32.mrb[33].mxu0  ;;  %2840 = vmatmul.mubr.msk.f32.gmra.mrb[38].mxu1 %vm18_vm0, %v1742_v34 }
 0xd4c   :  { %2842 = vmatprep.mubr.msk.f32.mxu1 %vm3057_vm1, %v3056_v0 }
 0xd4e   :  { %v1747_v36 = vpop.f32.mrb[34].mxu0 }
 0xd4f   :  { %v2833_v37 = vpop.f32.mrb[35].mxu0  ;;  %2843 = vmatmul.mubr.msk.f32.gmra.mrb[40].mxu1 %vm18_vm0, %v1747_v36 }
 0xd50   :  { %2851 = vmatprep.mubr.msk.f32.mxu1 %vm3057_vm1, %v3056_v0 }
 0xe1a   :  { %v1828_v38 = vpop.f32.mrb[36].mxu1 }
 0xe1b   :  { %v2838_v39 = vpop.f32.mrb[37].mxu1 }
 0xe1e   :  { %v1833_v40 = vpop.f32.mrb[38].mxu1 }
 0xe1f   :  { %v3046_v41 = vpack.i.bf16 %v1833_v40, %v1828_v38  ;;  %v2956_v42 = vpack.c.bf16 %v1833_v40, %v1828_v38  ;;  %v2841_v43 = vpop.f32.mrb[39].mxu1 }
 0xe21   :  { %3047 = vrot.lane.b32.xlu0 %v3046_v41, %s3059_s20 }
 0xe22   :  { %v1838_v44 = vpop.f32.mrb[40].mxu1 }
 0xe23   :  { %1857 = vrot.lane.b32.xlu1 %v1838_v44, %s3059_s20  ;;  %v2844_v45 = vpop.f32.mrb[41].mxu1 }
 0xe93   :  { %v3048_v47 = vpop.permute.xlu0 %3047 }
 0xe94   :  { %v3050_v48 = vunpack.i.h.bf16 %v3048_v47  ;;  %v3049_v49 = vunpack.i.l.bf16 %v3048_v47 }
 0xe95   :  { %v1858_v52 = vpop.permute.xlu1 %1857 }
 0xe96   :  { %v2953_v50 = vpack.c.bf16 %v3050_v48, %v3049_v49 }
 0xe98   :  { %2954 = vmatpush3.bf16.msra.mxu1 %v2953_v50 }
 0xe99   :  { %2849 = vmatprep.subr.mxu1 %v3056_v0 }
 0xe9c   :  { %2850 = vmatpush3.msra.mxu1 %v1858_v52 }
 0xe9d   :  { %2852 = vmatmul.mubr.msk.f32.vlgmr.msra.gmra.mrb[42].mxu1 %vm127_vm2, %v2435_v51  ;;  %2955 = vmatprep.subr.bf16.mxu1 %v3058_v5 }
 0xe9e   :  { %2957 = vmatpush3.bf16.msra.mxu1 %v2956_v42  ;;  %2854 = vmatprep.mubr.msk.f32.mxu1 %vm3057_vm1, %v3056_v0 }
 0xe9f   :  { %2864 = vmatprep.subr.mxu1 %v3056_v0 }
 0xea1   :  { %2855 = vmatmul.mubr.msk.f32.gmra.mrb[44].mxu1 %vm127_vm2, %v2436_v53 }
 0xea2   :  { %2865 = vmatpush3.msra.mxu1 %v1838_v44  ;;  %2857 = vmatprep.mubr.msk.f32.mxu1 %vm3057_vm1, %v3056_v0 }
 0xea5   :  { %2858 = vmatmul.mubr.msk.f32.gmra.mrb[46].mxu1 %vm127_vm2, %v2437_v54 }
 0xea6   :  { %2866 = vmatprep.mubr.msk.f32.mxu1 %vm3057_vm1, %v3056_v0 }
 0xea9   :  { %2867 = vmatmul.mubr.msk.f32.vlgmr.msra.gmra.mrb[42].mxu1 %vm127_vm2, %v2432_v55 }
 0xeaa   :  { %2869 = vmatprep.mubr.msk.f32.mxu1 %vm3057_vm1, %v3056_v0 }
 0xead   :  { %2870 = vmatmul.mubr.msk.f32.gmra.mrb[44].mxu1 %vm127_vm2, %v2433_v56 }
 0xeae   :  { %2872 = vmatprep.mubr.msk.f32.mxu1 %vm3057_vm1, %v3056_v0 }
 0xeb1   :  { %2873 = vmatmul.mubr.msk.f32.gmra.mrb[46].mxu1 %vm127_vm2, %v2434_v57 }
 0xf7c   :  { %v2026_v58 = vpop.f32.mrb[42].mxu1 }
 0xf7d   :  { %v2868_v59 = vpop.f32.mrb[43].mxu1  ;;  %2878 = vmatmul.mubr.msk.f32.vlgmr.msra.gmra.mrb[36].mxu0 %vm18_vm0, %v2026_v58 }
 0xf7e   :  { %2880 = vmatprep.mubr.msk.f32.mxu0 %vm3057_vm1, %v3056_v0 }
 0xf80   :  { %v2031_v60 = vpop.f32.mrb[44].mxu1 }
 0xf81   :  { %v2871_v61 = vpop.f32.mrb[45].mxu1  ;;  %2881 = vmatmul.mubr.msk.f32.gmra.mrb[38].mxu0 %vm18_vm0, %v2031_v60 }
 0xf82   :  { %2883 = vmatprep.mubr.msk.f32.mxu0 %vm3057_vm1, %v3056_v0 }
 0xf84   :  { %v2036_v62 = vpop.f32.mrb[46].mxu1 }
 0xf85   :  { %v2874_v63 = vpop.f32.mrb[47].mxu1  ;;  %2884 = vmatmul.mubr.msk.f32.gmra.mrb[40].mxu0 %vm18_vm0, %v2036_v62 }
 0xf86   :  { %2892 = vmatprep.mubr.msk.f32.mxu0 %vm3057_vm1, %v3056_v0 }
0x1050   :  { %v2117_v1 = vpop.f32.mrb[36].mxu0 }
0x1051   :  { %v2879_v2 = vpop.f32.mrb[37].mxu0 }
0x1054   :  { %v2122_v3 = vpop.f32.mrb[38].mxu0 }
0x1055   :  { %v3051_v4 = vpack.i.bf16 %v2122_v3, %v2117_v1  ;;  %v2962_v6 = vpack.c.bf16 %v2122_v3, %v2117_v1  ;;  %v2882_v7 = vpop.f32.mrb[39].mxu0 }
0x1057   :  { %3052 = vrot.lane.b32.xlu0 %v3051_v4, %s3059_s20 }
0x1058   :  { %v2127_v8 = vpop.f32.mrb[40].mxu0 }
0x1059   :  { %2146 = vrot.lane.b32.xlu1 %v2127_v8, %s3059_s20  ;;  %v2885_v9 = vpop.f32.mrb[41].mxu0 }
0x10c9   :  { %v3053_v10 = vpop.permute.xlu0 %3052 }
0x10ca   :  { %v3055_v11 = vunpack.i.h.bf16 %v3053_v10  ;;  %v3054_v12 = vunpack.i.l.bf16 %v3053_v10 }
0x10cb   :  { %v2147_v15 = vpop.permute.xlu1 %2146 }
0x10cc   :  { %v2959_v13 = vpack.c.bf16 %v3055_v11, %v3054_v12 }
0x10ce   :  { %2960 = vmatpush3.bf16.msra.mxu0 %v2959_v13 }
0x10cf   :  { %2890 = vmatprep.subr.mxu0 %v3056_v0 }
0x10d2   :  { %2891 = vmatpush3.msra.mxu0 %v2147_v15 }
0x10d3   :  { %2893 = vmatmul.mubr.msk.f32.vlgmr.msra.gmra.mrb[42].mxu0 %vm127_vm2, %v2451_v14  ;;  %2961 = vmatprep.subr.bf16.mxu0 %v3058_v5  ;;  %v2453_v5 = vld [vmem:[%s3543_s2 + $0x178] sm:$0xff] }
0x10d4   :  { %2963 = vmatpush3.bf16.msra.mxu0 %v2962_v6  ;;  %2895 = vmatprep.mubr.msk.f32.mxu0 %vm3057_vm1, %v3056_v0 }
0x10d5   :  { %2905 = vmatprep.subr.mxu0 %v3056_v0 }
0x10d7   :  { %2896 = vmatmul.mubr.msk.f32.gmra.mrb[44].mxu0 %vm127_vm2, %v2452_v16 }
0x10d8   :  { %2906 = vmatpush3.msra.mxu0 %v2127_v8  ;;  %2898 = vmatprep.mubr.msk.f32.mxu0 %vm3057_vm1, %v3056_v0 }
0x10db   :  { %2899 = vmatmul.mubr.msk.f32.gmra.mrb[46].mxu0 %vm127_vm2, %v2453_v5 }
0x10dc   :  { %2907 = vmatprep.mubr.msk.f32.mxu0 %vm3057_vm1, %v3056_v0 }
0x10df   :  { %2908 = vmatmul.mubr.msk.f32.vlgmr.msra.gmra.mrb[42].mxu0 %vm127_vm2, %v2448_v17 }
0x10e0   :  { %2910 = vmatprep.mubr.msk.f32.mxu0 %vm3057_vm1, %v3056_v0 }
0x10e3   :  { %2911 = vmatmul.mubr.msk.f32.gmra.mrb[44].mxu0 %vm127_vm2, %v2449_v18 }
0x10e4   :  { %2913 = vmatprep.mubr.msk.f32.mxu0 %vm3057_vm1, %v3056_v0 }
0x10e7   :  { %2914 = vmatmul.mubr.msk.f32.gmra.mrb[46].mxu0 %vm127_vm2, %v2450_v19 }
0x11b2   :  { %v2315_v20 = vpop.f32.mrb[42].mxu0 }
0x11b3   :  { %2329 = vst.msk [vmem:[%s3544_s3] sm:$0xff] %vm18_vm0, %v2315_v20  ;;  %v2909_v21 = vpop.f32.mrb[43].mxu0 }
0x11b6   :  { %v2320_v22 = vpop.f32.mrb[44].mxu0 }
0x11b7   :  { %2330 = vst.msk [vmem:[%s3544_s3 + $0x8] sm:$0xff] %vm18_vm0, %v2320_v22  ;;  %v2912_v0 = vpop.f32.mrb[45].mxu0 }
0x11ba   :  { %v2325_v23 = vpop.f32.mrb[46].mxu0 }
0x11bb   :  { %2331 = vst.msk [vmem:[%s3544_s3 + $0x10] sm:$0xff] %vm18_vm0, %v2325_v23  ;;  %v2915_v24 = vpop.f32.mrb[47].mxu0 }

</bundles_post_ra>
